<compile_context>
chip_gen: v7x
topology: tpu7x:2x2x1
jax: 0.10.0
libtpu: 0.0.40
codegen_flags: <defaults>
</compile_context>

<pallas_src>
import jax
import jax.numpy as jnp
from jax.experimental import pallas as pl
from jax.experimental.pallas import tpu as pltpu

# ---------------- config (small, lane-dense, consistent with the module's forward) ----------------
B = 2              # batch
IMG_C = 3          # image channels (NCHW)
IMG_HW = 16        # image spatial size
PATCH = 8          # patch size -> 2x2 = 4 patches
NP = (IMG_HW // PATCH) ** 2
TV = NP + 1        # vision tokens (cls + patches)
PDIM = IMG_C * PATCH * PATCH
DV = 128           # vision_cfg.width (lane-dense)
VH = 2             # vision attention heads
N_CAUSAL = 4       # vladapter_cfg.n_causal
C_HEADS = 2        # cformer attention heads
D_MODEL = 128      # decoder d_model (lane-dense)
DEC_H = 2          # decoder attention heads
VOCAB = 256        # decoder vocab
T = 8              # text length
L_DEC = N_CAUSAL + T
FFN = 256          # MLP hidden size
NEG_INF = -1e9


# ================================ in-kernel helpers ================================

def _bf16(x):
    return x.astype(jnp.bfloat16)


def _ln_f32(x, g, b, eps=1e-6):
    mu = jnp.mean(x, axis=-1, keepdims=True)
    xc = x - mu
    var = jnp.mean(xc * xc, axis=-1, keepdims=True)
    return xc * jax.lax.rsqrt(var + eps) * g + b


def _rms_f32(x, g, eps=1e-6):
    ms = jnp.mean(x * x, axis=-1, keepdims=True)
    return x * jax.lax.rsqrt(ms + eps) * g


def _gelu_tanh(x):
    # TODO(synk): reference ViT/cformer may use exact erf GELU; tanh approximation kept.
    c = 0.7978845608028654  # sqrt(2/pi)
    return 0.5 * x * (1.0 + jnp.tanh(c * (x + 0.044715 * x * x * x)))


def _silu(x):
    return x * (1.0 / (1.0 + jnp.exp(-x)))


def _softmax_rows(s):
    s = s - jnp.max(s, axis=-1, keepdims=True)
    e = jnp.exp(s)
    # approx reciprocal -> EUP slot (otherwise idle); divide effectively free.
    return e * pl.reciprocal(jnp.sum(e, axis=-1, keepdims=True), approx=True)


def _qkv_proj(x, wqkv, bqkv, n_heads):
    """Fused QKV projection; 1/sqrt(Dh) folded into q.  bf16 operands, f32 accumulate."""
    d = x.shape[-1]
    dh = d // n_heads
    qkv = jnp.dot(_bf16(x), wqkv, preferred_element_type=jnp.float32)
    if bqkv is not None:
        qkv = qkv + bqkv
    return qkv[:, :d] * (1.0 / (dh ** 0.5)), qkv[:, d:2 * d], qkv[:, 2 * d:]


def _attend(q, k, v, wo, bo, n_heads, mask_bool):
    """Multi-head attention on VMEM-resident values (q already scaled).

    Per-head scores/softmax/PV, then the head contexts are concatenated into one
    lane-dense (Tq, D) tensor and a single (Tq,D)x(D,D) output projection is issued
    (no per-head wo slices, no partial-sum adds)."""
    d = q.shape[-1]
    dh = d // n_heads
    ctx = []
    for h in range(n_heads):                       # tiny static unroll (2 heads)
        sl = slice(h * dh, (h + 1) * dh)
        # q @ k^T without an explicit transpose (contract last dims on the MXU).
        s = jax.lax.dot_general(_bf16(q[:, sl]), _bf16(k[:, sl]),
                                (((1,), (1,)), ((), ())),
                                preferred_element_type=jnp.float32)
        if mask_bool is not None:
            s = jnp.where(mask_bool, s, NEG_INF)
        p = _softmax_rows(s)                       # f32
        ctx.append(jnp.dot(_bf16(p), _bf16(v[:, sl]),
                           preferred_element_type=jnp.float32))
    ctx = jnp.concatenate(ctx, axis=-1)            # (Tq, D), lane-dense
    out = jnp.dot(_bf16(ctx), wo, preferred_element_type=jnp.float32)
    return out + bo if bo is not None else out


# ================================ fused kernel 1: vision + ln_visual + cformer ================================

def _vision_cformer_kernel(
        patches_ref, x0_ref, cq_ref, segvr_ref, segvc_ref, segqr_ref, segqc_ref,
        wp_ref,
        v_ln1g, v_ln1b, v_wqkv, v_bqkv, v_wo, v_bo, v_ln2g, v_ln2b,
        v_w1, v_b1, v_w2, v_b2,
        lnv_g, lnv_b,
        c_ln1g, c_ln1b, s_wqkv, s_bqkv, s_wo, s_bo, c_ln2g, c_ln2b,
        x_wq, x_bq, x_wkv, x_bkv, x_wo, x_bo, c_ln3g, c_ln3b,
        c_w1, c_b1, c_w2, c_b2, cp_w, cp_b,
        out_ref):
    # TODO(synk): single transformer block stands in for the full ViT / CausalFormer stacks.
    nq = cq_ref.shape[0]
    d = x0_ref.shape[1]

    # ---- attention masks built in-kernel (batch folded into rows -> block-diagonal) ----
    vis_mask = segvr_ref[...] == segvc_ref[...]                         # (Nv, Nv) same-batch
    rq = jax.lax.broadcasted_iota(jnp.int32, (nq, nq), 0)
    cc = jax.lax.broadcasted_iota(jnp.int32, (nq, nq), 1)
    self_mask = (segqr_ref[...] == segqc_ref[...]) & (rq >= cc)         # per-batch causal
    cross_mask = segqr_ref[...] == segvc_ref[...]                       # (Nq, Nv) same-batch

    # ---- visual.forward_features: patch embed (cls/pos/bias pre-folded into x0) + pre-LN block ----
    x = jnp.dot(patches_ref[...], wp_ref[...],
                preferred_element_type=jnp.float32) + x0_ref[...]       # (B*Tv, DV) f32
    h = _ln_f32(x, v_ln1g[...], v_ln1b[...])
    q, k, v = _qkv_proj(h, v_wqkv[...], v_bqkv[...], VH)
    x = x + _attend(q, k, v, v_wo[...], v_bo[...], VH, vis_mask)
    h = _ln_f32(x, v_ln2g[...], v_ln2b[...])
    hid = _gelu_tanh(jnp.dot(_bf16(h), v_w1[...],
                             preferred_element_type=jnp.float32) + v_b1[...])
    x = x + jnp.dot(_bf16(hid), v_w2[...], preferred_element_type=jnp.float32) + v_b2[...]

    # ---- ln_visual (keys/values of the cross-attention) ----
    feat = _ln_f32(x, lnv_g[...], lnv_b[...])                           # (B*Tv, DV)

    # ---- cformer: causal self-attn over the learned queries ----
    qx = cq_ref[...]                                                    # (B*Nc, DV)
    h = _ln_f32(qx, c_ln1g[...], c_ln1b[...])
    q, k, v = _qkv_proj(h, s_wqkv[...], s_bqkv[...], C_HEADS)
    qx = qx + _attend(q, k, v, s_wo[...], s_bo[...], C_HEADS, self_mask)

    # ---- cformer: cross-attn to the ln_visual'd image features ----
    h = _ln_f32(qx, c_ln2g[...], c_ln2b[...])
    dh = d // C_HEADS
    qq = (jnp.dot(_bf16(h), x_wq[...], preferred_element_type=jnp.float32)
          + x_bq[...]) * (1.0 / (dh ** 0.5))
    kv = jnp.dot(_bf16(feat), x_wkv[...], preferred_element_type=jnp.float32) + x_bkv[...]
    qx = qx + _attend(qq, kv[:, :d], kv[:, d:], x_wo[...], x_bo[...], C_HEADS, cross_mask)

    # ---- cformer: FFN + projection to decoder d_model ----
    h = _ln_f32(qx, c_ln3g[...], c_ln3b[...])
    hid = _gelu_tanh(jnp.dot(_bf16(h), c_w1[...],
                             preferred_element_type=jnp.float32) + c_b1[...])
    qx = qx + jnp.dot(_bf16(hid), c_w2[...], preferred_element_type=jnp.float32) + c_b2[...]
    out_ref[...] = (jnp.dot(_bf16(qx), cp_w[...], preferred_element_type=jnp.float32)
                    + cp_b[...]).astype(out_ref.dtype)                  # (B*Nc, D_MODEL)


# ================================ fused kernel 2: decoder + masked CE loss ================================

def _decoder_kernel(seq_ref, segr_ref, segc_ref, kv_ref, lbl_ref, w_ref,
                    an_ref, d_wqkv, d_wo, mn_ref, d_wgu, d_wd, fn_ref, lw_ref,
                    loss_ref):
    # TODO(synk): rotary position embeddings and the multi-layer LLaMA stack are omitted.
    seq = seq_ref[...]                                                  # (B*L, D) f32
    nl = seq.shape[0]
    row = jax.lax.broadcasted_iota(jnp.int32, (nl, nl), 0)
    col = jax.lax.broadcasted_iota(jnp.int32, (nl, nl), 1)
    allowed = (segr_ref[...] == segc_ref[...]) & (row >= col) & (kv_ref[...] > 0.0)

    # RMSNorm -> MHA -> +res
    h = _rms_f32(seq, an_ref[...])
    q, k, v = _qkv_proj(h, d_wqkv[...], None, DEC_H)
    seq = seq + _attend(q, k, v, d_wo[...], None, DEC_H, allowed)

    # RMSNorm -> SwiGLU MLP (fused gate/up) -> +res
    h = _rms_f32(seq, mn_ref[...])
    gu = jnp.dot(_bf16(h), d_wgu[...], preferred_element_type=jnp.float32)
    ffn = d_wgu.shape[1] // 2
    seq = seq + jnp.dot(_bf16(_silu(gu[:, :ffn]) * gu[:, ffn:]), d_wd[...],
                        preferred_element_type=jnp.float32)

    # final RMSNorm -> lm head -> masked CE -> single scalar loss (no host-side divide)
    h = _rms_f32(seq, fn_ref[...])
    # TODO(synk): at real vocab (32k) tile the lm head + online logsumexp instead of full logits.
    # TODO(synk): CE is position-for-position (text_output assumed pre-shifted); verify vs modeling_llama.
    logits = jnp.dot(_bf16(h), lw_ref[...], preferred_element_type=jnp.float32)  # (B*L, V)
    m = jnp.max(logits, axis=-1, keepdims=True)
    lse = jnp.log(jnp.sum(jnp.exp(logits - m), axis=-1, keepdims=True)) + m
    vio = jax.lax.broadcasted_iota(jnp.int32, logits.shape, 1)
    tgt = jnp.sum(jnp.where(vio == lbl_ref[...], logits, 0.0), axis=-1, keepdims=True)
    nll = (lse - tgt) * w_ref[...]                                      # (B*L, 1)
    num = jnp.sum(nll, axis=0, keepdims=True)                           # (1, 1)
    den = jnp.maximum(jnp.sum(w_ref[...], axis=0, keepdims=True), 1.0)  # (1, 1)
    loss_ref[...] = num / den


# ================================ pallas_call wrappers ================================

_VMEM_SPEC = pl.BlockSpec(memory_space=pltpu.MemorySpace.VMEM)


def _cost(flops, transcendentals, arrays, out_bytes):
    ba = int(sum(int(a.size) * a.dtype.itemsize for a in arrays)) + int(out_bytes)
    return pl.CostEstimate(flops=int(flops), transcendentals=int(transcendentals),
                           bytes_accessed=ba)


def vision_cformer(params, patches, x0t, cqt, segvr, segvc, segqr, segqc):
    p = params
    ops = (patches, x0t, cqt, segvr, segvc, segqr, segqc,
           p["v_patch_w"], p["v_ln1_g"], p["v_ln1_b"],
           p["v_attn"]["wqkv"], p["v_attn"]["bqkv"], p["v_attn"]["wo"], p["v_attn"]["bo"],
           p["v_ln2_g"], p["v_ln2_b"],
           p["v_mlp"]["w1"], p["v_mlp"]["b1"], p["v_mlp"]["w2"], p["v_mlp"]["b2"],
           p["ln_visual_g"], p["ln_visual_b"],
           p["c_ln1_g"], p["c_ln1_b"],
           p["c_self"]["wqkv"], p["c_self"]["bqkv"], p["c_self"]["wo"], p["c_self"]["bo"],
           p["c_ln2_g"], p["c_ln2_b"],
           p["c_cross"]["wq"], p["c_cross"]["bq"], p["c_cross"]["wkv"], p["c_cross"]["bkv"],
           p["c_cross"]["wo"], p["c_cross"]["bo"],
           p["c_ln3_g"], p["c_ln3_b"],
           p["c_mlp"]["w1"], p["c_mlp"]["b1"], p["c_mlp"]["w2"], p["c_mlp"]["b2"],
           p["c_proj_w"], p["c_proj_b"])
    nv, nq = x0t.shape[0], cqt.shape[0]
    flops = 2 * (nv * PDIM * DV + nv * DV * 3 * DV + 2 * nv * nv * DV + nv * DV * DV
                 + 2 * nv * DV * FFN
                 + nq * DV * 3 * DV + 2 * nq * nq * DV + nq * DV * DV
                 + nq * DV * DV + nv * DV * 2 * DV + 2 * nq * nv * DV + nq * DV * DV
                 + 2 * nq * DV * FFN + nq * DV * D_MODEL)
    transc = 2 * nv * nv + 2 * nq * nq + 2 * nq * nv + nv * FFN + nq * FFN
    return pl.pallas_call(
        _vision_cformer_kernel,
        out_shape=jax.ShapeDtypeStruct((nq, D_MODEL), jnp.float32),
        in_specs=[_VMEM_SPEC] * len(ops),
        out_specs=_VMEM_SPEC,
        cost_estimate=_cost(flops, transc, ops, nq * D_MODEL * 4),
    )(*ops)


def decoder_loss(params, seq, segr, segc, kvalid, labels, w):
    p = params
    ops = (seq, segr, segc, kvalid, labels, w,
           p["d_attn_norm"], p["d_attn"]["wqkv"], p["d_attn"]["wo"],
           p["d_mlp_norm"], p["d_mlp"]["wgu"], p["d_mlp"]["wd"],
           p["d_final_norm"], p["d_lmhead_w"])
    nl = seq.shape[0]
    flops = 2 * (nl * D_MODEL * 3 * D_MODEL + 2 * nl * nl * D_MODEL + nl * D_MODEL * D_MODEL
                 + nl * D_MODEL * 2 * FFN + nl * FFN * D_MODEL + nl * D_MODEL * VOCAB)
    transc = 2 * nl * nl + nl * FFN + nl * VOCAB
    return pl.pallas_call(
        _decoder_kernel,
        out_shape=jax.ShapeDtypeStruct((1, 1), jnp.float32),
        in_specs=[_VMEM_SPEC] * len(ops),
        out_specs=_VMEM_SPEC,
        cost_estimate=_cost(flops, transc, ops, 4),
    )(*ops)


# ================================ parameters ================================

def make_params(key):
    ks = iter(jax.random.split(key, 40))

    def nrm(shape, dtype=jnp.bfloat16, scale=0.02):
        # matmul weights stored bf16 (MXU-native, halves weight DMA); accumulation is f32.
        return (scale * jax.random.normal(next(ks), shape, jnp.float32)).astype(dtype)

    def zeros(shape):
        return jnp.zeros(shape, jnp.float32)

    def ones(shape):
        return jnp.ones(shape, jnp.float32)

    def attn_bias(d):   # ViT / cformer style: fused QKV, with biases
        return dict(wqkv=nrm((d, 3 * d)), bqkv=zeros((1, 3 * d)),
                    wo=nrm((d, d)), bo=zeros((1, d)))

    p = {}
    # ----- vision tower (_build_vision_tower, patch-embed ViT) -----
    p["v_patch_w"] = nrm((PDIM, DV))
    p["v_patch_b"] = zeros((1, DV))
    p["v_cls"] = nrm((1, DV), jnp.float32)
    p["v_pos"] = nrm((TV, DV), jnp.float32)
    p["v_ln1_g"], p["v_ln1_b"] = ones((1, DV)), zeros((1, DV))
    p["v_attn"] = attn_bias(DV)
    p["v_ln2_g"], p["v_ln2_b"] = ones((1, DV)), zeros((1, DV))
    p["v_mlp"] = dict(w1=nrm((DV, FFN)), b1=zeros((1, FFN)),
                      w2=nrm((FFN, DV)), b2=zeros((1, DV)))
    # ----- ln_visual: weight=1, bias=0 (as in __init__) -----
    p["ln_visual_g"], p["ln_visual_b"] = ones((1, DV)), zeros((1, DV))
    # ----- cformer (CausalFormer) -----
    p["c_query"] = nrm((N_CAUSAL, DV), jnp.float32)
    p["c_ln1_g"], p["c_ln1_b"] = ones((1, DV)), zeros((1, DV))
    p["c_self"] = attn_bias(DV)
    p["c_ln2_g"], p["c_ln2_b"] = ones((1, DV)), zeros((1, DV))
    p["c_cross"] = dict(wq=nrm((DV, DV)), bq=zeros((1, DV)),
                        wkv=nrm((DV, 2 * DV)), bkv=zeros((1, 2 * DV)),
                        wo=nrm((DV, DV)), bo=zeros((1, DV)))
    p["c_ln3_g"], p["c_ln3_b"] = ones((1, DV)), zeros((1, DV))
    p["c_mlp"] = dict(w1=nrm((DV, FFN)), b1=zeros((1, FFN)),
                      w2=nrm((FFN, DV)), b2=zeros((1, DV)))
    p["c_proj_w"] = nrm((DV, D_MODEL))
    p["c_proj_b"] = zeros((1, D_MODEL))
    # ----- decoder (LLaMAForClsAndRegression: LLaMA-style layer, no biases, + masked CE) -----
    p["d_embed"] = nrm((VOCAB, D_MODEL), jnp.float32)
    p["d_attn_norm"] = ones((1, D_MODEL))
    p["d_attn"] = dict(wqkv=nrm((D_MODEL, 3 * D_MODEL)), wo=nrm((D_MODEL, D_MODEL)))
    p["d_mlp_norm"] = ones((1, D_MODEL))
    p["d_mlp"] = dict(wgu=nrm((D_MODEL, 2 * FFN)), wd=nrm((FFN, D_MODEL)))
    p["d_final_norm"] = ones((1, D_MODEL))
    p["d_lmhead_w"] = nrm((D_MODEL, VOCAB))
    return p


# ================================ Emu forward ================================

def emu_forward(params, image, text_input, input_mask, text_output, output_mask):
    Bb = image.shape[0]
    g = IMG_HW // PATCH

    # -------- glue: im2col + cls/pos/bias pre-fold (everything else lives in the kernels) --------
    patches = image.reshape(Bb, IMG_C, g, PATCH, g, PATCH)
    patches = patches.transpose(0, 2, 4, 1, 3, 5).reshape(Bb, NP, PDIM)
    patches = jnp.concatenate([jnp.zeros((Bb, 1, PDIM), jnp.float32), patches], axis=1)
    patches = patches.reshape(Bb * TV, PDIM).astype(jnp.bfloat16)       # row 0/TV/...: cls slot

    x0 = jnp.concatenate(
        [params["v_cls"], jnp.broadcast_to(params["v_patch_b"], (NP, DV))], axis=0
    ) + params["v_pos"]                                                  # (Tv, DV)
    x0t = jnp.tile(x0, (Bb, 1))                                          # (B*Tv, DV)
    cqt = jnp.tile(params["c_query"], (Bb, 1))                           # (B*Nc, DV)

    seg_v = jnp.repeat(jnp.arange(Bb, dtype=jnp.int32), TV)
    seg_q = jnp.repeat(jnp.arange(Bb, dtype=jnp.int32), N_CAUSAL)

    # -------- fused: patch-embed + vision block + ln_visual + cformer --------
    img_embeds = vision_cformer(params, patches, x0t, cqt,
                                seg_v.reshape(-1, 1), seg_v.reshape(1, -1),
                                seg_q.reshape(-1, 1), seg_q.reshape(1, -1))
    img_embeds = img_embeds.reshape(Bb, N_CAUSAL, D_MODEL)

    # -------- fused: decoder layer + lm head + masked cross-entropy --------
    tok_embeds = params["d_embed"][text_input]                           # embedding gather (glue)
    seq = jnp.concatenate([img_embeds, tok_embeds], axis=1).reshape(Bb * L_DEC, D_MODEL)

    seg_d = jnp.repeat(jnp.arange(Bb, dtype=jnp.int32), L_DEC)
    kvalid = jnp.concatenate(
        [jnp.ones((Bb, N_CAUSAL), jnp.float32), input_mask.astype(jnp.float32)], axis=1
    ).reshape(1, Bb * L_DEC)
    labels = jnp.concatenate(
        [jnp.zeros((Bb, N_CAUSAL), jnp.int32), text_output.astype(jnp.int32)], axis=1
    ).reshape(Bb * L_DEC, 1)
    w = jnp.concatenate(
        [jnp.zeros((Bb, N_CAUSAL), jnp.float32), output_mask.astype(jnp.float32)], axis=1
    ).reshape(Bb * L_DEC, 1)

    loss = decoder_loss(params, seq, seg_d.reshape(-1, 1), seg_d.reshape(1, -1),
                        kvalid, labels, w)
    return loss[0, 0]


# ================================ main ================================

if __name__ == "__main__":
    key = jax.random.PRNGKey(0)
    kp, k1, k2, k3 = jax.random.split(key, 4)
    params = make_params(kp)

    image = jax.random.normal(k1, (B, IMG_C, IMG_HW, IMG_HW), jnp.float32)   # NCHW
    text_input = jax.random.randint(k2, (B, T), 0, VOCAB, dtype=jnp.int32)
    text_output = jax.random.randint(k3, (B, T), 0, VOCAB, dtype=jnp.int32)
    input_mask = jnp.ones((B, T), jnp.int32)
    output_mask = jnp.ones((B, T), jnp.int32)

    fwd = jax.jit(emu_forward)
    loss = jax.block_until_ready(
        fwd(params, image, text_input, input_mask, text_output, output_mask))
    assert loss.shape == () and bool(jnp.isfinite(loss))
    print("KERNEL_OK")
</pallas_src>

<mosaic_0001>
module attributes {stable_mosaic.version = 11 : i64} {
  func.func @_vision_cformer_kernel(%arg0: memref<10x192xbf16, #tpu.memory_space<vmem>>, %arg1: memref<10x128xf32, #tpu.memory_space<vmem>>, %arg2: memref<8x128xf32, #tpu.memory_space<vmem>>, %arg3: memref<10x1xi32, #tpu.memory_space<vmem>>, %arg4: memref<1x10xi32, #tpu.memory_space<vmem>>, %arg5: memref<8x1xi32, #tpu.memory_space<vmem>>, %arg6: memref<1x8xi32, #tpu.memory_space<vmem>>, %arg7: memref<192x128xbf16, #tpu.memory_space<vmem>>, %arg8: memref<1x128xf32, #tpu.memory_space<vmem>>, %arg9: memref<1x128xf32, #tpu.memory_space<vmem>>, %arg10: memref<128x384xbf16, #tpu.memory_space<vmem>>, %arg11: memref<1x384xf32, #tpu.memory_space<vmem>>, %arg12: memref<128x128xbf16, #tpu.memory_space<vmem>>, %arg13: memref<1x128xf32, #tpu.memory_space<vmem>>, %arg14: memref<1x128xf32, #tpu.memory_space<vmem>>, %arg15: memref<1x128xf32, #tpu.memory_space<vmem>>, %arg16: memref<128x256xbf16, #tpu.memory_space<vmem>>, %arg17: memref<1x256xf32, #tpu.memory_space<vmem>>, %arg18: memref<256x128xbf16, #tpu.memory_space<vmem>>, %arg19: memref<1x128xf32, #tpu.memory_space<vmem>>, %arg20: memref<1x128xf32, #tpu.memory_space<vmem>>, %arg21: memref<1x128xf32, #tpu.memory_space<vmem>>, %arg22: memref<1x128xf32, #tpu.memory_space<vmem>>, %arg23: memref<1x128xf32, #tpu.memory_space<vmem>>, %arg24: memref<128x384xbf16, #tpu.memory_space<vmem>>, %arg25: memref<1x384xf32, #tpu.memory_space<vmem>>, %arg26: memref<128x128xbf16, #tpu.memory_space<vmem>>, %arg27: memref<1x128xf32, #tpu.memory_space<vmem>>, %arg28: memref<1x128xf32, #tpu.memory_space<vmem>>, %arg29: memref<1x128xf32, #tpu.memory_space<vmem>>, %arg30: memref<128x128xbf16, #tpu.memory_space<vmem>>, %arg31: memref<1x128xf32, #tpu.memory_space<vmem>>, %arg32: memref<128x256xbf16, #tpu.memory_space<vmem>>, %arg33: memref<1x256xf32, #tpu.memory_space<vmem>>, %arg34: memref<128x128xbf16, #tpu.memory_space<vmem>>, %arg35: memref<1x128xf32, #tpu.memory_space<vmem>>, %arg36: memref<1x128xf32, #tpu.memory_space<vmem>>, %arg37: memref<1x128xf32, #tpu.memory_space<vmem>>, %arg38: memref<128x256xbf16, #tpu.memory_space<vmem>>, %arg39: memref<1x256xf32, #tpu.memory_space<vmem>>, %arg40: memref<256x128xbf16, #tpu.memory_space<vmem>>, %arg41: memref<1x128xf32, #tpu.memory_space<vmem>>, %arg42: memref<128x128xbf16, #tpu.memory_space<vmem>>, %arg43: memref<1x128xf32, #tpu.memory_space<vmem>>, %arg44: memref<8x128xf32, #tpu.memory_space<vmem>>) attributes {dimension_semantics = [], scalar_prefetch = 0 : i64, scratch_operands = 0 : i64, tpu.core_type = #tpu.core_type<tc>} {
    %c0 = arith.constant 0 : index
    %c0_0 = arith.constant 0 : index
    %0 = vector.load %arg3[%c0, %c0_0] : memref<10x1xi32, #tpu.memory_space<vmem>>, vector<10x1xi32>
    %c0_1 = arith.constant 0 : index
    %c0_2 = arith.constant 0 : index
    %1 = vector.load %arg4[%c0_1, %c0_2] : memref<1x10xi32, #tpu.memory_space<vmem>>, vector<1x10xi32>
    %2 = vector.broadcast %0 : vector<10x1xi32> to vector<10x10xi32>
    %3 = vector.broadcast %1 : vector<1x10xi32> to vector<10x10xi32>
    %4 = arith.cmpi eq, %2, %3 : vector<10x10xi32>
    %5 = tpu.iota {dimensions = array<i32: 0>} : vector<8x8xi32>
    %6 = tpu.iota {dimensions = array<i32: 1>} : vector<8x8xi32>
    %c0_3 = arith.constant 0 : index
    %c0_4 = arith.constant 0 : index
    %7 = vector.load %arg5[%c0_3, %c0_4] : memref<8x1xi32, #tpu.memory_space<vmem>>, vector<8x1xi32>
    %c0_5 = arith.constant 0 : index
    %c0_6 = arith.constant 0 : index
    %8 = vector.load %arg6[%c0_5, %c0_6] : memref<1x8xi32, #tpu.memory_space<vmem>>, vector<1x8xi32>
    %9 = vector.broadcast %7 : vector<8x1xi32> to vector<8x8xi32>
    %10 = vector.broadcast %8 : vector<1x8xi32> to vector<8x8xi32>
    %11 = arith.cmpi eq, %9, %10 : vector<8x8xi32>
    %12 = arith.cmpi sge, %5, %6 : vector<8x8xi32>
    %13 = arith.andi %11, %12 : vector<8x8xi1>
    %c0_7 = arith.constant 0 : index
    %c0_8 = arith.constant 0 : index
    %14 = vector.load %arg5[%c0_7, %c0_8] : memref<8x1xi32, #tpu.memory_space<vmem>>, vector<8x1xi32>
    %c0_9 = arith.constant 0 : index
    %c0_10 = arith.constant 0 : index
    %15 = vector.load %arg4[%c0_9, %c0_10] : memref<1x10xi32, #tpu.memory_space<vmem>>, vector<1x10xi32>
    %16 = vector.broadcast %14 : vector<8x1xi32> to vector<8x10xi32>
    %17 = vector.broadcast %15 : vector<1x10xi32> to vector<8x10xi32>
    %18 = arith.cmpi eq, %16, %17 : vector<8x10xi32>
    %c0_11 = arith.constant 0 : index
    %c0_12 = arith.constant 0 : index
    %19 = vector.load %arg0[%c0_11, %c0_12] : memref<10x192xbf16, #tpu.memory_space<vmem>>, vector<10x192xbf16>
    %c0_13 = arith.constant 0 : index
    %c0_14 = arith.constant 0 : index
    %20 = vector.load %arg7[%c0_13, %c0_14] : memref<192x128xbf16, #tpu.memory_space<vmem>>, vector<192x128xbf16>
    %cst = arith.constant dense<0.000000e+00> : vector<10x128xf32>
    %21 = tpu.matmul %19, %20, %cst {dimension_numbers = #tpu.dot_dimension_numbers<[1], [0], [0], [1], [0, 0, 1, 1], [], []>} : vector<10x192xbf16>, vector<192x128xbf16>, vector<10x128xf32> -> vector<10x128xf32>
    %c0_15 = arith.constant 0 : index
    %c0_16 = arith.constant 0 : index
    %22 = vector.load %arg1[%c0_15, %c0_16] : memref<10x128xf32, #tpu.memory_space<vmem>>, vector<10x128xf32>
    %23 = arith.addf %21, %22 : vector<10x128xf32>
    %c0_17 = arith.constant 0 : index
    %c0_18 = arith.constant 0 : index
    %24 = vector.load %arg8[%c0_17, %c0_18] : memref<1x128xf32, #tpu.memory_space<vmem>>, vector<1x128xf32>
    %c0_19 = arith.constant 0 : index
    %c0_20 = arith.constant 0 : index
    %25 = vector.load %arg9[%c0_19, %c0_20] : memref<1x128xf32, #tpu.memory_space<vmem>>, vector<1x128xf32>
    %cst_21 = arith.constant dense<0.000000e+00> : vector<10xf32>
    %26 = vector.multi_reduction <add>, %23, %cst_21 [1] : vector<10x128xf32> to vector<10xf32>
    %27 = vector.shape_cast %26 : vector<10xf32> to vector<10x1xf32>
    %cst_22 = arith.constant 1.280000e+02 : f32
    %28 = vector.broadcast %cst_22 : f32 to vector<10x1xf32>
    %29 = arith.divf %27, %28 : vector<10x1xf32>
    %30 = vector.broadcast %29 : vector<10x1xf32> to vector<10x128xf32>
    %31 = arith.subf %23, %30 : vector<10x128xf32>
    %32 = arith.mulf %31, %31 : vector<10x128xf32>
    %cst_23 = arith.constant dense<0.000000e+00> : vector<10xf32>
    %33 = vector.multi_reduction <add>, %32, %cst_23 [1] : vector<10x128xf32> to vector<10xf32>
    %34 = vector.shape_cast %33 : vector<10xf32> to vector<10x1xf32>
    %cst_24 = arith.constant 1.280000e+02 : f32
    %35 = vector.broadcast %cst_24 : f32 to vector<10x1xf32>
    %36 = arith.divf %34, %35 : vector<10x1xf32>
    %cst_25 = arith.constant 9.99999997E-7 : f32
    %37 = vector.broadcast %cst_25 : f32 to vector<10x1xf32>
    %38 = arith.addf %36, %37 : vector<10x1xf32>
    %39 = math.rsqrt %38 : vector<10x1xf32>
    %40 = vector.broadcast %39 : vector<10x1xf32> to vector<10x128xf32>
    %41 = arith.mulf %31, %40 : vector<10x128xf32>
    %42 = vector.broadcast %24 : vector<1x128xf32> to vector<10x128xf32>
    %43 = arith.mulf %41, %42 : vector<10x128xf32>
    %44 = vector.broadcast %25 : vector<1x128xf32> to vector<10x128xf32>
    %45 = arith.addf %43, %44 : vector<10x128xf32>
    %c0_26 = arith.constant 0 : index
    %c0_27 = arith.constant 0 : index
    %46 = vector.load %arg10[%c0_26, %c0_27] : memref<128x384xbf16, #tpu.memory_space<vmem>>, vector<128x384xbf16>
    %c0_28 = arith.constant 0 : index
    %c0_29 = arith.constant 0 : index
    %47 = vector.load %arg11[%c0_28, %c0_29] : memref<1x384xf32, #tpu.memory_space<vmem>>, vector<1x384xf32>
    %48 = arith.truncf %45 : vector<10x128xf32> to vector<10x128xbf16>
    %cst_30 = arith.constant dense<0.000000e+00> : vector<10x384xf32>
    %49 = tpu.matmul %48, %46, %cst_30 {dimension_numbers = #tpu.dot_dimension_numbers<[1], [0], [0], [1], [0, 0, 1, 1], [], []>} : vector<10x128xbf16>, vector<128x384xbf16>, vector<10x384xf32> -> vector<10x384xf32>
    %50 = vector.broadcast %47 : vector<1x384xf32> to vector<10x384xf32>
    %51 = arith.addf %49, %50 : vector<10x384xf32>
    %52 = vector.extract_strided_slice %51 {offsets = [0, 0], sizes = [10, 128], strides = [1, 1]} : vector<10x384xf32> to vector<10x128xf32>
    %cst_31 = arith.constant 1.250000e-01 : f32
    %53 = vector.broadcast %cst_31 : f32 to vector<10x128xf32>
    %54 = arith.mulf %52, %53 : vector<10x128xf32>
    %55 = vector.extract_strided_slice %51 {offsets = [0, 128], sizes = [10, 128], strides = [1, 1]} : vector<10x384xf32> to vector<10x128xf32>
    %56 = vector.extract_strided_slice %51 {offsets = [0, 256], sizes = [10, 128], strides = [1, 1]} : vector<10x384xf32> to vector<10x128xf32>
    %c0_32 = arith.constant 0 : index
    %c0_33 = arith.constant 0 : index
    %57 = vector.load %arg12[%c0_32, %c0_33] : memref<128x128xbf16, #tpu.memory_space<vmem>>, vector<128x128xbf16>
    %c0_34 = arith.constant 0 : index
    %c0_35 = arith.constant 0 : index
    %58 = vector.load %arg13[%c0_34, %c0_35] : memref<1x128xf32, #tpu.memory_space<vmem>>, vector<1x128xf32>
    %59 = vector.extract_strided_slice %54 {offsets = [0, 0], sizes = [10, 64], strides = [1, 1]} : vector<10x128xf32> to vector<10x64xf32>
    %60 = arith.truncf %59 : vector<10x64xf32> to vector<10x64xbf16>
    %61 = vector.extract_strided_slice %55 {offsets = [0, 0], sizes = [10, 64], strides = [1, 1]} : vector<10x128xf32> to vector<10x64xf32>
    %62 = arith.truncf %61 : vector<10x64xf32> to vector<10x64xbf16>
    %cst_36 = arith.constant dense<0.000000e+00> : vector<10x10xf32>
    %63 = tpu.matmul %60, %62, %cst_36 {dimension_numbers = #tpu.dot_dimension_numbers<[1], [1], [0], [0], [0, 0, 1, 0], [], []>} : vector<10x64xbf16>, vector<10x64xbf16>, vector<10x10xf32> -> vector<10x10xf32>
    %cst_37 = arith.constant -1.000000e+09 : f32
    %64 = vector.broadcast %cst_37 : f32 to vector<10x10xf32>
    %65 = arith.select %4, %63, %64 : vector<10x10xi1>, vector<10x10xf32>
    %cst_38 = arith.constant dense<0xFF800000> : vector<10xf32>
    %66 = vector.multi_reduction <maximumf>, %65, %cst_38 [1] : vector<10x10xf32> to vector<10xf32>
    %67 = vector.shape_cast %66 : vector<10xf32> to vector<10x1xf32>
    %68 = vector.broadcast %67 : vector<10x1xf32> to vector<10x10xf32>
    %69 = arith.subf %65, %68 : vector<10x10xf32>
    %70 = math.exp %69 : vector<10x10xf32>
    %cst_39 = arith.constant dense<0.000000e+00> : vector<10xf32>
    %71 = vector.multi_reduction <add>, %70, %cst_39 [1] : vector<10x10xf32> to vector<10xf32>
    %72 = vector.shape_cast %71 : vector<10xf32> to vector<10x1xf32>
    %73 = tpu.reciprocal %72 {approx = true} : vector<10x1xf32> -> vector<10x1xf32>
    %74 = vector.broadcast %73 : vector<10x1xf32> to vector<10x10xf32>
    %75 = arith.mulf %70, %74 : vector<10x10xf32>
    %76 = arith.truncf %75 : vector<10x10xf32> to vector<10x10xbf16>
    %77 = vector.extract_strided_slice %56 {offsets = [0, 0], sizes = [10, 64], strides = [1, 1]} : vector<10x128xf32> to vector<10x64xf32>
    %78 = arith.truncf %77 : vector<10x64xf32> to vector<10x64xbf16>
    %cst_40 = arith.constant dense<0.000000e+00> : vector<10x64xf32>
    %79 = tpu.matmul %76, %78, %cst_40 {dimension_numbers = #tpu.dot_dimension_numbers<[1], [0], [0], [1], [0, 0, 1, 1], [], []>} : vector<10x10xbf16>, vector<10x64xbf16>, vector<10x64xf32> -> vector<10x64xf32>
    %80 = vector.extract_strided_slice %54 {offsets = [0, 64], sizes = [10, 64], strides = [1, 1]} : vector<10x128xf32> to vector<10x64xf32>
    %81 = arith.truncf %80 : vector<10x64xf32> to vector<10x64xbf16>
    %82 = vector.extract_strided_slice %55 {offsets = [0, 64], sizes = [10, 64], strides = [1, 1]} : vector<10x128xf32> to vector<10x64xf32>
    %83 = arith.truncf %82 : vector<10x64xf32> to vector<10x64xbf16>
    %cst_41 = arith.constant dense<0.000000e+00> : vector<10x10xf32>
    %84 = tpu.matmul %81, %83, %cst_41 {dimension_numbers = #tpu.dot_dimension_numbers<[1], [1], [0], [0], [0, 0, 1, 0], [], []>} : vector<10x64xbf16>, vector<10x64xbf16>, vector<10x10xf32> -> vector<10x10xf32>
    %cst_42 = arith.constant -1.000000e+09 : f32
    %85 = vector.broadcast %cst_42 : f32 to vector<10x10xf32>
    %86 = arith.select %4, %84, %85 : vector<10x10xi1>, vector<10x10xf32>
    %cst_43 = arith.constant dense<0xFF800000> : vector<10xf32>
    %87 = vector.multi_reduction <maximumf>, %86, %cst_43 [1] : vector<10x10xf32> to vector<10xf32>
    %88 = vector.shape_cast %87 : vector<10xf32> to vector<10x1xf32>
    %89 = vector.broadcast %88 : vector<10x1xf32> to vector<10x10xf32>
    %90 = arith.subf %86, %89 : vector<10x10xf32>
    %91 = math.exp %90 : vector<10x10xf32>
    %cst_44 = arith.constant dense<0.000000e+00> : vector<10xf32>
    %92 = vector.multi_reduction <add>, %91, %cst_44 [1] : vector<10x10xf32> to vector<10xf32>
    %93 = vector.shape_cast %92 : vector<10xf32> to vector<10x1xf32>
    %94 = tpu.reciprocal %93 {approx = true} : vector<10x1xf32> -> vector<10x1xf32>
    %95 = vector.broadcast %94 : vector<10x1xf32> to vector<10x10xf32>
    %96 = arith.mulf %91, %95 : vector<10x10xf32>
    %97 = arith.truncf %96 : vector<10x10xf32> to vector<10x10xbf16>
    %98 = vector.extract_strided_slice %56 {offsets = [0, 64], sizes = [10, 64], strides = [1, 1]} : vector<10x128xf32> to vector<10x64xf32>
    %99 = arith.truncf %98 : vector<10x64xf32> to vector<10x64xbf16>
    %cst_45 = arith.constant dense<0.000000e+00> : vector<10x64xf32>
    %100 = tpu.matmul %97, %99, %cst_45 {dimension_numbers = #tpu.dot_dimension_numbers<[1], [0], [0], [1], [0, 0, 1, 1], [], []>} : vector<10x10xbf16>, vector<10x64xbf16>, vector<10x64xf32> -> vector<10x64xf32>
    %101 = tpu.concatenate %79, %100 in 1 : vector<10x64xf32>, vector<10x64xf32> -> vector<10x128xf32>
    %102 = arith.truncf %101 : vector<10x128xf32> to vector<10x128xbf16>
    %cst_46 = arith.constant dense<0.000000e+00> : vector<10x128xf32>
    %103 = tpu.matmul %102, %57, %cst_46 {dimension_numbers = #tpu.dot_dimension_numbers<[1], [0], [0], [1], [0, 0, 1, 1], [], []>} : vector<10x128xbf16>, vector<128x128xbf16>, vector<10x128xf32> -> vector<10x128xf32>
    %104 = vector.broadcast %58 : vector<1x128xf32> to vector<10x128xf32>
    %105 = arith.addf %103, %104 : vector<10x128xf32>
    %106 = arith.addf %23, %105 : vector<10x128xf32>
    %c0_47 = arith.constant 0 : index
    %c0_48 = arith.constant 0 : index
    %107 = vector.load %arg14[%c0_47, %c0_48] : memref<1x128xf32, #tpu.memory_space<vmem>>, vector<1x128xf32>
    %c0_49 = arith.constant 0 : index
    %c0_50 = arith.constant 0 : index
    %108 = vector.load %arg15[%c0_49, %c0_50] : memref<1x128xf32, #tpu.memory_space<vmem>>, vector<1x128xf32>
    %cst_51 = arith.constant dense<0.000000e+00> : vector<10xf32>
    %109 = vector.multi_reduction <add>, %106, %cst_51 [1] : vector<10x128xf32> to vector<10xf32>
    %110 = vector.shape_cast %109 : vector<10xf32> to vector<10x1xf32>
    %cst_52 = arith.constant 1.280000e+02 : f32
    %111 = vector.broadcast %cst_52 : f32 to vector<10x1xf32>
    %112 = arith.divf %110, %111 : vector<10x1xf32>
    %113 = vector.broadcast %112 : vector<10x1xf32> to vector<10x128xf32>
    %114 = arith.subf %106, %113 : vector<10x128xf32>
    %115 = arith.mulf %114, %114 : vector<10x128xf32>
    %cst_53 = arith.constant dense<0.000000e+00> : vector<10xf32>
    %116 = vector.multi_reduction <add>, %115, %cst_53 [1] : vector<10x128xf32> to vector<10xf32>
    %117 = vector.shape_cast %116 : vector<10xf32> to vector<10x1xf32>
    %cst_54 = arith.constant 1.280000e+02 : f32
    %118 = vector.broadcast %cst_54 : f32 to vector<10x1xf32>
    %119 = arith.divf %117, %118 : vector<10x1xf32>
    %cst_55 = arith.constant 9.99999997E-7 : f32
    %120 = vector.broadcast %cst_55 : f32 to vector<10x1xf32>
    %121 = arith.addf %119, %120 : vector<10x1xf32>
    %122 = math.rsqrt %121 : vector<10x1xf32>
    %123 = vector.broadcast %122 : vector<10x1xf32> to vector<10x128xf32>
    %124 = arith.mulf %114, %123 : vector<10x128xf32>
    %125 = vector.broadcast %107 : vector<1x128xf32> to vector<10x128xf32>
    %126 = arith.mulf %124, %125 : vector<10x128xf32>
    %127 = vector.broadcast %108 : vector<1x128xf32> to vector<10x128xf32>
    %128 = arith.addf %126, %127 : vector<10x128xf32>
    %129 = arith.truncf %128 : vector<10x128xf32> to vector<10x128xbf16>
    %c0_56 = arith.constant 0 : index
    %c0_57 = arith.constant 0 : index
    %130 = vector.load %arg16[%c0_56, %c0_57] : memref<128x256xbf16, #tpu.memory_space<vmem>>, vector<128x256xbf16>
    %cst_58 = arith.constant dense<0.000000e+00> : vector<10x256xf32>
    %131 = tpu.matmul %129, %130, %cst_58 {dimension_numbers = #tpu.dot_dimension_numbers<[1], [0], [0], [1], [0, 0, 1, 1], [], []>} : vector<10x128xbf16>, vector<128x256xbf16>, vector<10x256xf32> -> vector<10x256xf32>
    %c0_59 = arith.constant 0 : index
    %c0_60 = arith.constant 0 : index
    %132 = vector.load %arg17[%c0_59, %c0_60] : memref<1x256xf32, #tpu.memory_space<vmem>>, vector<1x256xf32>
    %133 = vector.broadcast %132 : vector<1x256xf32> to vector<10x256xf32>
    %134 = arith.addf %131, %133 : vector<10x256xf32>
    %cst_61 = arith.constant 5.000000e-01 : f32
    %135 = vector.broadcast %cst_61 : f32 to vector<10x256xf32>
    %136 = arith.mulf %135, %134 : vector<10x256xf32>
    %cst_62 = arith.constant 4.471500e-02 : f32
    %137 = vector.broadcast %cst_62 : f32 to vector<10x256xf32>
    %138 = arith.mulf %137, %134 : vector<10x256xf32>
    %139 = arith.mulf %138, %134 : vector<10x256xf32>
    %140 = arith.mulf %139, %134 : vector<10x256xf32>
    %141 = arith.addf %134, %140 : vector<10x256xf32>
    %cst_63 = arith.constant 0.797884583 : f32
    %142 = vector.broadcast %cst_63 : f32 to vector<10x256xf32>
    %143 = arith.mulf %142, %141 : vector<10x256xf32>
    %144 = math.tanh %143 : vector<10x256xf32>
    %cst_64 = arith.constant 1.000000e+00 : f32
    %145 = vector.broadcast %cst_64 : f32 to vector<10x256xf32>
    %146 = arith.addf %145, %144 : vector<10x256xf32>
    %147 = arith.mulf %136, %146 : vector<10x256xf32>
    %148 = arith.truncf %147 : vector<10x256xf32> to vector<10x256xbf16>
    %c0_65 = arith.constant 0 : index
    %c0_66 = arith.constant 0 : index
    %149 = vector.load %arg18[%c0_65, %c0_66] : memref<256x128xbf16, #tpu.memory_space<vmem>>, vector<256x128xbf16>
    %cst_67 = arith.constant dense<0.000000e+00> : vector<10x128xf32>
    %150 = tpu.matmul %148, %149, %cst_67 {dimension_numbers = #tpu.dot_dimension_numbers<[1], [0], [0], [1], [0, 0, 1, 1], [], []>} : vector<10x256xbf16>, vector<256x128xbf16>, vector<10x128xf32> -> vector<10x128xf32>
    %151 = arith.addf %106, %150 : vector<10x128xf32>
    %c0_68 = arith.constant 0 : index
    %c0_69 = arith.constant 0 : index
    %152 = vector.load %arg19[%c0_68, %c0_69] : memref<1x128xf32, #tpu.memory_space<vmem>>, vector<1x128xf32>
    %153 = vector.broadcast %152 : vector<1x128xf32> to vector<10x128xf32>
    %154 = arith.addf %151, %153 : vector<10x128xf32>
    %c0_70 = arith.constant 0 : index
    %c0_71 = arith.constant 0 : index
    %155 = vector.load %arg20[%c0_70, %c0_71] : memref<1x128xf32, #tpu.memory_space<vmem>>, vector<1x128xf32>
    %c0_72 = arith.constant 0 : index
    %c0_73 = arith.constant 0 : index
    %156 = vector.load %arg21[%c0_72, %c0_73] : memref<1x128xf32, #tpu.memory_space<vmem>>, vector<1x128xf32>
    %cst_74 = arith.constant dense<0.000000e+00> : vector<10xf32>
    %157 = vector.multi_reduction <add>, %154, %cst_74 [1] : vector<10x128xf32> to vector<10xf32>
    %158 = vector.shape_cast %157 : vector<10xf32> to vector<10x1xf32>
    %cst_75 = arith.constant 1.280000e+02 : f32
    %159 = vector.broadcast %cst_75 : f32 to vector<10x1xf32>
    %160 = arith.divf %158, %159 : vector<10x1xf32>
    %161 = vector.broadcast %160 : vector<10x1xf32> to vector<10x128xf32>
    %162 = arith.subf %154, %161 : vector<10x128xf32>
    %163 = arith.mulf %162, %162 : vector<10x128xf32>
    %cst_76 = arith.constant dense<0.000000e+00> : vector<10xf32>
    %164 = vector.multi_reduction <add>, %163, %cst_76 [1] : vector<10x128xf32> to vector<10xf32>
    %165 = vector.shape_cast %164 : vector<10xf32> to vector<10x1xf32>
    %cst_77 = arith.constant 1.280000e+02 : f32
    %166 = vector.broadcast %cst_77 : f32 to vector<10x1xf32>
    %167 = arith.divf %165, %166 : vector<10x1xf32>
    %cst_78 = arith.constant 9.99999997E-7 : f32
    %168 = vector.broadcast %cst_78 : f32 to vector<10x1xf32>
    %169 = arith.addf %167, %168 : vector<10x1xf32>
    %170 = math.rsqrt %169 : vector<10x1xf32>
    %171 = vector.broadcast %170 : vector<10x1xf32> to vector<10x128xf32>
    %172 = arith.mulf %162, %171 : vector<10x128xf32>
    %173 = vector.broadcast %155 : vector<1x128xf32> to vector<10x128xf32>
    %174 = arith.mulf %172, %173 : vector<10x128xf32>
    %175 = vector.broadcast %156 : vector<1x128xf32> to vector<10x128xf32>
    %176 = arith.addf %174, %175 : vector<10x128xf32>
    %c0_79 = arith.constant 0 : index
    %c0_80 = arith.constant 0 : index
    %177 = vector.load %arg2[%c0_79, %c0_80] : memref<8x128xf32, #tpu.memory_space<vmem>>, vector<8x128xf32>
    %c0_81 = arith.constant 0 : index
    %c0_82 = arith.constant 0 : index
    %178 = vector.load %arg22[%c0_81, %c0_82] : memref<1x128xf32, #tpu.memory_space<vmem>>, vector<1x128xf32>
    %c0_83 = arith.constant 0 : index
    %c0_84 = arith.constant 0 : index
    %179 = vector.load %arg23[%c0_83, %c0_84] : memref<1x128xf32, #tpu.memory_space<vmem>>, vector<1x128xf32>
    %cst_85 = arith.constant dense<0.000000e+00> : vector<8xf32>
    %180 = vector.multi_reduction <add>, %177, %cst_85 [1] : vector<8x128xf32> to vector<8xf32>
    %181 = vector.shape_cast %180 : vector<8xf32> to vector<8x1xf32>
    %cst_86 = arith.constant 1.280000e+02 : f32
    %182 = vector.broadcast %cst_86 : f32 to vector<8x1xf32>
    %183 = arith.divf %181, %182 : vector<8x1xf32>
    %184 = vector.broadcast %183 : vector<8x1xf32> to vector<8x128xf32>
    %185 = arith.subf %177, %184 : vector<8x128xf32>
    %186 = arith.mulf %185, %185 : vector<8x128xf32>
    %cst_87 = arith.constant dense<0.000000e+00> : vector<8xf32>
    %187 = vector.multi_reduction <add>, %186, %cst_87 [1] : vector<8x128xf32> to vector<8xf32>
    %188 = vector.shape_cast %187 : vector<8xf32> to vector<8x1xf32>
    %cst_88 = arith.constant 1.280000e+02 : f32
    %189 = vector.broadcast %cst_88 : f32 to vector<8x1xf32>
    %190 = arith.divf %188, %189 : vector<8x1xf32>
    %cst_89 = arith.constant 9.99999997E-7 : f32
    %191 = vector.broadcast %cst_89 : f32 to vector<8x1xf32>
    %192 = arith.addf %190, %191 : vector<8x1xf32>
    %193 = math.rsqrt %192 : vector<8x1xf32>
    %194 = vector.broadcast %193 : vector<8x1xf32> to vector<8x128xf32>
    %195 = arith.mulf %185, %194 : vector<8x128xf32>
    %196 = vector.broadcast %178 : vector<1x128xf32> to vector<8x128xf32>
    %197 = arith.mulf %195, %196 : vector<8x128xf32>
    %198 = vector.broadcast %179 : vector<1x128xf32> to vector<8x128xf32>
    %199 = arith.addf %197, %198 : vector<8x128xf32>
    %c0_90 = arith.constant 0 : index
    %c0_91 = arith.constant 0 : index
    %200 = vector.load %arg24[%c0_90, %c0_91] : memref<128x384xbf16, #tpu.memory_space<vmem>>, vector<128x384xbf16>
    %c0_92 = arith.constant 0 : index
    %c0_93 = arith.constant 0 : index
    %201 = vector.load %arg25[%c0_92, %c0_93] : memref<1x384xf32, #tpu.memory_space<vmem>>, vector<1x384xf32>
    %202 = arith.truncf %199 : vector<8x128xf32> to vector<8x128xbf16>
    %cst_94 = arith.constant dense<0.000000e+00> : vector<8x384xf32>
    %203 = tpu.matmul %202, %200, %cst_94 {dimension_numbers = #tpu.dot_dimension_numbers<[1], [0], [0], [1], [0, 0, 1, 1], [], []>} : vector<8x128xbf16>, vector<128x384xbf16>, vector<8x384xf32> -> vector<8x384xf32>
    %204 = vector.broadcast %201 : vector<1x384xf32> to vector<8x384xf32>
    %205 = arith.addf %203, %204 : vector<8x384xf32>
    %206 = vector.extract_strided_slice %205 {offsets = [0, 0], sizes = [8, 128], strides = [1, 1]} : vector<8x384xf32> to vector<8x128xf32>
    %cst_95 = arith.constant 1.250000e-01 : f32
    %207 = vector.broadcast %cst_95 : f32 to vector<8x128xf32>
    %208 = arith.mulf %206, %207 : vector<8x128xf32>
    %209 = vector.extract_strided_slice %205 {offsets = [0, 128], sizes = [8, 128], strides = [1, 1]} : vector<8x384xf32> to vector<8x128xf32>
    %210 = vector.extract_strided_slice %205 {offsets = [0, 256], sizes = [8, 128], strides = [1, 1]} : vector<8x384xf32> to vector<8x128xf32>
    %c0_96 = arith.constant 0 : index
    %c0_97 = arith.constant 0 : index
    %211 = vector.load %arg26[%c0_96, %c0_97] : memref<128x128xbf16, #tpu.memory_space<vmem>>, vector<128x128xbf16>
    %c0_98 = arith.constant 0 : index
    %c0_99 = arith.constant 0 : index
    %212 = vector.load %arg27[%c0_98, %c0_99] : memref<1x128xf32, #tpu.memory_space<vmem>>, vector<1x128xf32>
    %213 = vector.extract_strided_slice %208 {offsets = [0, 0], sizes = [8, 64], strides = [1, 1]} : vector<8x128xf32> to vector<8x64xf32>
    %214 = arith.truncf %213 : vector<8x64xf32> to vector<8x64xbf16>
    %215 = vector.extract_strided_slice %209 {offsets = [0, 0], sizes = [8, 64], strides = [1, 1]} : vector<8x128xf32> to vector<8x64xf32>
    %216 = arith.truncf %215 : vector<8x64xf32> to vector<8x64xbf16>
    %cst_100 = arith.constant dense<0.000000e+00> : vector<8x8xf32>
    %217 = tpu.matmul %214, %216, %cst_100 {dimension_numbers = #tpu.dot_dimension_numbers<[1], [1], [0], [0], [0, 0, 1, 0], [], []>} : vector<8x64xbf16>, vector<8x64xbf16>, vector<8x8xf32> -> vector<8x8xf32>
    %cst_101 = arith.constant -1.000000e+09 : f32
    %218 = vector.broadcast %cst_101 : f32 to vector<8x8xf32>
    %219 = arith.select %13, %217, %218 : vector<8x8xi1>, vector<8x8xf32>
    %cst_102 = arith.constant dense<0xFF800000> : vector<8xf32>
    %220 = vector.multi_reduction <maximumf>, %219, %cst_102 [1] : vector<8x8xf32> to vector<8xf32>
    %221 = vector.shape_cast %220 : vector<8xf32> to vector<8x1xf32>
    %222 = vector.broadcast %221 : vector<8x1xf32> to vector<8x8xf32>
    %223 = arith.subf %219, %222 : vector<8x8xf32>
    %224 = math.exp %223 : vector<8x8xf32>
    %cst_103 = arith.constant dense<0.000000e+00> : vector<8xf32>
    %225 = vector.multi_reduction <add>, %224, %cst_103 [1] : vector<8x8xf32> to vector<8xf32>
    %226 = vector.shape_cast %225 : vector<8xf32> to vector<8x1xf32>
    %227 = tpu.reciprocal %226 {approx = true} : vector<8x1xf32> -> vector<8x1xf32>
    %228 = vector.broadcast %227 : vector<8x1xf32> to vector<8x8xf32>
    %229 = arith.mulf %224, %228 : vector<8x8xf32>
    %230 = arith.truncf %229 : vector<8x8xf32> to vector<8x8xbf16>
    %231 = vector.extract_strided_slice %210 {offsets = [0, 0], sizes = [8, 64], strides = [1, 1]} : vector<8x128xf32> to vector<8x64xf32>
    %232 = arith.truncf %231 : vector<8x64xf32> to vector<8x64xbf16>
    %cst_104 = arith.constant dense<0.000000e+00> : vector<8x64xf32>
    %233 = tpu.matmul %230, %232, %cst_104 {dimension_numbers = #tpu.dot_dimension_numbers<[1], [0], [0], [1], [0, 0, 1, 1], [], []>} : vector<8x8xbf16>, vector<8x64xbf16>, vector<8x64xf32> -> vector<8x64xf32>
    %234 = vector.extract_strided_slice %208 {offsets = [0, 64], sizes = [8, 64], strides = [1, 1]} : vector<8x128xf32> to vector<8x64xf32>
    %235 = arith.truncf %234 : vector<8x64xf32> to vector<8x64xbf16>
    %236 = vector.extract_strided_slice %209 {offsets = [0, 64], sizes = [8, 64], strides = [1, 1]} : vector<8x128xf32> to vector<8x64xf32>
    %237 = arith.truncf %236 : vector<8x64xf32> to vector<8x64xbf16>
    %cst_105 = arith.constant dense<0.000000e+00> : vector<8x8xf32>
    %238 = tpu.matmul %235, %237, %cst_105 {dimension_numbers = #tpu.dot_dimension_numbers<[1], [1], [0], [0], [0, 0, 1, 0], [], []>} : vector<8x64xbf16>, vector<8x64xbf16>, vector<8x8xf32> -> vector<8x8xf32>
    %cst_106 = arith.constant -1.000000e+09 : f32
    %239 = vector.broadcast %cst_106 : f32 to vector<8x8xf32>
    %240 = arith.select %13, %238, %239 : vector<8x8xi1>, vector<8x8xf32>
    %cst_107 = arith.constant dense<0xFF800000> : vector<8xf32>
    %241 = vector.multi_reduction <maximumf>, %240, %cst_107 [1] : vector<8x8xf32> to vector<8xf32>
    %242 = vector.shape_cast %241 : vector<8xf32> to vector<8x1xf32>
    %243 = vector.broadcast %242 : vector<8x1xf32> to vector<8x8xf32>
    %244 = arith.subf %240, %243 : vector<8x8xf32>
    %245 = math.exp %244 : vector<8x8xf32>
    %cst_108 = arith.constant dense<0.000000e+00> : vector<8xf32>
    %246 = vector.multi_reduction <add>, %245, %cst_108 [1] : vector<8x8xf32> to vector<8xf32>
    %247 = vector.shape_cast %246 : vector<8xf32> to vector<8x1xf32>
    %248 = tpu.reciprocal %247 {approx = true} : vector<8x1xf32> -> vector<8x1xf32>
    %249 = vector.broadcast %248 : vector<8x1xf32> to vector<8x8xf32>
    %250 = arith.mulf %245, %249 : vector<8x8xf32>
    %251 = arith.truncf %250 : vector<8x8xf32> to vector<8x8xbf16>
    %252 = vector.extract_strided_slice %210 {offsets = [0, 64], sizes = [8, 64], strides = [1, 1]} : vector<8x128xf32> to vector<8x64xf32>
    %253 = arith.truncf %252 : vector<8x64xf32> to vector<8x64xbf16>
    %cst_109 = arith.constant dense<0.000000e+00> : vector<8x64xf32>
    %254 = tpu.matmul %251, %253, %cst_109 {dimension_numbers = #tpu.dot_dimension_numbers<[1], [0], [0], [1], [0, 0, 1, 1], [], []>} : vector<8x8xbf16>, vector<8x64xbf16>, vector<8x64xf32> -> vector<8x64xf32>
    %255 = tpu.concatenate %233, %254 in 1 : vector<8x64xf32>, vector<8x64xf32> -> vector<8x128xf32>
    %256 = arith.truncf %255 : vector<8x128xf32> to vector<8x128xbf16>
    %cst_110 = arith.constant dense<0.000000e+00> : vector<8x128xf32>
    %257 = tpu.matmul %256, %211, %cst_110 {dimension_numbers = #tpu.dot_dimension_numbers<[1], [0], [0], [1], [0, 0, 1, 1], [], []>} : vector<8x128xbf16>, vector<128x128xbf16>, vector<8x128xf32> -> vector<8x128xf32>
    %258 = vector.broadcast %212 : vector<1x128xf32> to vector<8x128xf32>
    %259 = arith.addf %257, %258 : vector<8x128xf32>
    %260 = arith.addf %177, %259 : vector<8x128xf32>
    %c0_111 = arith.constant 0 : index
    %c0_112 = arith.constant 0 : index
    %261 = vector.load %arg28[%c0_111, %c0_112] : memref<1x128xf32, #tpu.memory_space<vmem>>, vector<1x128xf32>
    %c0_113 = arith.constant 0 : index
    %c0_114 = arith.constant 0 : index
    %262 = vector.load %arg29[%c0_113, %c0_114] : memref<1x128xf32, #tpu.memory_space<vmem>>, vector<1x128xf32>
    %cst_115 = arith.constant dense<0.000000e+00> : vector<8xf32>
    %263 = vector.multi_reduction <add>, %260, %cst_115 [1] : vector<8x128xf32> to vector<8xf32>
    %264 = vector.shape_cast %263 : vector<8xf32> to vector<8x1xf32>
    %cst_116 = arith.constant 1.280000e+02 : f32
    %265 = vector.broadcast %cst_116 : f32 to vector<8x1xf32>
    %266 = arith.divf %264, %265 : vector<8x1xf32>
    %267 = vector.broadcast %266 : vector<8x1xf32> to vector<8x128xf32>
    %268 = arith.subf %260, %267 : vector<8x128xf32>
    %269 = arith.mulf %268, %268 : vector<8x128xf32>
    %cst_117 = arith.constant dense<0.000000e+00> : vector<8xf32>
    %270 = vector.multi_reduction <add>, %269, %cst_117 [1] : vector<8x128xf32> to vector<8xf32>
    %271 = vector.shape_cast %270 : vector<8xf32> to vector<8x1xf32>
    %cst_118 = arith.constant 1.280000e+02 : f32
    %272 = vector.broadcast %cst_118 : f32 to vector<8x1xf32>
    %273 = arith.divf %271, %272 : vector<8x1xf32>
    %cst_119 = arith.constant 9.99999997E-7 : f32
    %274 = vector.broadcast %cst_119 : f32 to vector<8x1xf32>
    %275 = arith.addf %273, %274 : vector<8x1xf32>
    %276 = math.rsqrt %275 : vector<8x1xf32>
    %277 = vector.broadcast %276 : vector<8x1xf32> to vector<8x128xf32>
    %278 = arith.mulf %268, %277 : vector<8x128xf32>
    %279 = vector.broadcast %261 : vector<1x128xf32> to vector<8x128xf32>
    %280 = arith.mulf %278, %279 : vector<8x128xf32>
    %281 = vector.broadcast %262 : vector<1x128xf32> to vector<8x128xf32>
    %282 = arith.addf %280, %281 : vector<8x128xf32>
    %283 = arith.truncf %282 : vector<8x128xf32> to vector<8x128xbf16>
    %c0_120 = arith.constant 0 : index
    %c0_121 = arith.constant 0 : index
    %284 = vector.load %arg30[%c0_120, %c0_121] : memref<128x128xbf16, #tpu.memory_space<vmem>>, vector<128x128xbf16>
    %cst_122 = arith.constant dense<0.000000e+00> : vector<8x128xf32>
    %285 = tpu.matmul %283, %284, %cst_122 {dimension_numbers = #tpu.dot_dimension_numbers<[1], [0], [0], [1], [0, 0, 1, 1], [], []>} : vector<8x128xbf16>, vector<128x128xbf16>, vector<8x128xf32> -> vector<8x128xf32>
    %c0_123 = arith.constant 0 : index
    %c0_124 = arith.constant 0 : index
    %286 = vector.load %arg31[%c0_123, %c0_124] : memref<1x128xf32, #tpu.memory_space<vmem>>, vector<1x128xf32>
    %287 = vector.broadcast %286 : vector<1x128xf32> to vector<8x128xf32>
    %288 = arith.addf %285, %287 : vector<8x128xf32>
    %cst_125 = arith.constant 1.250000e-01 : f32
    %289 = vector.broadcast %cst_125 : f32 to vector<8x128xf32>
    %290 = arith.mulf %288, %289 : vector<8x128xf32>
    %291 = arith.truncf %176 : vector<10x128xf32> to vector<10x128xbf16>
    %c0_126 = arith.constant 0 : index
    %c0_127 = arith.constant 0 : index
    %292 = vector.load %arg32[%c0_126, %c0_127] : memref<128x256xbf16, #tpu.memory_space<vmem>>, vector<128x256xbf16>
    %cst_128 = arith.constant dense<0.000000e+00> : vector<10x256xf32>
    %293 = tpu.matmul %291, %292, %cst_128 {dimension_numbers = #tpu.dot_dimension_numbers<[1], [0], [0], [1], [0, 0, 1, 1], [], []>} : vector<10x128xbf16>, vector<128x256xbf16>, vector<10x256xf32> -> vector<10x256xf32>
    %c0_129 = arith.constant 0 : index
    %c0_130 = arith.constant 0 : index
    %294 = vector.load %arg33[%c0_129, %c0_130] : memref<1x256xf32, #tpu.memory_space<vmem>>, vector<1x256xf32>
    %295 = vector.broadcast %294 : vector<1x256xf32> to vector<10x256xf32>
    %296 = arith.addf %293, %295 : vector<10x256xf32>
    %297 = vector.extract_strided_slice %296 {offsets = [0, 0], sizes = [10, 128], strides = [1, 1]} : vector<10x256xf32> to vector<10x128xf32>
    %298 = vector.extract_strided_slice %296 {offsets = [0, 128], sizes = [10, 128], strides = [1, 1]} : vector<10x256xf32> to vector<10x128xf32>
    %c0_131 = arith.constant 0 : index
    %c0_132 = arith.constant 0 : index
    %299 = vector.load %arg34[%c0_131, %c0_132] : memref<128x128xbf16, #tpu.memory_space<vmem>>, vector<128x128xbf16>
    %c0_133 = arith.constant 0 : index
    %c0_134 = arith.constant 0 : index
    %300 = vector.load %arg35[%c0_133, %c0_134] : memref<1x128xf32, #tpu.memory_space<vmem>>, vector<1x128xf32>
    %301 = vector.extract_strided_slice %290 {offsets = [0, 0], sizes = [8, 64], strides = [1, 1]} : vector<8x128xf32> to vector<8x64xf32>
    %302 = arith.truncf %301 : vector<8x64xf32> to vector<8x64xbf16>
    %303 = vector.extract_strided_slice %297 {offsets = [0, 0], sizes = [10, 64], strides = [1, 1]} : vector<10x128xf32> to vector<10x64xf32>
    %304 = arith.truncf %303 : vector<10x64xf32> to vector<10x64xbf16>
    %cst_135 = arith.constant dense<0.000000e+00> : vector<8x10xf32>
    %305 = tpu.matmul %302, %304, %cst_135 {dimension_numbers = #tpu.dot_dimension_numbers<[1], [1], [0], [0], [0, 0, 1, 0], [], []>} : vector<8x64xbf16>, vector<10x64xbf16>, vector<8x10xf32> -> vector<8x10xf32>
    %cst_136 = arith.constant -1.000000e+09 : f32
    %306 = vector.broadcast %cst_136 : f32 to vector<8x10xf32>
    %307 = arith.select %18, %305, %306 : vector<8x10xi1>, vector<8x10xf32>
    %cst_137 = arith.constant dense<0xFF800000> : vector<8xf32>
    %308 = vector.multi_reduction <maximumf>, %307, %cst_137 [1] : vector<8x10xf32> to vector<8xf32>
    %309 = vector.shape_cast %308 : vector<8xf32> to vector<8x1xf32>
    %310 = vector.broadcast %309 : vector<8x1xf32> to vector<8x10xf32>
    %311 = arith.subf %307, %310 : vector<8x10xf32>
    %312 = math.exp %311 : vector<8x10xf32>
    %cst_138 = arith.constant dense<0.000000e+00> : vector<8xf32>
    %313 = vector.multi_reduction <add>, %312, %cst_138 [1] : vector<8x10xf32> to vector<8xf32>
    %314 = vector.shape_cast %313 : vector<8xf32> to vector<8x1xf32>
    %315 = tpu.reciprocal %314 {approx = true} : vector<8x1xf32> -> vector<8x1xf32>
    %316 = vector.broadcast %315 : vector<8x1xf32> to vector<8x10xf32>
    %317 = arith.mulf %312, %316 : vector<8x10xf32>
    %318 = arith.truncf %317 : vector<8x10xf32> to vector<8x10xbf16>
    %319 = vector.extract_strided_slice %298 {offsets = [0, 0], sizes = [10, 64], strides = [1, 1]} : vector<10x128xf32> to vector<10x64xf32>
    %320 = arith.truncf %319 : vector<10x64xf32> to vector<10x64xbf16>
    %cst_139 = arith.constant dense<0.000000e+00> : vector<8x64xf32>
    %321 = tpu.matmul %318, %320, %cst_139 {dimension_numbers = #tpu.dot_dimension_numbers<[1], [0], [0], [1], [0, 0, 1, 1], [], []>} : vector<8x10xbf16>, vector<10x64xbf16>, vector<8x64xf32> -> vector<8x64xf32>
    %322 = vector.extract_strided_slice %290 {offsets = [0, 64], sizes = [8, 64], strides = [1, 1]} : vector<8x128xf32> to vector<8x64xf32>
    %323 = arith.truncf %322 : vector<8x64xf32> to vector<8x64xbf16>
    %324 = vector.extract_strided_slice %297 {offsets = [0, 64], sizes = [10, 64], strides = [1, 1]} : vector<10x128xf32> to vector<10x64xf32>
    %325 = arith.truncf %324 : vector<10x64xf32> to vector<10x64xbf16>
    %cst_140 = arith.constant dense<0.000000e+00> : vector<8x10xf32>
    %326 = tpu.matmul %323, %325, %cst_140 {dimension_numbers = #tpu.dot_dimension_numbers<[1], [1], [0], [0], [0, 0, 1, 0], [], []>} : vector<8x64xbf16>, vector<10x64xbf16>, vector<8x10xf32> -> vector<8x10xf32>
    %cst_141 = arith.constant -1.000000e+09 : f32
    %327 = vector.broadcast %cst_141 : f32 to vector<8x10xf32>
    %328 = arith.select %18, %326, %327 : vector<8x10xi1>, vector<8x10xf32>
    %cst_142 = arith.constant dense<0xFF800000> : vector<8xf32>
    %329 = vector.multi_reduction <maximumf>, %328, %cst_142 [1] : vector<8x10xf32> to vector<8xf32>
    %330 = vector.shape_cast %329 : vector<8xf32> to vector<8x1xf32>
    %331 = vector.broadcast %330 : vector<8x1xf32> to vector<8x10xf32>
    %332 = arith.subf %328, %331 : vector<8x10xf32>
    %333 = math.exp %332 : vector<8x10xf32>
    %cst_143 = arith.constant dense<0.000000e+00> : vector<8xf32>
    %334 = vector.multi_reduction <add>, %333, %cst_143 [1] : vector<8x10xf32> to vector<8xf32>
    %335 = vector.shape_cast %334 : vector<8xf32> to vector<8x1xf32>
    %336 = tpu.reciprocal %335 {approx = true} : vector<8x1xf32> -> vector<8x1xf32>
    %337 = vector.broadcast %336 : vector<8x1xf32> to vector<8x10xf32>
    %338 = arith.mulf %333, %337 : vector<8x10xf32>
    %339 = arith.truncf %338 : vector<8x10xf32> to vector<8x10xbf16>
    %340 = vector.extract_strided_slice %298 {offsets = [0, 64], sizes = [10, 64], strides = [1, 1]} : vector<10x128xf32> to vector<10x64xf32>
    %341 = arith.truncf %340 : vector<10x64xf32> to vector<10x64xbf16>
    %cst_144 = arith.constant dense<0.000000e+00> : vector<8x64xf32>
    %342 = tpu.matmul %339, %341, %cst_144 {dimension_numbers = #tpu.dot_dimension_numbers<[1], [0], [0], [1], [0, 0, 1, 1], [], []>} : vector<8x10xbf16>, vector<10x64xbf16>, vector<8x64xf32> -> vector<8x64xf32>
    %343 = tpu.concatenate %321, %342 in 1 : vector<8x64xf32>, vector<8x64xf32> -> vector<8x128xf32>
    %344 = arith.truncf %343 : vector<8x128xf32> to vector<8x128xbf16>
    %cst_145 = arith.constant dense<0.000000e+00> : vector<8x128xf32>
    %345 = tpu.matmul %344, %299, %cst_145 {dimension_numbers = #tpu.dot_dimension_numbers<[1], [0], [0], [1], [0, 0, 1, 1], [], []>} : vector<8x128xbf16>, vector<128x128xbf16>, vector<8x128xf32> -> vector<8x128xf32>
    %346 = vector.broadcast %300 : vector<1x128xf32> to vector<8x128xf32>
    %347 = arith.addf %345, %346 : vector<8x128xf32>
    %348 = arith.addf %260, %347 : vector<8x128xf32>
    %c0_146 = arith.constant 0 : index
    %c0_147 = arith.constant 0 : index
    %349 = vector.load %arg36[%c0_146, %c0_147] : memref<1x128xf32, #tpu.memory_space<vmem>>, vector<1x128xf32>
    %c0_148 = arith.constant 0 : index
    %c0_149 = arith.constant 0 : index
    %350 = vector.load %arg37[%c0_148, %c0_149] : memref<1x128xf32, #tpu.memory_space<vmem>>, vector<1x128xf32>
    %cst_150 = arith.constant dense<0.000000e+00> : vector<8xf32>
    %351 = vector.multi_reduction <add>, %348, %cst_150 [1] : vector<8x128xf32> to vector<8xf32>
    %352 = vector.shape_cast %351 : vector<8xf32> to vector<8x1xf32>
    %cst_151 = arith.constant 1.280000e+02 : f32
    %353 = vector.broadcast %cst_151 : f32 to vector<8x1xf32>
    %354 = arith.divf %352, %353 : vector<8x1xf32>
    %355 = vector.broadcast %354 : vector<8x1xf32> to vector<8x128xf32>
    %356 = arith.subf %348, %355 : vector<8x128xf32>
    %357 = arith.mulf %356, %356 : vector<8x128xf32>
    %cst_152 = arith.constant dense<0.000000e+00> : vector<8xf32>
    %358 = vector.multi_reduction <add>, %357, %cst_152 [1] : vector<8x128xf32> to vector<8xf32>
    %359 = vector.shape_cast %358 : vector<8xf32> to vector<8x1xf32>
    %cst_153 = arith.constant 1.280000e+02 : f32
    %360 = vector.broadcast %cst_153 : f32 to vector<8x1xf32>
    %361 = arith.divf %359, %360 : vector<8x1xf32>
    %cst_154 = arith.constant 9.99999997E-7 : f32
    %362 = vector.broadcast %cst_154 : f32 to vector<8x1xf32>
    %363 = arith.addf %361, %362 : vector<8x1xf32>
    %364 = math.rsqrt %363 : vector<8x1xf32>
    %365 = vector.broadcast %364 : vector<8x1xf32> to vector<8x128xf32>
    %366 = arith.mulf %356, %365 : vector<8x128xf32>
    %367 = vector.broadcast %349 : vector<1x128xf32> to vector<8x128xf32>
    %368 = arith.mulf %366, %367 : vector<8x128xf32>
    %369 = vector.broadcast %350 : vector<1x128xf32> to vector<8x128xf32>
    %370 = arith.addf %368, %369 : vector<8x128xf32>
    %371 = arith.truncf %370 : vector<8x128xf32> to vector<8x128xbf16>
    %c0_155 = arith.constant 0 : index
    %c0_156 = arith.constant 0 : index
    %372 = vector.load %arg38[%c0_155, %c0_156] : memref<128x256xbf16, #tpu.memory_space<vmem>>, vector<128x256xbf16>
    %cst_157 = arith.constant dense<0.000000e+00> : vector<8x256xf32>
    %373 = tpu.matmul %371, %372, %cst_157 {dimension_numbers = #tpu.dot_dimension_numbers<[1], [0], [0], [1], [0, 0, 1, 1], [], []>} : vector<8x128xbf16>, vector<128x256xbf16>, vector<8x256xf32> -> vector<8x256xf32>
    %c0_158 = arith.constant 0 : index
    %c0_159 = arith.constant 0 : index
    %374 = vector.load %arg39[%c0_158, %c0_159] : memref<1x256xf32, #tpu.memory_space<vmem>>, vector<1x256xf32>
    %375 = vector.broadcast %374 : vector<1x256xf32> to vector<8x256xf32>
    %376 = arith.addf %373, %375 : vector<8x256xf32>
    %cst_160 = arith.constant 5.000000e-01 : f32
    %377 = vector.broadcast %cst_160 : f32 to vector<8x256xf32>
    %378 = arith.mulf %377, %376 : vector<8x256xf32>
    %cst_161 = arith.constant 4.471500e-02 : f32
    %379 = vector.broadcast %cst_161 : f32 to vector<8x256xf32>
    %380 = arith.mulf %379, %376 : vector<8x256xf32>
    %381 = arith.mulf %380, %376 : vector<8x256xf32>
    %382 = arith.mulf %381, %376 : vector<8x256xf32>
    %383 = arith.addf %376, %382 : vector<8x256xf32>
    %cst_162 = arith.constant 0.797884583 : f32
    %384 = vector.broadcast %cst_162 : f32 to vector<8x256xf32>
    %385 = arith.mulf %384, %383 : vector<8x256xf32>
    %386 = math.tanh %385 : vector<8x256xf32>
    %cst_163 = arith.constant 1.000000e+00 : f32
    %387 = vector.broadcast %cst_163 : f32 to vector<8x256xf32>
    %388 = arith.addf %387, %386 : vector<8x256xf32>
    %389 = arith.mulf %378, %388 : vector<8x256xf32>
    %390 = arith.truncf %389 : vector<8x256xf32> to vector<8x256xbf16>
    %c0_164 = arith.constant 0 : index
    %c0_165 = arith.constant 0 : index
    %391 = vector.load %arg40[%c0_164, %c0_165] : memref<256x128xbf16, #tpu.memory_space<vmem>>, vector<256x128xbf16>
    %cst_166 = arith.constant dense<0.000000e+00> : vector<8x128xf32>
    %392 = tpu.matmul %390, %391, %cst_166 {dimension_numbers = #tpu.dot_dimension_numbers<[1], [0], [0], [1], [0, 0, 1, 1], [], []>} : vector<8x256xbf16>, vector<256x128xbf16>, vector<8x128xf32> -> vector<8x128xf32>
    %393 = arith.addf %348, %392 : vector<8x128xf32>
    %c0_167 = arith.constant 0 : index
    %c0_168 = arith.constant 0 : index
    %394 = vector.load %arg41[%c0_167, %c0_168] : memref<1x128xf32, #tpu.memory_space<vmem>>, vector<1x128xf32>
    %395 = vector.broadcast %394 : vector<1x128xf32> to vector<8x128xf32>
    %396 = arith.addf %393, %395 : vector<8x128xf32>
    %397 = arith.truncf %396 : vector<8x128xf32> to vector<8x128xbf16>
    %c0_169 = arith.constant 0 : index
    %c0_170 = arith.constant 0 : index
    %398 = vector.load %arg42[%c0_169, %c0_170] : memref<128x128xbf16, #tpu.memory_space<vmem>>, vector<128x128xbf16>
    %cst_171 = arith.constant dense<0.000000e+00> : vector<8x128xf32>
    %399 = tpu.matmul %397, %398, %cst_171 {dimension_numbers = #tpu.dot_dimension_numbers<[1], [0], [0], [1], [0, 0, 1, 1], [], []>} : vector<8x128xbf16>, vector<128x128xbf16>, vector<8x128xf32> -> vector<8x128xf32>
    %c0_172 = arith.constant 0 : index
    %c0_173 = arith.constant 0 : index
    %400 = vector.load %arg43[%c0_172, %c0_173] : memref<1x128xf32, #tpu.memory_space<vmem>>, vector<1x128xf32>
    %401 = vector.broadcast %400 : vector<1x128xf32> to vector<8x128xf32>
    %402 = arith.addf %399, %401 : vector<8x128xf32>
    %c0_174 = arith.constant 0 : index
    %c0_175 = arith.constant 0 : index
    %403 = vector.load %arg44[%c0_174, %c0_175] : memref<8x128xf32, #tpu.memory_space<vmem>>, vector<8x128xf32>
    tpu.vector_store %arg44[%c0_174, %c0_175], %402 {strides = array<i32>} : memref<8x128xf32, #tpu.memory_space<vmem>>, vector<8x128xf32>,
    return
  }
}

module attributes {stable_mosaic.version = 11 : i64} {
  func.func @_decoder_kernel(%arg0: memref<24x128xf32, #tpu.memory_space<vmem>>, %arg1: memref<24x1xi32, #tpu.memory_space<vmem>>, %arg2: memref<1x24xi32, #tpu.memory_space<vmem>>, %arg3: memref<1x24xf32, #tpu.memory_space<vmem>>, %arg4: memref<24x1xi32, #tpu.memory_space<vmem>>, %arg5: memref<24x1xf32, #tpu.memory_space<vmem>>, %arg6: memref<1x128xf32, #tpu.memory_space<vmem>>, %arg7: memref<128x384xbf16, #tpu.memory_space<vmem>>, %arg8: memref<128x128xbf16, #tpu.memory_space<vmem>>, %arg9: memref<1x128xf32, #tpu.memory_space<vmem>>, %arg10: memref<128x512xbf16, #tpu.memory_space<vmem>>, %arg11: memref<256x128xbf16, #tpu.memory_space<vmem>>, %arg12: memref<1x128xf32, #tpu.memory_space<vmem>>, %arg13: memref<128x256xbf16, #tpu.memory_space<vmem>>, %arg14: memref<1x1xf32, #tpu.memory_space<vmem>>) attributes {dimension_semantics = [], scalar_prefetch = 0 : i64, scratch_operands = 0 : i64, tpu.core_type = #tpu.core_type<tc>} {
    %c0 = arith.constant 0 : index
    %c0_0 = arith.constant 0 : index
    %0 = vector.load %arg0[%c0, %c0_0] : memref<24x128xf32, #tpu.memory_space<vmem>>, vector<24x128xf32>
    %1 = tpu.iota {dimensions = array<i32: 0>} : vector<24x24xi32>
    %2 = tpu.iota {dimensions = array<i32: 1>} : vector<24x24xi32>
    %c0_1 = arith.constant 0 : index
    %c0_2 = arith.constant 0 : index
    %3 = vector.load %arg1[%c0_1, %c0_2] : memref<24x1xi32, #tpu.memory_space<vmem>>, vector<24x1xi32>
    %c0_3 = arith.constant 0 : index
    %c0_4 = arith.constant 0 : index
    %4 = vector.load %arg2[%c0_3, %c0_4] : memref<1x24xi32, #tpu.memory_space<vmem>>, vector<1x24xi32>
    %5 = vector.broadcast %3 : vector<24x1xi32> to vector<24x24xi32>
    %6 = vector.broadcast %4 : vector<1x24xi32> to vector<24x24xi32>
    %7 = arith.cmpi eq, %5, %6 : vector<24x24xi32>
    %8 = arith.cmpi sge, %1, %2 : vector<24x24xi32>
    %9 = arith.andi %7, %8 : vector<24x24xi1>
    %c0_5 = arith.constant 0 : index
    %c0_6 = arith.constant 0 : index
    %10 = vector.load %arg3[%c0_5, %c0_6] : memref<1x24xf32, #tpu.memory_space<vmem>>, vector<1x24xf32>
    %cst = arith.constant 0.000000e+00 : f32
    %11 = vector.broadcast %cst : f32 to vector<1x24xf32>
    %12 = arith.cmpf ogt, %10, %11 : vector<1x24xf32>
    %13 = vector.broadcast %12 : vector<1x24xi1> to vector<24x24xi1>
    %14 = arith.andi %9, %13 : vector<24x24xi1>
    %c0_7 = arith.constant 0 : index
    %c0_8 = arith.constant 0 : index
    %15 = vector.load %arg6[%c0_7, %c0_8] : memref<1x128xf32, #tpu.memory_space<vmem>>, vector<1x128xf32>
    %16 = arith.mulf %0, %0 : vector<24x128xf32>
    %cst_9 = arith.constant dense<0.000000e+00> : vector<24xf32>
    %17 = vector.multi_reduction <add>, %16, %cst_9 [1] : vector<24x128xf32> to vector<24xf32>
    %18 = vector.shape_cast %17 : vector<24xf32> to vector<24x1xf32>
    %cst_10 = arith.constant 1.280000e+02 : f32
    %19 = vector.broadcast %cst_10 : f32 to vector<24x1xf32>
    %20 = arith.divf %18, %19 : vector<24x1xf32>
    %cst_11 = arith.constant 9.99999997E-7 : f32
    %21 = vector.broadcast %cst_11 : f32 to vector<24x1xf32>
    %22 = arith.addf %20, %21 : vector<24x1xf32>
    %23 = math.rsqrt %22 : vector<24x1xf32>
    %24 = vector.broadcast %23 : vector<24x1xf32> to vector<24x128xf32>
    %25 = arith.mulf %0, %24 : vector<24x128xf32>
    %26 = vector.broadcast %15 : vector<1x128xf32> to vector<24x128xf32>
    %27 = arith.mulf %25, %26 : vector<24x128xf32>
    %c0_12 = arith.constant 0 : index
    %c0_13 = arith.constant 0 : index
    %28 = vector.load %arg7[%c0_12, %c0_13] : memref<128x384xbf16, #tpu.memory_space<vmem>>, vector<128x384xbf16>
    %29 = arith.truncf %27 : vector<24x128xf32> to vector<24x128xbf16>
    %cst_14 = arith.constant dense<0.000000e+00> : vector<24x384xf32>
    %30 = tpu.matmul %29, %28, %cst_14 {dimension_numbers = #tpu.dot_dimension_numbers<[1], [0], [0], [1], [0, 0, 1, 1], [], []>} : vector<24x128xbf16>, vector<128x384xbf16>, vector<24x384xf32> -> vector<24x384xf32>
    %31 = vector.extract_strided_slice %30 {offsets = [0, 0], sizes = [24, 128], strides = [1, 1]} : vector<24x384xf32> to vector<24x128xf32>
    %cst_15 = arith.constant 1.250000e-01 : f32
    %32 = vector.broadcast %cst_15 : f32 to vector<24x128xf32>
    %33 = arith.mulf %31, %32 : vector<24x128xf32>
    %34 = vector.extract_strided_slice %30 {offsets = [0, 128], sizes = [24, 128], strides = [1, 1]} : vector<24x384xf32> to vector<24x128xf32>
    %35 = vector.extract_strided_slice %30 {offsets = [0, 256], sizes = [24, 128], strides = [1, 1]} : vector<24x384xf32> to vector<24x128xf32>
    %c0_16 = arith.constant 0 : index
    %c0_17 = arith.constant 0 : index
    %36 = vector.load %arg8[%c0_16, %c0_17] : memref<128x128xbf16, #tpu.memory_space<vmem>>, vector<128x128xbf16>
    %37 = vector.extract_strided_slice %33 {offsets = [0, 0], sizes = [24, 64], strides = [1, 1]} : vector<24x128xf32> to vector<24x64xf32>
    %38 = arith.truncf %37 : vector<24x64xf32> to vector<24x64xbf16>
    %39 = vector.extract_strided_slice %34 {offsets = [0, 0], sizes = [24, 64], strides = [1, 1]} : vector<24x128xf32> to vector<24x64xf32>
    %40 = arith.truncf %39 : vector<24x64xf32> to vector<24x64xbf16>
    %cst_18 = arith.constant dense<0.000000e+00> : vector<24x24xf32>
    %41 = tpu.matmul %38, %40, %cst_18 {dimension_numbers = #tpu.dot_dimension_numbers<[1], [1], [0], [0], [0, 0, 1, 0], [], []>} : vector<24x64xbf16>, vector<24x64xbf16>, vector<24x24xf32> -> vector<24x24xf32>
    %cst_19 = arith.constant -1.000000e+09 : f32
    %42 = vector.broadcast %cst_19 : f32 to vector<24x24xf32>
    %43 = arith.select %14, %41, %42 : vector<24x24xi1>, vector<24x24xf32>
    %cst_20 = arith.constant dense<0xFF800000> : vector<24xf32>
    %44 = vector.multi_reduction <maximumf>, %43, %cst_20 [1] : vector<24x24xf32> to vector<24xf32>
    %45 = vector.shape_cast %44 : vector<24xf32> to vector<24x1xf32>
    %46 = vector.broadcast %45 : vector<24x1xf32> to vector<24x24xf32>
    %47 = arith.subf %43, %46 : vector<24x24xf32>
    %48 = math.exp %47 : vector<24x24xf32>
    %cst_21 = arith.constant dense<0.000000e+00> : vector<24xf32>
    %49 = vector.multi_reduction <add>, %48, %cst_21 [1] : vector<24x24xf32> to vector<24xf32>
    %50 = vector.shape_cast %49 : vector<24xf32> to vector<24x1xf32>
    %51 = tpu.reciprocal %50 {approx = true} : vector<24x1xf32> -> vector<24x1xf32>
    %52 = vector.broadcast %51 : vector<24x1xf32> to vector<24x24xf32>
    %53 = arith.mulf %48, %52 : vector<24x24xf32>
    %54 = arith.truncf %53 : vector<24x24xf32> to vector<24x24xbf16>
    %55 = vector.extract_strided_slice %35 {offsets = [0, 0], sizes = [24, 64], strides = [1, 1]} : vector<24x128xf32> to vector<24x64xf32>
    %56 = arith.truncf %55 : vector<24x64xf32> to vector<24x64xbf16>
    %cst_22 = arith.constant dense<0.000000e+00> : vector<24x64xf32>
    %57 = tpu.matmul %54, %56, %cst_22 {dimension_numbers = #tpu.dot_dimension_numbers<[1], [0], [0], [1], [0, 0, 1, 1], [], []>} : vector<24x24xbf16>, vector<24x64xbf16>, vector<24x64xf32> -> vector<24x64xf32>
    %58 = vector.extract_strided_slice %33 {offsets = [0, 64], sizes = [24, 64], strides = [1, 1]} : vector<24x128xf32> to vector<24x64xf32>
    %59 = arith.truncf %58 : vector<24x64xf32> to vector<24x64xbf16>
    %60 = vector.extract_strided_slice %34 {offsets = [0, 64], sizes = [24, 64], strides = [1, 1]} : vector<24x128xf32> to vector<24x64xf32>
    %61 = arith.truncf %60 : vector<24x64xf32> to vector<24x64xbf16>
    %cst_23 = arith.constant dense<0.000000e+00> : vector<24x24xf32>
    %62 = tpu.matmul %59, %61, %cst_23 {dimension_numbers = #tpu.dot_dimension_numbers<[1], [1], [0], [0], [0, 0, 1, 0], [], []>} : vector<24x64xbf16>, vector<24x64xbf16>, vector<24x24xf32> -> vector<24x24xf32>
    %cst_24 = arith.constant -1.000000e+09 : f32
    %63 = vector.broadcast %cst_24 : f32 to vector<24x24xf32>
    %64 = arith.select %14, %62, %63 : vector<24x24xi1>, vector<24x24xf32>
    %cst_25 = arith.constant dense<0xFF800000> : vector<24xf32>
    %65 = vector.multi_reduction <maximumf>, %64, %cst_25 [1] : vector<24x24xf32> to vector<24xf32>
    %66 = vector.shape_cast %65 : vector<24xf32> to vector<24x1xf32>
    %67 = vector.broadcast %66 : vector<24x1xf32> to vector<24x24xf32>
    %68 = arith.subf %64, %67 : vector<24x24xf32>
    %69 = math.exp %68 : vector<24x24xf32>
    %cst_26 = arith.constant dense<0.000000e+00> : vector<24xf32>
    %70 = vector.multi_reduction <add>, %69, %cst_26 [1] : vector<24x24xf32> to vector<24xf32>
    %71 = vector.shape_cast %70 : vector<24xf32> to vector<24x1xf32>
    %72 = tpu.reciprocal %71 {approx = true} : vector<24x1xf32> -> vector<24x1xf32>
    %73 = vector.broadcast %72 : vector<24x1xf32> to vector<24x24xf32>
    %74 = arith.mulf %69, %73 : vector<24x24xf32>
    %75 = arith.truncf %74 : vector<24x24xf32> to vector<24x24xbf16>
    %76 = vector.extract_strided_slice %35 {offsets = [0, 64], sizes = [24, 64], strides = [1, 1]} : vector<24x128xf32> to vector<24x64xf32>
    %77 = arith.truncf %76 : vector<24x64xf32> to vector<24x64xbf16>
    %cst_27 = arith.constant dense<0.000000e+00> : vector<24x64xf32>
    %78 = tpu.matmul %75, %77, %cst_27 {dimension_numbers = #tpu.dot_dimension_numbers<[1], [0], [0], [1], [0, 0, 1, 1], [], []>} : vector<24x24xbf16>, vector<24x64xbf16>, vector<24x64xf32> -> vector<24x64xf32>
    %79 = tpu.concatenate %57, %78 in 1 : vector<24x64xf32>, vector<24x64xf32> -> vector<24x128xf32>
    %80 = arith.truncf %79 : vector<24x128xf32> to vector<24x128xbf16>
    %cst_28 = arith.constant dense<0.000000e+00> : vector<24x128xf32>
    %81 = tpu.matmul %80, %36, %cst_28 {dimension_numbers = #tpu.dot_dimension_numbers<[1], [0], [0], [1], [0, 0, 1, 1], [], []>} : vector<24x128xbf16>, vector<128x128xbf16>, vector<24x128xf32> -> vector<24x128xf32>
    %82 = arith.addf %0, %81 : vector<24x128xf32>
    %c0_29 = arith.constant 0 : index
    %c0_30 = arith.constant 0 : index
    %83 = vector.load %arg9[%c0_29, %c0_30] : memref<1x128xf32, #tpu.memory_space<vmem>>, vector<1x128xf32>
    %84 = arith.mulf %82, %82 : vector<24x128xf32>
    %cst_31 = arith.constant dense<0.000000e+00> : vector<24xf32>
    %85 = vector.multi_reduction <add>, %84, %cst_31 [1] : vector<24x128xf32> to vector<24xf32>
    %86 = vector.shape_cast %85 : vector<24xf32> to vector<24x1xf32>
    %cst_32 = arith.constant 1.280000e+02 : f32
    %87 = vector.broadcast %cst_32 : f32 to vector<24x1xf32>
    %88 = arith.divf %86, %87 : vector<24x1xf32>
    %cst_33 = arith.constant 9.99999997E-7 : f32
    %89 = vector.broadcast %cst_33 : f32 to vector<24x1xf32>
    %90 = arith.addf %88, %89 : vector<24x1xf32>
    %91 = math.rsqrt %90 : vector<24x1xf32>
    %92 = vector.broadcast %91 : vector<24x1xf32> to vector<24x128xf32>
    %93 = arith.mulf %82, %92 : vector<24x128xf32>
    %94 = vector.broadcast %83 : vector<1x128xf32> to vector<24x128xf32>
    %95 = arith.mulf %93, %94 : vector<24x128xf32>
    %96 = arith.truncf %95 : vector<24x128xf32> to vector<24x128xbf16>
    %c0_34 = arith.constant 0 : index
    %c0_35 = arith.constant 0 : index
    %97 = vector.load %arg10[%c0_34, %c0_35] : memref<128x512xbf16, #tpu.memory_space<vmem>>, vector<128x512xbf16>
    %cst_36 = arith.constant dense<0.000000e+00> : vector<24x512xf32>
    %98 = tpu.matmul %96, %97, %cst_36 {dimension_numbers = #tpu.dot_dimension_numbers<[1], [0], [0], [1], [0, 0, 1, 1], [], []>} : vector<24x128xbf16>, vector<128x512xbf16>, vector<24x512xf32> -> vector<24x512xf32>
    %99 = vector.extract_strided_slice %98 {offsets = [0, 0], sizes = [24, 256], strides = [1, 1]} : vector<24x512xf32> to vector<24x256xf32>
    %cst_37 = arith.constant 0.000000e+00 : f32
    %100 = vector.broadcast %cst_37 : f32 to vector<24x256xf32>
    %101 = arith.subf %100, %99 : vector<24x256xf32>
    %102 = math.exp %101 : vector<24x256xf32>
    %cst_38 = arith.constant 1.000000e+00 : f32
    %103 = vector.broadcast %cst_38 : f32 to vector<24x256xf32>
    %104 = arith.addf %103, %102 : vector<24x256xf32>
    %cst_39 = arith.constant 1.000000e+00 : f32
    %105 = vector.broadcast %cst_39 : f32 to vector<24x256xf32>
    %106 = arith.divf %105, %104 : vector<24x256xf32>
    %107 = arith.mulf %99, %106 : vector<24x256xf32>
    %108 = vector.extract_strided_slice %98 {offsets = [0, 256], sizes = [24, 256], strides = [1, 1]} : vector<24x512xf32> to vector<24x256xf32>
    %109 = arith.mulf %107, %108 : vector<24x256xf32>
    %110 = arith.truncf %109 : vector<24x256xf32> to vector<24x256xbf16>
    %c0_40 = arith.constant 0 : index
    %c0_41 = arith.constant 0 : index
    %111 = vector.load %arg11[%c0_40, %c0_41] : memref<256x128xbf16, #tpu.memory_space<vmem>>, vector<256x128xbf16>
    %cst_42 = arith.constant dense<0.000000e+00> : vector<24x128xf32>
    %112 = tpu.matmul %110, %111, %cst_42 {dimension_numbers = #tpu.dot_dimension_numbers<[1], [0], [0], [1], [0, 0, 1, 1], [], []>} : vector<24x256xbf16>, vector<256x128xbf16>, vector<24x128xf32> -> vector<24x128xf32>
    %113 = arith.addf %82, %112 : vector<24x128xf32>
    %c0_43 = arith.constant 0 : index
    %c0_44 = arith.constant 0 : index
    %114 = vector.load %arg12[%c0_43, %c0_44] : memref<1x128xf32, #tpu.memory_space<vmem>>, vector<1x128xf32>
    %115 = arith.mulf %113, %113 : vector<24x128xf32>
    %cst_45 = arith.constant dense<0.000000e+00> : vector<24xf32>
    %116 = vector.multi_reduction <add>, %115, %cst_45 [1] : vector<24x128xf32> to vector<24xf32>
    %117 = vector.shape_cast %116 : vector<24xf32> to vector<24x1xf32>
    %cst_46 = arith.constant 1.280000e+02 : f32
    %118 = vector.broadcast %cst_46 : f32 to vector<24x1xf32>
    %119 = arith.divf %117, %118 : vector<24x1xf32>
    %cst_47 = arith.constant 9.99999997E-7 : f32
    %120 = vector.broadcast %cst_47 : f32 to vector<24x1xf32>
    %121 = arith.addf %119, %120 : vector<24x1xf32>
    %122 = math.rsqrt %121 : vector<24x1xf32>
    %123 = vector.broadcast %122 : vector<24x1xf32> to vector<24x128xf32>
    %124 = arith.mulf %113, %123 : vector<24x128xf32>
    %125 = vector.broadcast %114 : vector<1x128xf32> to vector<24x128xf32>
    %126 = arith.mulf %124, %125 : vector<24x128xf32>
    %127 = arith.truncf %126 : vector<24x128xf32> to vector<24x128xbf16>
    %c0_48 = arith.constant 0 : index
    %c0_49 = arith.constant 0 : index
    %128 = vector.load %arg13[%c0_48, %c0_49] : memref<128x256xbf16, #tpu.memory_space<vmem>>, vector<128x256xbf16>
    %cst_50 = arith.constant dense<0.000000e+00> : vector<24x256xf32>
    %129 = tpu.matmul %127, %128, %cst_50 {dimension_numbers = #tpu.dot_dimension_numbers<[1], [0], [0], [1], [0, 0, 1, 1], [], []>} : vector<24x128xbf16>, vector<128x256xbf16>, vector<24x256xf32> -> vector<24x256xf32>
    %cst_51 = arith.constant dense<0xFF800000> : vector<24xf32>
    %130 = vector.multi_reduction <maximumf>, %129, %cst_51 [1] : vector<24x256xf32> to vector<24xf32>
    %131 = vector.shape_cast %130 : vector<24xf32> to vector<24x1xf32>
    %132 = vector.broadcast %131 : vector<24x1xf32> to vector<24x256xf32>
    %133 = arith.subf %129, %132 : vector<24x256xf32>
    %134 = math.exp %133 : vector<24x256xf32>
    %cst_52 = arith.constant dense<0.000000e+00> : vector<24xf32>
    %135 = vector.multi_reduction <add>, %134, %cst_52 [1] : vector<24x256xf32> to vector<24xf32>
    %136 = vector.shape_cast %135 : vector<24xf32> to vector<24x1xf32>
    %137 = math.log %136 : vector<24x1xf32>
    %138 = arith.addf %137, %131 : vector<24x1xf32>
    %139 = tpu.iota {dimensions = array<i32: 1>} : vector<24x256xi32>
    %c0_53 = arith.constant 0 : index
    %c0_54 = arith.constant 0 : index
    %140 = vector.load %arg4[%c0_53, %c0_54] : memref<24x1xi32, #tpu.memory_space<vmem>>, vector<24x1xi32>
    %141 = vector.broadcast %140 : vector<24x1xi32> to vector<24x256xi32>
    %142 = arith.cmpi eq, %139, %141 : vector<24x256xi32>
    %cst_55 = arith.constant 0.000000e+00 : f32
    %143 = vector.broadcast %cst_55 : f32 to vector<24x256xf32>
    %144 = arith.select %142, %129, %143 : vector<24x256xi1>, vector<24x256xf32>
    %cst_56 = arith.constant dense<0.000000e+00> : vector<24xf32>
    %145 = vector.multi_reduction <add>, %144, %cst_56 [1] : vector<24x256xf32> to vector<24xf32>
    %146 = vector.shape_cast %145 : vector<24xf32> to vector<24x1xf32>
    %147 = arith.subf %138, %146 : vector<24x1xf32>
    %c0_57 = arith.constant 0 : index
    %c0_58 = arith.constant 0 : index
    %148 = vector.load %arg5[%c0_57, %c0_58] : memref<24x1xf32, #tpu.memory_space<vmem>>, vector<24x1xf32>
    %149 = arith.mulf %147, %148 : vector<24x1xf32>
    %cst_59 = arith.constant dense<0.000000e+00> : vector<1xf32>
    %150 = vector.multi_reduction <add>, %149, %cst_59 [0] : vector<24x1xf32> to vector<1xf32>
    %151 = vector.shape_cast %150 : vector<1xf32> to vector<1x1xf32>
    %c0_60 = arith.constant 0 : index
    %c0_61 = arith.constant 0 : index
    %152 = vector.load %arg5[%c0_60, %c0_61] : memref<24x1xf32, #tpu.memory_space<vmem>>, vector<24x1xf32>
    %cst_62 = arith.constant dense<0.000000e+00> : vector<1xf32>
    %153 = vector.multi_reduction <add>, %152, %cst_62 [0] : vector<24x1xf32> to vector<1xf32>
    %154 = vector.shape_cast %153 : vector<1xf32> to vector<1x1xf32>
    %cst_63 = arith.constant 1.000000e+00 : f32
    %155 = vector.broadcast %cst_63 : f32 to vector<1x1xf32>
    %156 = arith.maximumf %154, %155 : vector<1x1xf32>
    %157 = arith.divf %151, %156 : vector<1x1xf32>
    %c0_64 = arith.constant 0 : index
    %c0_65 = arith.constant 0 : index
    %158 = vector.load %arg14[%c0_64, %c0_65] : memref<1x1xf32, #tpu.memory_space<vmem>>, vector<1x1xf32>
    tpu.vector_store %arg14[%c0_64, %c0_65], %157 {strides = array<i32>} : memref<1x1xf32, #tpu.memory_space<vmem>>, vector<1x1xf32>,
    return
  }
}

</mosaic_0001>

<bundles_post_ra>
// kernel: tile.14
= control target key start
LH: loop header
LB: loop body
LE: loop exit
PB: predicated region body
PF: predicated region fallthrough
CT: control target
= control target key end

     0   :  { %s32_s0 = inlined_call_operand.vmem [shape: f32[2,5,128], index: 0, kind: input, shape index: {}]   ;;  %s33_s1 = inlined_call_operand.vmem [shape: f32[10,128], index: 1, kind: output, shape index: {}]  }
   0x1   :  { %v2_v0 = vld [vmem:[%s32_s0] sm:$0x1f]   ;;  %v8_v1 = vld [vmem:[%s32_s0 + $0x8] sm:$0x1f]  }
   0x2   :  { %3 = vst [vmem:[%s33_s1] sm:$0x1f] %v2_v0   ;;  %9 = vst [vmem:[%s33_s1 + $0x5] sm:$0x1f] %v8_v1  }

// kernel: emu_forward.3
= control target key start
LH: loop header
LB: loop body
LE: loop exit
PB: predicated region body
PF: predicated region fallthrough
CT: control target
= control target key end

     0   :  { %v2227_v26 = vmov 0   ;;  %s2832_s0 = inlined_call_operand.vmem [shape: f32[24,128], index: 0, kind: input, shape index: {}]   ;;  %s2833_s1 = inlined_call_operand.vmem [shape: s32[24,1], index: 1, kind: input, shape index: {}]   ;;  %s2834_s2 = inlined_call_operand.vmem [shape: s32[1,24], index: 2, kind: input, shape index: {}]   ;;  %s2835_s3 = inlined_call_operand.vmem [shape: f32[1,24], index: 3, kind: input, shape index: {}]   ;;  %s2836_s4 = inlined_call_operand.vmem [shape: s32[24,1], index: 4, kind: input, shape index: {}]   ;;  %s2837_s5 = inlined_call_operand.vmem [shape: f32[24,1], index: 5, kind: input, shape index: {}]   ;;  %s2838_s6 = inlined_call_operand.vmem [shape: f32[1,128], index: 6, kind: input, shape index: {}]   ;;  %s2839_s7 = inlined_call_operand.vmem [shape: bf16[128,384], index: 7, kind: input, shape index: {}]   ;;  %s2840_s8 = inlined_call_operand.vmem [shape: bf16[128,128], index: 8, kind: input, shape index: {}]   ;;  %s2841_s9 = inlined_call_operand.vmem [shape: f32[1,128], index: 9, kind: input, shape index: {}]   ;;  %s2842_s10 = inlined_call_operand.vmem [shape: bf16[128,512], index: 10, kind: input, shape index: {}]   ;;  %s2843_s11 = inlined_call_operand.vmem [shape: bf16[256,128], index: 11, kind: input, shape index: {}]   ;;  %s2844_s12 = inlined_call_operand.vmem [shape: f32[1,128], index: 12, kind: input, shape index: {}]   ;;  %s2845_s13 = inlined_call_operand.vmem [shape: bf16[128,256], index: 13, kind: input, shape index: {}]   ;;  %s2846_s14 = inlined_call_operand.hbm [shape: f32[1,1], index: 14, kind: output, shape index: {}]  }
   0x1   :  { %v2308_v0 = vld [vmem:[%s2832_s0] sm:$0xff]  ;;  %v2313_v1 = vld [vmem:[%s2832_s0 + $0x8] sm:$0xff]  ;;  %v2318_v2 = vld [vmem:[%s2832_s0 + $0x10] sm:$0xff]  ;;  %321 = vmatprep.mubr.bf16.mxu0 %v2227_v26  ;;  %1982 = vset.pattern.permute.xlu1 %v2227_v26 }
   0x2   :  { %v96_v3 = vmul.f32 %v2308_v0, %v2308_v0  ;;  %v98_v4 = vmul.f32 %v2318_v2, %v2318_v2  ;;  %v1989_v5 = vld [vmem:[%s2839_s7 + $0x4] ss:$12 sps:$4 sm:$0xff]   ;;  %v1991_v6 = vld [vmem:[%s2839_s7] ss:$12 sps:$4 sm:$0xff]   ;;  %v97_v7 = vmul.f32 %v2313_v1, %v2313_v1  ;;  %v1992_v8 = vld [vmem:[%s2839_s7 + $0x1c] ss:$12 sps:$4 sm:$0xff]   ;;  %1983 = vset.pattern.permute.xlu0 %v2227_v26 }
   0x3   :  { %v1994_v9 = vld [vmem:[%s2839_s7 + $0x18] ss:$12 sps:$4 sm:$0xff]   ;;  %289 = vmatprep.subr.bf16.mxu0 %v1989_v5  ;;  %v1995_v10 = vld [vmem:[%s2839_s7 + $0x8] ss:$12 sps:$4 sm:$0xff]   ;;  %v1998_v12 = vld [vmem:[%s2839_s7 + $0x30] ss:$12 sps:$4 sm:$0xff]  }
   0x4   :  { %99 = vadd.xlane.f32.xlu0 %v96_v3  ;;  %103 = vadd.xlane.f32.xlu1 %v98_v4  ;;  %v1996_v11 = vld [vmem:[%s2839_s7 + $0x34] ss:$12 sps:$4 sm:$0xff]   ;;  %v2000_v14 = vld [vmem:[%s2839_s7 + $0x4c] ss:$12 sps:$4 sm:$0xff]   ;;  %v2004_v17 = vld [vmem:[%s2839_s7 + $0x64] ss:$12 sps:$4 sm:$0xff]  }
   0x5   :  { %290 = vmatpush1.bf16.msra.mxu0 %v1991_v6  ;;  %1901 = vmatprep.subr.bf16.mxu1 %v1995_v10  ;;  %v1999_v13 = vld [vmem:[%s2839_s7 + $0x20] ss:$12 sps:$4 sm:$0xff]   ;;  %v2002_v15 = vld [vmem:[%s2839_s7 + $0x48] ss:$12 sps:$4 sm:$0xff]   ;;  %v2003_v16 = vld [vmem:[%s2839_s7 + $0x38] ss:$12 sps:$4 sm:$0xff]  }
   0x6   :  { %291 = vmatprep.subr.bf16.mxu0 %v1992_v8  ;;  %1902 = vmatpush3.bf16.msra.mxu1 %v1995_v10  ;;  %v2006_v18 = vld [vmem:[%s2839_s7 + $0x60] ss:$12 sps:$4 sm:$0xff]   ;;  %v2007_v19 = vld [vmem:[%s2839_s7 + $0x50] ss:$12 sps:$4 sm:$0xff]   ;;  %v2010_v21 = vld [vmem:[%s2839_s7 + $0x78] ss:$12 sps:$4 sm:$0xff]  }
   0x7   :  { %1903 = vmatprep.subr.bf16.mxu1 %v1999_v13  ;;  %v2008_v20 = vld [vmem:[%s2839_s7 + $0x7c] ss:$12 sps:$4 sm:$0xff]   ;;  %v2012_v23 = vld [vmem:[%s2839_s7 + $0x94] ss:$12 sps:$4 sm:$0xff]   ;;  %v2016_v27 = vld [vmem:[%s2839_s7 + $0xac] ss:$12 sps:$4 sm:$0xff]  }
   0x8   :  { %101 = vadd.xlane.f32.xlu0 %v97_v7  ;;  %v2011_v22 = vld [vmem:[%s2839_s7 + $0x68] ss:$12 sps:$4 sm:$0xff]   ;;  %v2014_v24 = vld [vmem:[%s2839_s7 + $0x90] ss:$12 sps:$4 sm:$0xff]   ;;  %v2015_v25 = vld [vmem:[%s2839_s7 + $0x80] ss:$12 sps:$4 sm:$0xff]  }
   0x9   :  { %292 = vmatpush1.bf16.msra.mxu0 %v1994_v9  ;;  %v2018_v28 = vld [vmem:[%s2839_s7 + $0xa8] ss:$12 sps:$4 sm:$0xff]   ;;  %v2019_v29 = vld [vmem:[%s2839_s7 + $0x98] ss:$12 sps:$4 sm:$0xff]   ;;  %v2020_v30 = vld [vmem:[%s2839_s7 + $0xb0] ss:$12 sps:$4 sm:$0xff]  }
   0xa   :  { %293 = vmatprep.subr.bf16.mxu0 %v1996_v11  ;;  %1904 = vmatpush3.bf16.msra.mxu1 %v1999_v13 }
   0xb   :  { %1905 = vmatprep.subr.bf16.mxu1 %v2003_v16 }
   0xd   :  { %294 = vmatpush1.bf16.msra.mxu0 %v1998_v12 }
   0xe   :  { %295 = vmatprep.subr.bf16.mxu0 %v2000_v14  ;;  %1906 = vmatpush3.bf16.msra.mxu1 %v2003_v16 }
   0xf   :  { %1907 = vmatprep.subr.bf16.mxu1 %v2007_v19 }
  0x11   :  { %296 = vmatpush1.bf16.msra.mxu0 %v2002_v15 }
  0x12   :  { %297 = vmatprep.subr.bf16.mxu0 %v2004_v17  ;;  %1908 = vmatpush3.bf16.msra.mxu1 %v2007_v19 }
  0x13   :  { %1909 = vmatprep.subr.bf16.mxu1 %v2011_v22 }
  0x15   :  { %298 = vmatpush1.bf16.msra.mxu0 %v2006_v18 }
  0x16   :  { %299 = vmatprep.subr.bf16.mxu0 %v2008_v20  ;;  %1910 = vmatpush3.bf16.msra.mxu1 %v2011_v22 }
  0x17   :  { %1911 = vmatprep.subr.bf16.mxu1 %v2015_v25 }
  0x19   :  { %300 = vmatpush1.bf16.msra.mxu0 %v2010_v21 }
  0x1a   :  { %301 = vmatprep.subr.bf16.mxu0 %v2012_v23  ;;  %1912 = vmatpush3.bf16.msra.mxu1 %v2015_v25 }
  0x1b   :  { %1913 = vmatprep.subr.bf16.mxu1 %v2019_v29 }
  0x1d   :  { %302 = vmatpush1.bf16.msra.mxu0 %v2014_v24 }
  0x1e   :  { %303 = vmatprep.subr.bf16.mxu0 %v2016_v27  ;;  %1914 = vmatpush3.bf16.msra.mxu1 %v2019_v29 }
  0x1f   :  { %1915 = vmatprep.subr.bf16.mxu1 %v2020_v30 }
  0x21   :  { %304 = vmatpush1.bf16.msra.mxu0 %v2018_v28 }
  0x22   :  { %1916 = vmatpush3.bf16.msra.mxu1 %v2020_v30 }
  0x23   :  { %19 = vsyncpa [#allocation3], 0  ;;  %v1730_v43 = vld [vmem:[%s2838_s6] ss:$0 sm:$0xff]  ;;  %v59_v53 = vld [vmem:[%s2833_s1 + $0x8] sm:$0xff]  ;;  %vm411_vm0 = vcmask 523264   ;;  %v52_v18 = vlaneseq }
  0x24   :  { %v58_v52 = vld [vmem:[%s2833_s1] sm:$0xff]  ;;  %66 = vperm.xlu0 %1983, %v59_v53   ;;  %v60_v54 = vld [vmem:[%s2833_s1 + $0x10] sm:$0xff]  ;;  %vm519_vm1 = vcmask 1043456   ;;  %vm475_vm15 = vcmask 195584  }
  0x25   :  { %63 = vperm.xlu1 %1982, %v58_v52   ;;  %v84_v19 = vld [vmem:[%s2835_s3] sm:$0x1]  ;;  %v53_v20 = vshrl.u32 %v52_v18, 7  ;;  %v2446_v23 = vand.u32 127, %v52_v18 }
  0x26   :  { %vm85_vm2 = vcmp.gt.f32.partialorder %v84_v19, 0.0  ;;  %v1729_v25 = vld [vmem:[%s2834_s2] ss:$0 sm:$0xff]  ;;  %s2228_s2 = smov 64  }
  0x27   :  { %v89_v22 = vsub.s32 0, %v53_v20  ;;  %v86_v24 = vsel %vm85_vm2, 1, %v2227_v26  ;;  %v55_v27 = vadd.s32 16, %v53_v20  ;;  %v54_v29 = vadd.s32 8, %v53_v20 }
  0x28   :  { %vm78_vm3 = vcmp.ge.s32.totalorder %v53_v20, %v2446_v23 }
  0x29   :  { %69 = vperm.xlu1 %1982, %v60_v54   ;;  %v90_v30 = vrot.slane %v86_v24, %v89_v22  ;;  %vm80_vm5 = vcmp.ge.s32.totalorder %v55_v27, %v2446_v23  ;;  %vm79_vm7 = vcmp.ge.s32.totalorder %v54_v29, %v2446_v23 }
  0x2b   :  { %vm91_vm10 = vcmp.eq.s32.totalorder %v90_v30, 1 }
  0x91   :  { %v100_v31 = vpop.xlane.xlu0 %99  ;;  %v104_v32 = vpop.xlane.xlu1 %103 }
  0x92   :  { %v106_v33 = vmul.f32 0.0078125, %v100_v31  ;;  %v108_v34 = vmul.f32 0.0078125, %v104_v32 }
  0x94   :  { %v109_v35 = vadd.f32 1e-06, %v106_v33  ;;  %v111_v36 = vadd.f32 1e-06, %v108_v34 }
  0x95   :  { %v102_v37 = vpop.xlane.xlu0 %101 }
  0x96   :  { %2117 = vrsqrt.f32 %v109_v35  ;;  %v107_v38 = vmul.f32 0.0078125, %v102_v37 }
  0x97   :  { %2119 = vrsqrt.f32 %v111_v36 }
  0x98   :  { %v110_v39 = vadd.f32 1e-06, %v107_v38 }
  0x9a   :  { %2121 = vrsqrt.f32 %v110_v39 }
  0xa0   :  { %v2118_v40 = vpop.eup %2117 }
  0xa1   :  { %v2120_v41 = vpop.eup %2119  ;;  %v115_v44 = vmul.f32 %v2118_v40, %v2308_v0 }
  0xa2   :  { %v117_v42 = vmul.f32 %v2120_v41, %v2318_v2 }
  0xa3   :  { %v124_v48 = vmul.f32 %v1730_v43, %v115_v44  ;;  %v67_v31 = vpop.permute.xlu0 %66 }
  0xa4   :  { %v2122_v45 = vpop.eup %2121  ;;  %v126_v46 = vmul.f32 %v1730_v43, %v117_v42  ;;  %v64_v21 = vpop.permute.xlu1 %63  ;;  %vm76_vm8 = vcmp.eq.s32.totalorder %v67_v31, %v1729_v25 }
  0xa5   :  { %v116_v47 = vmul.f32 %v2122_v45, %v2313_v1  ;;  %vm75_vm4 = vcmp.eq.s32.totalorder %v64_v21, %v1729_v25  ;;  %vm82_vm12 = vmand %vm76_vm8, %vm79_vm7  ;;  %vm1687_vm7 = vcmask 7168   ;;  %vm1713_vm8 = vcmask 0  }
  0xa6   :  { %v160_v50 = vpack.c.bf16 %v126_v46, %v126_v46  ;;  %vm81_vm9 = vmand %vm75_vm4, %vm78_vm3 }
  0xa7   :  { %v125_v49 = vmul.f32 %v1730_v43, %v116_v47  ;;  %vm2455_vm13 = vmand %vm81_vm9, %vm91_vm10 }
  0xa8   :  { %v70_v28 = vpop.permute.xlu1 %69  ;;  %vm2463_vm2 = vmand %vm82_vm12, %vm91_vm10 }
  0xa9   :  { %v159_v51 = vpack.c.bf16 %v125_v49, %v124_v48  ;;  %vm77_vm6 = vcmp.eq.s32.totalorder %v70_v28, %v1729_v25 }
  0xaa   :  { %vm83_vm11 = vmand %vm77_vm6, %vm80_vm5 }
  0xab   :  { %322 = vmatmul.mubr.bf16.vlgmr.msra.gmra.mrb[0].mxu0 %v159_v51  ;;  %1917 = vmatprep.mubr.bf16.mxu1 %v159_v51  ;;  %vm2459_vm14 = vmand %vm83_vm11, %vm91_vm10 }
  0xac   :  { %331 = vmatprep.mubr.bf16.mxu0 %v2227_v26  ;;  %1918 = vmatmul.mubr.bf16.vlgmr.msra.gmra.mrb[0].mxu1 %v160_v50 }
  0xb3   :  { %332 = vmatmul.mubr.bf16.gmra.mrb[4].mxu0 %v160_v50 }
 0x17e   :  { %v323_v55 = vpop.f32.mrb[0].mxu0 }
 0x17f   :  { %v325_v56 = vpop.f32.mrb[1].mxu0  ;;  %v1919_v57 = vpop.f32.mrb[0].mxu1  ;;  %v388_v60 = vmul.f32 0.125, %v323_v55 }
 0x180   :  { %v327_v58 = vpop.f32.mrb[2].mxu0  ;;  %v374_v59 = vpop.f32.mrb[1].mxu1  ;;  %v2434_v16 = vpack.c.bf16 %v1919_v57, %v1919_v57 }
 0x181   :  { %v389_v61 = vmul.f32 0.125, %v327_v58  ;;  %v329_v62 = vpop.f32.mrb[3].mxu0  ;;  %v1920_v63 = vpop.f32.mrb[2].mxu1 }
 0x182   :  { %v2417_v3 = vpack.c.bf16 %v329_v62, %v325_v56  ;;  %v377_v4 = vpop.f32.mrb[3].mxu1  ;;  %v521_v17 = vsel %vm519_vm1, %v2434_v16, 0 }
 0x183   :  { %v2419_v5 = vpack.c.bf16 %v389_v61, %v388_v60  ;;  %v2421_v6 = vpack.c.bf16 %v377_v4, %v374_v59 }
 0x184   :  { %1973 = vmatprep.subr.msk.bf16.mxu1 %vm411_vm0, %v2417_v3  ;;  %v419_v7 = vsel %vm411_vm0, %v2417_v3, 0 }
 0x185   :  { %1922 = vmatpush3.bf16.xpose.msra.mxu1 %v419_v7  ;;  %1925 = vmatprep.mubr.msk.bf16.mxu1 %vm411_vm0, %v2419_v5 }
 0x186   :  { %v333_v8 = vpop.f32.mrb[4].mxu0 }
 0x187   :  { %v335_v9 = vpop.f32.mrb[5].mxu0  ;;  %v390_v14 = vmul.f32 0.125, %v333_v8 }
 0x188   :  { %v410_v10 = vpack.c.bf16 %v335_v9, %v335_v9  ;;  %v337_v11 = vpop.f32.mrb[6].mxu0 }
 0x189   :  { %v338_v12 = vpop.f32.mrb[7].mxu0  ;;  %v2432_v15 = vpack.c.bf16 %v390_v14, %v390_v14 }
 0x18a   :  { %1974 = vmatprep.subr.msk.bf16.mxu1 %vm411_vm0, %v410_v10  ;;  %v422_v13 = vsel %vm411_vm0, %v410_v10, 0 }
 0x18d   :  { %1924 = vmatpush3.bf16.xpose.msra.mxu1 %v422_v13 }
 0x18e   :  { %1929 = vmatprep.subr.bf16.mxu1 %v2421_v6 }
 0x194   :  { %1926 = vmatmul.mubr.msk.bf16.vlgmr.msra.gmra.mrb[4].mxu1 %vm411_vm0, %v2432_v15 }
 0x195   :  { %1930 = vmatpush3.bf16.msra.mxu1 %v2421_v6 }
 0x196   :  { %1975 = vmatprep.subr.msk.bf16.mxu1 %vm519_vm1, %v2434_v16 }
 0x199   :  { %1932 = vmatpush3.bf16.msra.mxu1 %v521_v17 }
 0x267   :  { %v1927_v34 = vpop.f32.mrb[4].mxu1 }
 0x268   :  { %v458_v35 = vpop.f32.mrb[5].mxu1  ;;  %v474_v41 = vsel %vm2459_vm14, %v1927_v34, -1e+09 }
 0x269   :  { %v472_v37 = vsel %vm2455_vm13, %v458_v35, -1e+09  ;;  %v1928_v38 = vpop.f32.mrb[6].mxu1  ;;  %v482_v44 = vsel %vm475_vm15, %v474_v41, -inf }
 0x26a   :  { %v461_v39 = vpop.f32.mrb[7].mxu1  ;;  %v476_v40 = vsel %vm475_vm15, %v472_v37, -inf }
 0x26b   :  { %v473_v42 = vsel %vm2463_vm2, %v461_v39, -1e+09  ;;  %477 = vmax.xlane.f32.xlu1 %v476_v40 }
 0x26c   :  { %v479_v43 = vsel %vm475_vm15, %v473_v42, -inf }
 0x26d   :  { %480 = vmax.xlane.f32.xlu0 %v479_v43 }
 0x26f   :  { %483 = vmax.xlane.f32.xlu1 %v482_v44 }
 0x283   :  { %581 = vrot.lane.b32.xlu0 %v410_v10, %s2228_s2 }
 0x2f8   :  { %v478_v45 = vpop.xlane.xlu1 %477 }
 0x2f9   :  { %v485_v46 = vsub.f32 %v472_v37, %v478_v45 }
 0x2fa   :  { %v481_v47 = vpop.xlane.xlu0 %480 }
 0x2fb   :  { %v488_v50 = vmul.f32 1.442695, %v485_v46  ;;  %v486_v51 = vsub.f32 %v473_v42, %v481_v47 }
 0x2fc   :  { %v484_v48 = vpop.xlane.xlu1 %483 }
 0x2fd   :  { %v487_v49 = vsub.f32 %v474_v41, %v484_v48  ;;  %v490_v53 = vmul.f32 1.442695, %v486_v51 }
 0x2fe   :  { %v582_v14 = vpop.permute.xlu0 %581 }
 0x2ff   :  { %v492_v52 = vmul.f32 1.442695, %v487_v49 }
 0x301   :  { %2123 = vpow2.f32 %v492_v52 }
 0x302   :  { %2125 = vpow2.f32 %v488_v50 }
 0x303   :  { %2127 = vpow2.f32 %v490_v53 }
 0x30b   :  { %v2124_v54 = vpop.eup %2123 }
 0x30c   :  { %v500_v55 = vsel %vm475_vm15, %v2124_v54, 0.0  ;;  %v2126_v56 = vpop.eup %2125 }
 0x30d   :  { %501 = vadd.xlane.f32.xlu1 %v500_v55  ;;  %v494_v57 = vsel %vm475_vm15, %v2126_v56, 0.0  ;;  %v2128_v58 = vpop.eup %2127 }
 0x30e   :  { %v497_v59 = vsel %vm475_vm15, %v2128_v58, 0.0 }
 0x311   :  { %495 = vadd.xlane.f32.xlu1 %v494_v57 }
 0x315   :  { %498 = vadd.xlane.f32.xlu1 %v497_v59 }
 0x326   :  { %579 = vrot.lane.b32.xlu1 %v2417_v3, %s2228_s2 }
 0x32a   :  { %573 = vrot.lane.b32.xlu1 %v2419_v5, %s2228_s2 }
 0x32e   :  { %575 = vrot.lane.b32.xlu1 %v2432_v15, %s2228_s2  ;;  %v593_v15 = vsel %vm411_vm0, %v582_v14, 0 }
 0x39a   :  { %v502_v60 = vpop.xlane.xlu1 %501 }
 0x39b   :  { %2129 = vrcp.f32 %v502_v60 }
 0x39e   :  { %v496_v61 = vpop.xlane.xlu1 %495 }
 0x39f   :  { %2131 = vrcp.f32 %v496_v61  ;;  %v2021_v61 = vld [vmem:[%s2840_s8] sm:$0xff]  }
 0x3a2   :  { %v499_v62 = vpop.xlane.xlu1 %498 }
 0x3a3   :  { %2133 = vrcp.f32 %v499_v62  ;;  %v2022_v62 = vld [vmem:[%s2840_s8 + $0x8] sm:$0xff]  }
 0x3a5   :  { %v2130_v4 = vpop.eup %2129 }
 0x3a6   :  { %v580_v63 = vpop.permute.xlu1 %579  ;;  %v508_v9 = vmul.f32 %v2130_v4, %v2124_v54  ;;  %v2024_v4 = vld [vmem:[%s2840_s8 + $0x18] sm:$0xff]  }
 0x3a7   :  { %1976 = vmatprep.subr.msk.bf16.mxu1 %vm411_vm0, %v580_v63  ;;  %v590_v12 = vsel %vm411_vm0, %v580_v63, 0  ;;  %v2023_v63 = vld [vmem:[%s2840_s8 + $0x10] sm:$0xff]  }
 0x3a8   :  { %v510_v5 = vpack.c.bf16 %v508_v9, %v508_v9  ;;  %v2027_v9 = vld [vmem:[%s2840_s8 + $0x30] sm:$0xff]  }
 0x3a9   :  { %v2132_v7 = vpop.eup %2131 }
 0x3aa   :  { %v506_v3 = vmul.f32 %v2132_v7, %v2126_v56  ;;  %v574_v13 = vpop.permute.xlu1 %573  ;;  %v2025_v7 = vld [vmem:[%s2840_s8 + $0x20] sm:$0xff]  }
 0x3ad   :  { %v2134_v8 = vpop.eup %2133 }
 0x3ae   :  { %v507_v10 = vmul.f32 %v2134_v8, %v2128_v58  ;;  %v576_v17 = vpop.permute.xlu1 %575  ;;  %v2026_v8 = vld [vmem:[%s2840_s8 + $0x28] sm:$0xff]  }
 0x3b0   :  { %v509_v11 = vpack.c.bf16 %v507_v10, %v506_v3  ;;  %v2028_v3 = vld [vmem:[%s2840_s8 + $0x38] sm:$0xff]  }
 0x3b2   :  { %1933 = vmatprep.mubr.msk.bf16.mxu1 %vm475_vm15, %v509_v11 }
 0x3b3   :  { %1934 = vmatmul.mubr.msk.bf16.vlgmr.msra.gmra.mrb[8].mxu1 %vm475_vm15, %v510_v5 }
 0x3b4   :  { %1938 = vmatpush3.bf16.xpose.msra.mxu1 %v590_v12  ;;  %1941 = vmatprep.mubr.msk.bf16.mxu1 %vm411_vm0, %v574_v13 }
 0x3b5   :  { %1977 = vmatprep.subr.msk.bf16.mxu1 %vm411_vm0, %v582_v14 }
 0x3bc   :  { %1940 = vmatpush3.bf16.xpose.msra.mxu1 %v593_v15 }
 0x3c3   :  { %1942 = vmatmul.mubr.msk.bf16.vlgmr.msra.gmra.mrb[12].mxu1 %vm411_vm0, %v576_v17 }
 0x3c4   :  { %1118 = vmatprep.mubr.bf16.mxu1 %v2227_v26 }
 0x486   :  { %v2495_v18 = vpop.f32.mrb[8].mxu1 }
 0x487   :  { %v2497_v19 = vpop.f32.mrb[9].mxu1 }
 0x488   :  { %v1936_v20 = vpop.f32.mrb[10].mxu1 }
 0x489   :  { %v2499_v21 = vpop.f32.mrb[11].mxu1 }
 0x496   :  { %v1943_v22 = vpop.f32.mrb[12].mxu1 }
 0x497   :  { %v629_v24 = vpop.f32.mrb[13].mxu1  ;;  %v645_v34 = vsel %vm2459_vm14, %v1943_v22, -1e+09 }
 0x498   :  { %v643_v25 = vsel %vm2455_vm13, %v629_v24, -1e+09  ;;  %v1944_v27 = vpop.f32.mrb[14].mxu1  ;;  %v652_v35 = vsel %vm475_vm15, %v645_v34, -inf }
 0x499   :  { %v632_v28 = vpop.f32.mrb[15].mxu1  ;;  %v646_v29 = vsel %vm475_vm15, %v643_v25, -inf }
 0x49a   :  { %v644_v30 = vsel %vm2463_vm2, %v632_v28, -1e+09  ;;  %647 = vmax.xlane.f32.xlu1 %v646_v29  ;;  %v2029_v29 = vld [vmem:[%s2842_s10] ss:$16 sps:$4 sm:$0xff]  }
 0x49b   :  { %v649_v31 = vsel %vm475_vm15, %v644_v30, -inf }
 0x49c   :  { %650 = vmax.xlane.f32.xlu0 %v649_v31  ;;  %v2040_v31 = vld [vmem:[%s2842_s10 + $0x2c] ss:$16 sps:$4 sm:$0xff]  }
 0x4a0   :  { %653 = vmax.xlane.f32.xlu0 %v652_v35  ;;  %v2038_v35 = vld [vmem:[%s2842_s10 + $0x28] ss:$16 sps:$4 sm:$0xff]  }
 0x527   :  { %v648_v37 = vpop.xlane.xlu1 %647 }
 0x528   :  { %v655_v39 = vsub.f32 %v643_v25, %v648_v37  ;;  %v2043_v37 = vld [vmem:[%s2842_s10 + $0x44] ss:$16 sps:$4 sm:$0xff]  }
 0x529   :  { %v651_v32 = vpop.xlane.xlu0 %650 }
 0x52a   :  { %v656_v38 = vsub.f32 %v644_v30, %v651_v32  ;;  %v658_v36 = vmul.f32 1.442695, %v655_v39  ;;  %v2037_v30 = vld [vmem:[%s2842_s10 + $0x24] ss:$16 sps:$4 sm:$0xff]   ;;  %v2046_v32 = vld [vmem:[%s2842_s10 + $0x4c] ss:$16 sps:$4 sm:$0xff]  }
 0x52b   :  { %v2044_v39 = vld [vmem:[%s2842_s10 + $0x48] ss:$16 sps:$4 sm:$0xff]  }
 0x52c   :  { %v660_v40 = vmul.f32 1.442695, %v656_v38  ;;  %v2041_v38 = vld [vmem:[%s2842_s10 + $0x40] ss:$16 sps:$4 sm:$0xff]  }
 0x52d   :  { %v654_v41 = vpop.xlane.xlu0 %653 }
 0x52e   :  { %2135 = vpow2.f32 %v660_v40  ;;  %v657_v42 = vsub.f32 %v645_v34, %v654_v41  ;;  %v2035_v34 = vld [vmem:[%s2842_s10 + $0x20] ss:$16 sps:$4 sm:$0xff]  }
 0x530   :  { %v662_v43 = vmul.f32 1.442695, %v657_v42 }
 0x532   :  { %2137 = vpow2.f32 %v662_v43 }
 0x533   :  { %2139 = vpow2.f32 %v658_v36 }
 0x538   :  { %v2136_v44 = vpop.eup %2135 }
 0x539   :  { %v667_v33 = vsel %vm475_vm15, %v2136_v44, 0.0 }
 0x53a   :  { %668 = vadd.xlane.f32.xlu0 %v667_v33 }
 0x53c   :  { %v2138_v45 = vpop.eup %2137 }
 0x53d   :  { %v670_v46 = vsel %vm475_vm15, %v2138_v45, 0.0  ;;  %v2140_v47 = vpop.eup %2139 }
 0x53e   :  { %671 = vadd.xlane.f32.xlu1 %v670_v46  ;;  %v664_v48 = vsel %vm475_vm15, %v2140_v47, 0.0 }
 0x542   :  { %665 = vadd.xlane.f32.xlu1 %v664_v48  ;;  %v2050_v48 = vld [vmem:[%s2842_s10 + $0x68] ss:$16 sps:$4 sm:$0xff]  }
 0x550   :  { %683 = vrot.lane.b32.xlu0 %v2421_v6, %s2228_s2 }
 0x553   :  { %685 = vrot.lane.b32.xlu1 %v2434_v16, %s2228_s2 }
 0x5c7   :  { %v669_v49 = vpop.xlane.xlu0 %668 }
 0x5cb   :  { %v672_v50 = vpop.xlane.xlu1 %671  ;;  %v684_v51 = vpop.permute.xlu0 %683 }
 0x5cc   :  { %1945 = vmatprep.subr.bf16.mxu0 %v684_v51  ;;  %2141 = vrcp.f32 %v672_v50  ;;  %v2058_v50 = vld [vmem:[%s2842_s10 + $0x8c] ss:$16 sps:$4 sm:$0xff]  }
 0x5cd   :  { %1946 = vmatpush3.bf16.msra.mxu0 %v684_v51  ;;  %2143 = vrcp.f32 %v669_v49  ;;  %v2055_v49 = vld [vmem:[%s2842_s10 + $0x84] ss:$16 sps:$4 sm:$0xff]   ;;  %v2053_v51 = vld [vmem:[%s2842_s10 + $0x80] ss:$16 sps:$4 sm:$0xff]  }
 0x5cf   :  { %v666_v52 = vpop.xlane.xlu1 %665 }
 0x5d0   :  { %2145 = vrcp.f32 %v666_v52  ;;  %v2056_v52 = vld [vmem:[%s2842_s10 + $0x88] ss:$16 sps:$4 sm:$0xff]  }
 0x5d3   :  { %v686_v53 = vpop.permute.xlu1 %685 }
 0x5d4   :  { %v695_v54 = vsel %vm519_vm1, %v686_v53, 0  ;;  %1978 = vmatprep.subr.msk.bf16.mxu0 %vm519_vm1, %v686_v53  ;;  %v2061_v53 = vld [vmem:[%s2842_s10 + $0xa4] ss:$16 sps:$4 sm:$0xff]  }
 0x5d5   :  { %1948 = vmatpush3.bf16.msra.mxu0 %v695_v54  ;;  %v2064_v54 = vld [vmem:[%s2842_s10 + $0xac] ss:$16 sps:$4 sm:$0xff]  }
 0x5d6   :  { %v2142_v55 = vpop.eup %2141  ;;  %1953 = vmatprep.subr.bf16.mxu0 %v2021_v61 }
 0x5d7   :  { %v2144_v6 = vpop.eup %2143  ;;  %v678_v57 = vmul.f32 %v2142_v55, %v2138_v45  ;;  %v2059_v55 = vld [vmem:[%s2842_s10 + $0xa0] ss:$16 sps:$4 sm:$0xff]  }
 0x5d8   :  { %v677_v58 = vmul.f32 %v2144_v6, %v2136_v44  ;;  %v2062_v6 = vld [vmem:[%s2842_s10 + $0xa8] ss:$16 sps:$4 sm:$0xff]  }
 0x5d9   :  { %v680_v60 = vpack.c.bf16 %v678_v57, %v678_v57  ;;  %v2070_v57 = vld [vmem:[%s2842_s10 + $0xcc] ss:$16 sps:$4 sm:$0xff]  }
 0x5da   :  { %v2146_v56 = vpop.eup %2145 }
 0x5db   :  { %v676_v16 = vmul.f32 %v2146_v56, %v2140_v47  ;;  %v2052_v47 = vld [vmem:[%s2842_s10 + $0x6c] ss:$16 sps:$4 sm:$0xff]   ;;  %v2067_v56 = vld [vmem:[%s2842_s10 + $0xc4] ss:$16 sps:$4 sm:$0xff]  }
 0x5dd   :  { %v679_v59 = vpack.c.bf16 %v677_v58, %v676_v16  ;;  %v2065_v16 = vld [vmem:[%s2842_s10 + $0xc0] ss:$16 sps:$4 sm:$0xff]   ;;  %v2068_v58 = vld [vmem:[%s2842_s10 + $0xc8] ss:$16 sps:$4 sm:$0xff]  }
 0x5df   :  { %1949 = vmatprep.mubr.msk.bf16.mxu0 %vm475_vm15, %v679_v59  ;;  %v2073_v59 = vld [vmem:[%s2842_s10 + $0xe4] ss:$16 sps:$4 sm:$0xff]  }
 0x5e0   :  { %1950 = vmatmul.mubr.msk.bf16.vlgmr.msra.gmra.mrb[8].mxu0 %vm475_vm15, %v680_v60  ;;  %v2076_v60 = vld [vmem:[%s2842_s10 + $0xec] ss:$16 sps:$4 sm:$0xff]  }
 0x5e1   :  { %1954 = vmatpush3.bf16.msra.mxu0 %v2021_v61  ;;  %v2071_v61 = vld [vmem:[%s2842_s10 + $0xe0] ss:$16 sps:$4 sm:$0xff]  }
 0x5e2   :  { %1955 = vmatprep.subr.bf16.mxu0 %v2022_v62 }
 0x5e5   :  { %1956 = vmatpush3.bf16.msra.mxu0 %v2022_v62  ;;  %v2074_v62 = vld [vmem:[%s2842_s10 + $0xe8] ss:$16 sps:$4 sm:$0xff]  }
 0x5e6   :  { %1957 = vmatprep.subr.bf16.mxu0 %v2023_v63 }
 0x5e9   :  { %1958 = vmatpush3.bf16.msra.mxu0 %v2023_v63 }
 0x5ea   :  { %1959 = vmatprep.subr.bf16.mxu0 %v2024_v4 }
 0x5ed   :  { %1960 = vmatpush3.bf16.msra.mxu0 %v2024_v4 }
 0x5ee   :  { %1961 = vmatprep.subr.bf16.mxu0 %v2025_v7 }
 0x5f1   :  { %1962 = vmatpush3.bf16.msra.mxu0 %v2025_v7 }
 0x5f2   :  { %1963 = vmatprep.subr.bf16.mxu0 %v2026_v8 }
 0x5f5   :  { %1964 = vmatpush3.bf16.msra.mxu0 %v2026_v8 }
 0x5f6   :  { %1965 = vmatprep.subr.bf16.mxu0 %v2027_v9 }
 0x5f9   :  { %1966 = vmatpush3.bf16.msra.mxu0 %v2027_v9 }
 0x5fa   :  { %1967 = vmatprep.subr.bf16.mxu0 %v2028_v3 }
 0x5fd   :  { %1968 = vmatpush3.bf16.msra.mxu0 %v2028_v3 }
 0x6b3   :  { %v1951_v10 = vpop.f32.mrb[8].mxu0 }
 0x6b4   :  { %752 = vrot.lane.b32.xlu0 %v1951_v10, %s2228_s2  ;;  %v731_v11 = vpop.f32.mrb[9].mxu0 }
 0x6b5   :  { %v1952_v5 = vpop.f32.mrb[10].mxu0 }
 0x6b6   :  { %v734_v12 = vpop.f32.mrb[11].mxu0 }
 0x6b7   :  { %v1984_v13 = vpack.i.bf16 %v734_v12, %v731_v11 }
 0x6b9   :  { %1985 = vrot.lane.b32.xlu1 %v1984_v13, %s2228_s2 }
 0x726   :  { %v753_v14 = vpop.permute.xlu0 %752 }
 0x727   :  { %v759_v22 = vsel %vm411_vm0, %v2495_v18, %v753_v14  ;;  %v2031_v18 = vld [vmem:[%s2842_s10 + $0x4] ss:$16 sps:$4 sm:$0xff]  }
 0x728   :  { %v761_v28 = vpack.c.bf16 %v759_v22, %v759_v22  ;;  %1086 = vmatprep.subr.bf16.mxu1 %v2031_v18  ;;  %v2077_v18 = vld [vmem:[%s2843_s11 + $0x40] sm:$0xff]  }
 0x729   :  { %1087 = vmatpush1.bf16.msra.mxu1 %v2029_v29 }
 0x72a   :  { %1088 = vmatprep.subr.bf16.mxu1 %v2037_v30  ;;  %v2080_v30 = vld [vmem:[%s2843_s11 + $0x8] sm:$0xff]  }
 0x72b   :  { %v1986_v15 = vpop.permute.xlu1 %1985 }
 0x72c   :  { %v1988_v17 = vunpack.i.h.bf16 %v1986_v15  ;;  %v1987_v20 = vunpack.i.l.bf16 %v1986_v15  ;;  %v1771_v15 = vld [vmem:[%s2841_s9] ss:$0 sm:$0xff] }
 0x72d   :  { %1089 = vmatpush1.bf16.msra.mxu1 %v2035_v34  ;;  %v2082_v34 = vld [vmem:[%s2843_s11 + $0x10] sm:$0xff]  }
 0x72e   :  { %v757_v24 = vsel %vm411_vm0, %v2497_v19, %v1987_v20  ;;  %v758_v25 = vsel %vm411_vm0, %v2499_v21, %v1988_v17  ;;  %v2032_v19 = vld [vmem:[%s2842_s10 + $0x8] ss:$16 sps:$4 sm:$0xff]   ;;  %v2034_v21 = vld [vmem:[%s2842_s10 + $0xc] ss:$16 sps:$4 sm:$0xff]   ;;  %1090 = vmatprep.subr.bf16.mxu1 %v2043_v37 }
 0x72f   :  { %v760_v27 = vpack.c.bf16 %v758_v25, %v757_v24  ;;  %1137 = vmatprep.subr.bf16.mxu0 %v2034_v21  ;;  %v2079_v21 = vld [vmem:[%s2843_s11 + $0x48] sm:$0xff]   ;;  %v2084_v37 = vld [vmem:[%s2843_s11 + $0x18] sm:$0xff]  }
 0x731   :  { %1969 = vmatprep.mubr.bf16.mxu0 %v760_v27  ;;  %1091 = vmatpush1.bf16.msra.mxu1 %v2041_v38  ;;  %v2086_v38 = vld [vmem:[%s2843_s11 + $0x20] sm:$0xff]  }
 0x732   :  { %1970 = vmatmul.mubr.bf16.vlgmr.msra.gmra.mrb[12].mxu0 %v761_v28 }
 0x733   :  { %1169 = vmatprep.mubr.bf16.mxu0 %v2227_v26  ;;  %1138 = vmatpush1.bf16.msra.mxu0 %v2032_v19  ;;  %v2078_v19 = vld [vmem:[%s2843_s11] sm:$0xff]  }
 0x734   :  { %1139 = vmatprep.subr.bf16.mxu0 %v2040_v31  ;;  %v2081_v31 = vld [vmem:[%s2843_s11 + $0x50] sm:$0xff]  }
 0x737   :  { %1140 = vmatpush1.bf16.msra.mxu0 %v2038_v35  ;;  %v2083_v35 = vld [vmem:[%s2843_s11 + $0x58] sm:$0xff]  }
 0x738   :  { %1141 = vmatprep.subr.bf16.mxu0 %v2046_v32  ;;  %v2085_v32 = vld [vmem:[%s2843_s11 + $0x60] sm:$0xff]  }
 0x73b   :  { %1142 = vmatpush1.bf16.msra.mxu0 %v2044_v39  ;;  %v2087_v39 = vld [vmem:[%s2843_s11 + $0x68] sm:$0xff]  }
 0x73c   :  { %1143 = vmatprep.subr.bf16.mxu0 %v2052_v47 }
 0x73f   :  { %1144 = vmatpush1.bf16.msra.mxu0 %v2050_v48 }
 0x740   :  { %1145 = vmatprep.subr.bf16.mxu0 %v2058_v50 }
 0x743   :  { %1146 = vmatpush1.bf16.msra.mxu0 %v2056_v52 }
 0x744   :  { %1147 = vmatprep.subr.bf16.mxu0 %v2064_v54 }
 0x747   :  { %1148 = vmatpush1.bf16.msra.mxu0 %v2062_v6 }
 0x748   :  { %1149 = vmatprep.subr.bf16.mxu0 %v2070_v57 }
 0x74b   :  { %1150 = vmatpush1.bf16.msra.mxu0 %v2068_v58 }
 0x74c   :  { %1151 = vmatprep.subr.bf16.mxu0 %v2076_v60 }
 0x74f   :  { %1152 = vmatpush1.bf16.msra.mxu0 %v2074_v62 }
 0x805   :  { %v1971_v40 = vpop.f32.mrb[12].mxu0 }
 0x806   :  { %v844_v41 = vpop.f32.mrb[13].mxu0  ;;  %v2599_v45 = vadd.f32 %v1971_v40, %v2318_v2  ;;  %v2047_v2 = vld [vmem:[%s2842_s10 + $0x60] ss:$16 sps:$4 sm:$0xff]   ;;  %v2088_v40 = vld [vmem:[%s2843_s11 + $0x28] sm:$0xff]  }
 0x807   :  { %v2591_v42 = vadd.f32 %v844_v41, %v2308_v0  ;;  %v1972_v36 = vpop.f32.mrb[14].mxu0  ;;  %v2089_v41 = vld [vmem:[%s2843_s11 + $0x70] sm:$0xff]  }
 0x808   :  { %v847_v43 = vpop.f32.mrb[15].mxu0  ;;  %v864_v0 = vmul.f32 %v2599_v45, %v2599_v45  ;;  %v2090_v36 = vld [vmem:[%s2843_s11 + $0x30] sm:$0xff]  }
 0x809   :  { %v2594_v44 = vadd.f32 %v847_v43, %v2313_v1  ;;  %v862_v33 = vmul.f32 %v2591_v42, %v2591_v42  ;;  %v2049_v1 = vld [vmem:[%s2842_s10 + $0x64] ss:$16 sps:$4 sm:$0xff]   ;;  %v2091_v43 = vld [vmem:[%s2843_s11 + $0x78] sm:$0xff]  }
 0x80a   :  { %1092 = vmatprep.subr.bf16.mxu1 %v2049_v1 }
 0x80b   :  { %865 = vadd.xlane.f32.xlu1 %v862_v33  ;;  %v863_v46 = vmul.f32 %v2594_v44, %v2594_v44  ;;  %1093 = vmatpush1.bf16.msra.mxu1 %v2047_v2  ;;  %v2092_v33 = vld [vmem:[%s2843_s11 + $0x38] sm:$0xff]  }
 0x80c   :  { %1094 = vmatprep.subr.bf16.mxu1 %v2055_v49 }
 0x80d   :  { %867 = vadd.xlane.f32.xlu0 %v863_v46 }
 0x80f   :  { %1095 = vmatpush1.bf16.msra.mxu1 %v2053_v51 }
 0x810   :  { %1096 = vmatprep.subr.bf16.mxu1 %v2061_v53 }
 0x811   :  { %869 = vadd.xlane.f32.xlu0 %v864_v0 }
 0x813   :  { %1097 = vmatpush1.bf16.msra.mxu1 %v2059_v55 }
 0x814   :  { %1098 = vmatprep.subr.bf16.mxu1 %v2067_v56 }
 0x817   :  { %1099 = vmatpush1.bf16.msra.mxu1 %v2065_v16 }
 0x818   :  { %1100 = vmatprep.subr.bf16.mxu1 %v2073_v59 }
 0x81b   :  { %1101 = vmatpush1.bf16.msra.mxu1 %v2071_v61 }
 0x81c   :  { %1873 = vmatprep.subr.bf16.mxu1 %v2077_v18 }
 0x898   :  { %v866_v63 = vpop.xlane.xlu1 %865 }
 0x899   :  { %v871_v4 = vmul.f32 0.0078125, %v866_v63 }
 0x89a   :  { %v868_v7 = vpop.xlane.xlu0 %867 }
 0x89b   :  { %v874_v8 = vadd.f32 1e-06, %v871_v4  ;;  %v872_v9 = vmul.f32 0.0078125, %v868_v7 }
 0x89d   :  { %2147 = vrsqrt.f32 %v874_v8  ;;  %v875_v3 = vadd.f32 1e-06, %v872_v9 }
 0x89e   :  { %v870_v10 = vpop.xlane.xlu0 %869 }
 0x89f   :  { %2149 = vrsqrt.f32 %v875_v3  ;;  %v873_v11 = vmul.f32 0.0078125, %v870_v10 }
 0x8a1   :  { %v876_v5 = vadd.f32 1e-06, %v873_v11 }
 0x8a3   :  { %2151 = vrsqrt.f32 %v876_v5 }
 0x8a7   :  { %v2148_v12 = vpop.eup %2147 }
 0x8a8   :  { %v880_v13 = vmul.f32 %v2148_v12, %v2591_v42 }
 0x8a9   :  { %v2150_v14 = vpop.eup %2149 }
 0x8aa   :  { %v881_v17 = vmul.f32 %v2150_v14, %v2594_v44  ;;  %v889_v20 = vmul.f32 %v1771_v15, %v880_v13 }
 0x8ac   :  { %v890_v22 = vmul.f32 %v1771_v15, %v881_v17 }
 0x8ad   :  { %v2152_v24 = vpop.eup %2151 }
 0x8ae   :  { %v892_v25 = vpack.c.bf16 %v890_v22, %v889_v20  ;;  %v882_v27 = vmul.f32 %v2152_v24, %v2599_v45 }
 0x8b0   :  { %1119 = vmatmul.mubr.bf16.vlgmr.msra.gmra.mrb[16].mxu1 %v892_v25  ;;  %1170 = vmatmul.mubr.bf16.vlgmr.msra.gmra.mrb[16].mxu0 %v892_v25  ;;  %v891_v28 = vmul.f32 %v1771_v15, %v882_v27 }
 0x8b1   :  { %1128 = vmatprep.mubr.bf16.mxu1 %v2227_v26  ;;  %1179 = vmatprep.mubr.bf16.mxu0 %v2227_v26 }
 0x8b2   :  { %v893_v29 = vpack.c.bf16 %v891_v28, %v891_v28  ;;  %1874 = vmatpush3.bf16.msra.mxu1 %v2078_v19 }
 0x8b3   :  { %1875 = vmatprep.subr.bf16.mxu1 %v2079_v21 }
 0x8b6   :  { %1876 = vmatpush3.bf16.msra.mxu1 %v2080_v30 }
 0x8b7   :  { %1877 = vmatprep.subr.bf16.mxu1 %v2081_v31 }
 0x8b8   :  { %1129 = vmatmul.mubr.bf16.gmra.mrb[20].mxu1 %v893_v29  ;;  %1180 = vmatmul.mubr.bf16.gmra.mrb[20].mxu0 %v893_v29 }
 0x8b9   :  { %1580 = vmatprep.mubr.bf16.mxu0 %v2227_v26 }
 0x8ba   :  { %1878 = vmatpush3.bf16.msra.mxu1 %v2082_v34 }
 0x8bb   :  { %1879 = vmatprep.subr.bf16.mxu1 %v2083_v35 }
 0x8be   :  { %1880 = vmatpush3.bf16.msra.mxu1 %v2084_v37 }
 0x8bf   :  { %1881 = vmatprep.subr.bf16.mxu1 %v2085_v32 }
 0x8c2   :  { %1882 = vmatpush3.bf16.msra.mxu1 %v2086_v38 }
 0x8c3   :  { %1883 = vmatprep.subr.bf16.mxu1 %v2087_v39 }
 0x8c6   :  { %1884 = vmatpush3.bf16.msra.mxu1 %v2088_v40 }
 0x8c7   :  { %1885 = vmatprep.subr.bf16.mxu1 %v2089_v41 }
 0x8ca   :  { %1886 = vmatpush3.bf16.msra.mxu1 %v2090_v36 }
 0x8cb   :  { %1887 = vmatprep.subr.bf16.mxu1 %v2091_v43 }
 0x8ce   :  { %1888 = vmatpush3.bf16.msra.mxu1 %v2092_v33 }
 0x983   :  { %v1120_v46 = vpop.f32.mrb[16].mxu1  ;;  %v1171_v0 = vpop.f32.mrb[16].mxu0 }
 0x984   :  { %v1188_v1 = vsub.f32 0.0, %v1120_v46  ;;  %v1122_v47 = vpop.f32.mrb[17].mxu1  ;;  %v1173_v2 = vpop.f32.mrb[17].mxu0 }
 0x985   :  { %v1189_v48 = vsub.f32 0.0, %v1122_v47  ;;  %v1124_v49 = vpop.f32.mrb[18].mxu1  ;;  %v1175_v50 = vpop.f32.mrb[18].mxu0 }
 0x986   :  { %v1194_v51 = vmul.f32 1.442695, %v1188_v1  ;;  %v1190_v52 = vsub.f32 0.0, %v1124_v49  ;;  %v1126_v53 = vpop.f32.mrb[19].mxu1  ;;  %v1177_v54 = vpop.f32.mrb[19].mxu0 }
 0x987   :  { %v1196_v55 = vmul.f32 1.442695, %v1189_v48  ;;  %v1191_v6 = vsub.f32 0.0, %v1126_v53  ;;  %v2098_v48 = vld [vmem:[%s2845_s13 + $0x14] ss:$8 sps:$4 sm:$0xff]  }
 0x988   :  { %2153 = vpow2.f32 %v1194_v51  ;;  %v1198_v56 = vmul.f32 1.442695, %v1190_v52  ;;  %v2099_v51 = vld [vmem:[%s2845_s13 + $0x20] ss:$8 sps:$4 sm:$0xff]  }
 0x989   :  { %2155 = vpow2.f32 %v1196_v55  ;;  %v1200_v57 = vmul.f32 1.442695, %v1191_v6 }
 0x98a   :  { %2157 = vpow2.f32 %v1198_v56 }
 0x98b   :  { %2159 = vpow2.f32 %v1200_v57  ;;  %v1130_v16 = vpop.f32.mrb[20].mxu1  ;;  %v1181_v58 = vpop.f32.mrb[20].mxu0 }
 0x98c   :  { %v1192_v59 = vsub.f32 0.0, %v1130_v16  ;;  %v1132_v60 = vpop.f32.mrb[21].mxu1  ;;  %v1183_v61 = vpop.f32.mrb[21].mxu0 }
 0x98d   :  { %v1193_v62 = vsub.f32 0.0, %v1132_v60  ;;  %v1134_v63 = vpop.f32.mrb[22].mxu1  ;;  %v1185_v4 = vpop.f32.mrb[22].mxu0 }
 0x98e   :  { %v1202_v7 = vmul.f32 1.442695, %v1192_v59  ;;  %v1135_v8 = vpop.f32.mrb[23].mxu1  ;;  %v1186_v9 = vpop.f32.mrb[23].mxu0 }
 0x98f   :  { %v1204_v3 = vmul.f32 1.442695, %v1193_v62  ;;  %v2107_v9 = vld [vmem:[%s2845_s13 + $0x44] ss:$8 sps:$4 sm:$0xff]  }
 0x990   :  { %2161 = vpow2.f32 %v1202_v7 }
 0x991   :  { %2163 = vpow2.f32 %v1204_v3  ;;  %v2110_v3 = vld [vmem:[%s2845_s13 + $0x54] ss:$8 sps:$4 sm:$0xff]  }
 0x992   :  { %v2154_v10 = vpop.eup %2153 }
 0x993   :  { %v2156_v11 = vpop.eup %2155  ;;  %v1206_v5 = vadd.f32 1.0, %v2154_v10  ;;  %v2108_v10 = vld [vmem:[%s2845_s13 + $0x50] ss:$8 sps:$4 sm:$0xff]  }
 0x994   :  { %v2158_v12 = vpop.eup %2157  ;;  %v1207_v13 = vadd.f32 1.0, %v2156_v11  ;;  %v2113_v11 = vld [vmem:[%s2845_s13 + $0x64] ss:$8 sps:$4 sm:$0xff]  }
 0x995   :  { %v2160_v14 = vpop.eup %2159  ;;  %2165 = vrcp.f32 %v1206_v5  ;;  %v1208_v15 = vadd.f32 1.0, %v2158_v12  ;;  %v2111_v5 = vld [vmem:[%s2845_s13 + $0x60] ss:$8 sps:$4 sm:$0xff]   ;;  %v2114_v12 = vld [vmem:[%s2845_s13 + $0x70] ss:$8 sps:$4 sm:$0xff]  }
 0x996   :  { %2167 = vrcp.f32 %v1207_v13  ;;  %v1209_v17 = vadd.f32 1.0, %v2160_v14  ;;  %v2116_v13 = vld [vmem:[%s2845_s13 + $0x74] ss:$8 sps:$4 sm:$0xff]  }
 0x997   :  { %2169 = vrcp.f32 %v1208_v15 }
 0x998   :  { %2171 = vrcp.f32 %v1209_v17 }
 0x99a   :  { %v2162_v20 = vpop.eup %2161 }
 0x99b   :  { %v2164_v22 = vpop.eup %2163  ;;  %v1210_v24 = vadd.f32 1.0, %v2162_v20 }
 0x99c   :  { %v1211_v25 = vadd.f32 1.0, %v2164_v22 }
 0x99d   :  { %2173 = vrcp.f32 %v1210_v24 }
 0x99e   :  { %2175 = vrcp.f32 %v1211_v25 }
 0x99f   :  { %v2166_v27 = vpop.eup %2165 }
 0x9a0   :  { %v2168_v28 = vpop.eup %2167  ;;  %v1224_v29 = vmul.f32 %v2166_v27, %v1120_v46 }
 0x9a1   :  { %v2170_v18 = vpop.eup %2169  ;;  %v1225_v19 = vmul.f32 %v2168_v28, %v1122_v47 }
 0x9a2   :  { %v2172_v21 = vpop.eup %2171  ;;  %v1230_v30 = vmul.f32 %v1224_v29, %v1171_v0  ;;  %v1226_v31 = vmul.f32 %v2170_v18, %v1124_v49  ;;  %v2093_v0 = vld [vmem:[%s2845_s13] ss:$8 sps:$4 sm:$0xff]   ;;  %v2096_v49 = vld [vmem:[%s2845_s13 + $0x10] ss:$8 sps:$4 sm:$0xff]  }
 0x9a3   :  { %v1231_v34 = vmul.f32 %v1225_v19, %v1173_v2  ;;  %v1227_v35 = vmul.f32 %v2172_v21, %v1126_v53  ;;  %v2095_v2 = vld [vmem:[%s2845_s13 + $0x4] ss:$8 sps:$4 sm:$0xff]   ;;  %v1820_v21 = vld [vmem:[%s2844_s12] ss:$0 sm:$0xff] }
 0x9a4   :  { %v1232_v37 = vmul.f32 %v1226_v31, %v1175_v50  ;;  %1548 = vmatprep.subr.bf16.mxu0 %v2095_v2  ;;  %v2101_v50 = vld [vmem:[%s2845_s13 + $0x24] ss:$8 sps:$4 sm:$0xff]  }
 0x9a5   :  { %v1233_v32 = vmul.f32 %v1227_v35, %v1177_v54  ;;  %1549 = vmatpush1.bf16.msra.mxu0 %v2093_v0 }
 0x9a6   :  { %v1236_v38 = vpack.c.bf16 %v1232_v37, %v1230_v30  ;;  %1550 = vmatprep.subr.bf16.mxu0 %v2098_v48 }
 0x9a7   :  { %v2174_v39 = vpop.eup %2173  ;;  %v1237_v40 = vpack.c.bf16 %v1233_v32, %v1231_v34 }
 0x9a8   :  { %v2176_v41 = vpop.eup %2175  ;;  %v1228_v36 = vmul.f32 %v2174_v39, %v1130_v16 }
 0x9a9   :  { %v1229_v43 = vmul.f32 %v2176_v41, %v1132_v60  ;;  %1400 = vmatprep.mubr.bf16.mxu1 %v1237_v40  ;;  %1551 = vmatpush1.bf16.msra.mxu0 %v2096_v49  ;;  %v1647_v49 = vld [vmem:[%s2836_s4 + $0x10] sm:$0xff] }
 0x9aa   :  { %v1234_v33 = vmul.f32 %v1228_v36, %v1181_v58  ;;  %1401 = vmatmul.mubr.bf16.vlgmr.msra.gmra.mrb[24].mxu1 %v1236_v38  ;;  %1552 = vmatprep.subr.bf16.mxu0 %v2101_v50  ;;  %v1646_v50 = vld [vmem:[%s2836_s4 + $0x8] sm:$0xff] }
 0x9ab   :  { %v1235_v1 = vmul.f32 %v1229_v43, %v1183_v61 }
 0x9ac   :  { %v1238_v47 = vpack.c.bf16 %v1234_v33, %v1234_v33 }
 0x9ad   :  { %v1239_v46 = vpack.c.bf16 %v1235_v1, %v1235_v1  ;;  %1553 = vmatpush1.bf16.msra.mxu0 %v2099_v51 }
 0x9af   :  { %1408 = vmatprep.mubr.bf16.mxu1 %v1239_v46 }
 0x9b2   :  { %1409 = vmatmul.mubr.bf16.gmra.mrb[28].mxu1 %v1238_v47 }
 0xa7d   :  { %v1889_v52 = vpop.f32.mrb[24].mxu1 }
 0xa7e   :  { %v1890_v53 = vpop.f32.mrb[25].mxu1 }
 0xa7f   :  { %v1891_v54 = vadd.f32 %v1890_v53, %v1889_v52  ;;  %v1892_v55 = vpop.f32.mrb[26].mxu1 }
 0xa80   :  { %v1893_v6 = vpop.f32.mrb[27].mxu1 }
 0xa81   :  { %v1416_v56 = vadd.f32 %v1891_v54, %v2591_v42  ;;  %v1894_v57 = vadd.f32 %v1893_v6, %v1892_v55  ;;  %v2104_v42 = vld [vmem:[%s2845_s13 + $0x34] ss:$8 sps:$4 sm:$0xff]   ;;  %v1644_v55 = vadd.s32 128, %v2446_v23 }
 0xa82   :  { %1554 = vmatprep.subr.bf16.mxu0 %v2104_v42 }
 0xa83   :  { %v1417_v16 = vadd.f32 %v1894_v57, %v2594_v44  ;;  %v1420_v58 = vmul.f32 %v1416_v56, %v1416_v56  ;;  %v2102_v44 = vld [vmem:[%s2845_s13 + $0x30] ss:$8 sps:$4 sm:$0xff]  }
 0xa84   :  { %1555 = vmatpush1.bf16.msra.mxu0 %v2102_v44 }
 0xa85   :  { %v1895_v59 = vpop.f32.mrb[28].mxu1  ;;  %1423 = vadd.xlane.f32.xlu1 %v1420_v58  ;;  %v1421_v60 = vmul.f32 %v1417_v16, %v1417_v16  ;;  %1556 = vmatprep.subr.bf16.mxu0 %v2107_v9 }
 0xa86   :  { %v1896_v61 = vpop.f32.mrb[29].mxu1 }
 0xa87   :  { %v1897_v62 = vadd.f32 %v1896_v61, %v1895_v59  ;;  %v1898_v63 = vpop.f32.mrb[30].mxu1  ;;  %1425 = vadd.xlane.f32.xlu0 %v1421_v60 }
 0xa88   :  { %v1899_v4 = vpop.f32.mrb[31].mxu1 }
 0xa89   :  { %v1418_v7 = vadd.f32 %v1897_v62, %v2599_v45  ;;  %v2105_v45 = vld [vmem:[%s2845_s13 + $0x40] ss:$8 sps:$4 sm:$0xff]  }
 0xa8a   :  { %1557 = vmatpush1.bf16.msra.mxu0 %v2105_v45 }
 0xa8b   :  { %v1422_v8 = vmul.f32 %v1418_v7, %v1418_v7  ;;  %1558 = vmatprep.subr.bf16.mxu0 %v2110_v3 }
 0xa8d   :  { %1427 = vadd.xlane.f32.xlu1 %v1422_v8 }
 0xa8e   :  { %1559 = vmatpush1.bf16.msra.mxu0 %v2108_v10 }
 0xa8f   :  { %1560 = vmatprep.subr.bf16.mxu0 %v2113_v11 }
 0xa92   :  { %1561 = vmatpush1.bf16.msra.mxu0 %v2111_v5 }
 0xa93   :  { %1562 = vmatprep.subr.bf16.mxu0 %v2116_v13 }
 0xa96   :  { %1563 = vmatpush1.bf16.msra.mxu0 %v2114_v12 }
 0xb12   :  { %v1424_v14 = vpop.xlane.xlu1 %1423 }
 0xb13   :  { %v1429_v15 = vmul.f32 0.0078125, %v1424_v14 }
 0xb14   :  { %v1426_v17 = vpop.xlane.xlu0 %1425 }
 0xb15   :  { %v1432_v20 = vadd.f32 1e-06, %v1429_v15  ;;  %v1430_v22 = vmul.f32 0.0078125, %v1426_v17 }
 0xb17   :  { %2177 = vrsqrt.f32 %v1432_v20  ;;  %v1433_v24 = vadd.f32 1e-06, %v1430_v22 }
 0xb19   :  { %2179 = vrsqrt.f32 %v1433_v24 }
 0xb1a   :  { %v1428_v25 = vpop.xlane.xlu1 %1427 }
 0xb1b   :  { %v1431_v27 = vmul.f32 0.0078125, %v1428_v25 }
 0xb1d   :  { %v1434_v28 = vadd.f32 1e-06, %v1431_v27 }
 0xb1f   :  { %2181 = vrsqrt.f32 %v1434_v28 }
 0xb21   :  { %v2178_v29 = vpop.eup %2177 }
 0xb22   :  { %v1438_v18 = vmul.f32 %v2178_v29, %v1416_v56  ;;  %v1682_v29 = vld [vmem:[%s2837_s5 + $0x8] sm:$0xff] }
 0xb23   :  { %v2180_v19 = vpop.eup %2179 }
 0xb24   :  { %v1439_v30 = vmul.f32 %v2180_v19, %v1417_v16  ;;  %v1447_v31 = vmul.f32 %v1820_v21, %v1438_v18  ;;  %v1700_v19 = vsel %vm1687_vm7, %v1682_v29, 0.0 }
 0xb26   :  { %v1448_v34 = vmul.f32 %v1820_v21, %v1439_v30 }
 0xb28   :  { %v1450_v35 = vpack.c.bf16 %v1448_v34, %v1447_v31 }
 0xb29   :  { %v2182_v37 = vpop.eup %2181 }
 0xb2a   :  { %1581 = vmatmul.mubr.bf16.vlgmr.msra.gmra.mrb[24].mxu0 %v1450_v35  ;;  %v1440_v32 = vmul.f32 %v2182_v37, %v1418_v7 }
 0xb2b   :  { %1590 = vmatprep.mubr.bf16.mxu0 %v2227_v26  ;;  %v1645_v26 = vld [vmem:[%s2836_s4] sm:$0xff] }
 0xb2c   :  { %v1449_v38 = vmul.f32 %v1820_v21, %v1440_v32  ;;  %v1683_v21 = vld [vmem:[%s2837_s5 + $0x10] sm:$0xff] }
 0xb2d   :  { %v1702_v31 = vsel %vm1687_vm7, %v1683_v21, 0.0 }
 0xb2e   :  { %v1451_v39 = vpack.c.bf16 %v1449_v38, %v1449_v38 }
 0xb32   :  { %1591 = vmatmul.mubr.bf16.gmra.mrb[28].mxu0 %v1451_v39 }
 0xbfd   :  { %v1582_v40 = vpop.f32.mrb[24].mxu0 }
 0xbfe   :  { %v1584_v41 = vpop.f32.mrb[25].mxu0 }
 0xbff   :  { %v1586_v36 = vpop.f32.mrb[26].mxu0  ;;  %v1599_v43 = vmax.f32 %v1582_v40, %v1584_v41 }
 0xc00   :  { %v1588_v33 = vpop.f32.mrb[27].mxu0 }
 0xc01   :  { %1600 = vmax.xlane.f32.xlu0 %v1599_v43  ;;  %v1602_v1 = vmax.f32 %v1586_v36, %v1588_v33 }
 0xc03   :  { %1603 = vmax.xlane.f32.xlu1 %v1602_v1 }
 0xc05   :  { %v1592_v46 = vpop.f32.mrb[28].mxu0 }
 0xc06   :  { %v1594_v47 = vpop.f32.mrb[29].mxu0 }
 0xc07   :  { %v1596_v0 = vpop.f32.mrb[30].mxu0  ;;  %v1605_v2 = vmax.f32 %v1592_v46, %v1594_v47 }
 0xc08   :  { %v1597_v48 = vpop.f32.mrb[31].mxu0 }
 0xc09   :  { %1606 = vmax.xlane.f32.xlu0 %v1605_v2 }
 0xc14   :  { %1649 = vperm.xlu1 %1982, %v1645_v26  }
 0xc18   :  { %1655 = vperm.xlu1 %1982, %v1647_v49  }
 0xc1f   :  { %1652 = vperm.xlu0 %1983, %v1646_v50  }
 0xc8e   :  { %v2786_v51 = vpop.xlane.xlu0 %1600 }
 0xc8f   :  { %v1608_v52 = vsub.f32 %v1582_v40, %v2786_v51  ;;  %v1609_v53 = vsub.f32 %v1584_v41, %v2786_v51 }
 0xc90   :  { %v2790_v54 = vpop.xlane.xlu1 %1603 }
 0xc91   :  { %v1614_v6 = vmul.f32 1.442695, %v1608_v52  ;;  %v1616_v56 = vmul.f32 1.442695, %v1609_v53  ;;  %v1610_v57 = vsub.f32 %v1586_v36, %v2790_v54  ;;  %v1611_v16 = vsub.f32 %v1588_v33, %v2790_v54 }
 0xc93   :  { %2183 = vpow2.f32 %v1614_v6  ;;  %v1618_v58 = vmul.f32 1.442695, %v1610_v57  ;;  %v1620_v59 = vmul.f32 1.442695, %v1611_v16 }
 0xc94   :  { %2185 = vpow2.f32 %v1616_v56  ;;  %v1650_v60 = vpop.permute.xlu1 %1649 }
 0xc95   :  { %2187 = vpow2.f32 %v1618_v58  ;;  %vm1657_vm0 = vcmp.eq.s32.totalorder %v2446_v23, %v1650_v60  ;;  %vm1658_vm1 = vcmp.eq.s32.totalorder %v1644_v55, %v1650_v60 }
 0xc96   :  { %2189 = vpow2.f32 %v1620_v59  ;;  %v2796_v61 = vpop.xlane.xlu0 %1606  ;;  %v1663_v62 = vsel %vm1657_vm0, %v1582_v40, 0.0  ;;  %v1664_v63 = vsel %vm1658_vm1, %v1584_v41, 0.0 }
 0xc97   :  { %v1612_v4 = vsub.f32 %v1592_v46, %v2796_v61  ;;  %v1613_v7 = vsub.f32 %v1594_v47, %v2796_v61  ;;  %v1669_v8 = vadd.f32 %v1664_v63, %v1663_v62 }
 0xc98   :  { %v1656_v42 = vpop.permute.xlu1 %1655 }
 0xc99   :  { %v1622_v44 = vmul.f32 1.442695, %v1612_v4  ;;  %v1624_v9 = vmul.f32 1.442695, %v1613_v7  ;;  %vm1661_vm3 = vcmp.eq.s32.totalorder %v2446_v23, %v1656_v42  ;;  %vm1662_vm4 = vcmp.eq.s32.totalorder %v1644_v55, %v1656_v42 }
 0xc9a   :  { %v1667_v45 = vsel %vm1661_vm3, %v1592_v46, 0.0  ;;  %v1668_v3 = vsel %vm1662_vm4, %v1594_v47, 0.0 }
 0xc9b   :  { %2191 = vpow2.f32 %v1622_v44  ;;  %v1675_v10 = vadd.f32 %v1668_v3, %v1667_v45 }
 0xc9c   :  { %2193 = vpow2.f32 %v1624_v9 }
 0xc9d   :  { %v2184_v11 = vpop.eup %2183 }
 0xc9e   :  { %v2186_v5 = vpop.eup %2185  ;;  %v1653_v12 = vpop.permute.xlu0 %1652 }
 0xc9f   :  { %v2188_v13 = vpop.eup %2187  ;;  %vm1659_vm5 = vcmp.eq.s32.totalorder %v2446_v23, %v1653_v12  ;;  %vm1660_vm6 = vcmp.eq.s32.totalorder %v1644_v55, %v1653_v12  ;;  %v1626_v14 = vadd.f32 %v2186_v5, %v2184_v11  ;;  %v1681_v23 = vld [vmem:[%s2837_s5] sm:$0xff]  ;;  %s2229_s5 = smov [#allocation2]  }
 0xca0   :  { %v2190_v15 = vpop.eup %2189  ;;  %v1665_v17 = vsel %vm1659_vm5, %v1586_v36, 0.0  ;;  %v1666_v20 = vsel %vm1660_vm6, %v1588_v33, 0.0  ;;  %v1699_v18 = vsel %vm1687_vm7, %v1681_v23, 0.0  ;;  %s1721_s10 = sshll.u32 %s2229_s5, 4  ;;  %s1722_s10 = int_to_ptr.vmem [resolvable:$true] %s1721_s10 }
 0xca1   :  { %1627 = vadd.xlane.f32.xlu1 %v1626_v14  ;;  %v1629_v22 = vadd.f32 %v2190_v15, %v2188_v13  ;;  %v1672_v24 = vadd.f32 %v1666_v20, %v1665_v17  ;;  %v1701_v30 = vadd.f32 %v1700_v19, %v1699_v18  ;;  %s2203_s17 = scalar_lea.vmem %s1722_s10, 16  ;;  %s2207_s9 = scalar_lea.vmem %s1722_s10, 32 }
 0xca2   :  { %p2204_p0 = scmp.ne.s32.totalorder %s1722_s10, %s2203_s17  ;;  %p2208_p1 = scmp.lt.s32.totalorder %s1722_s10, %s1722_s10 }
 0xca3   :  { %1630 = vadd.xlane.f32.xlu0 %v1629_v22  ;;  %v1703_v34 = vadd.f32 %v1702_v31, %v1701_v30  ;;  %p2209_p2 = scmp.lt.s32.totalorder %s2207_s9, %s2203_s17 }
 0xca5   :  { %v2192_v25 = vpop.eup %2191  ;;  %1670 = vadd.xlane.f32.xlu1 %v1669_v8  ;;  %v1704_v32 = vrot.slane %v1703_v34, 4  ;;  %p2210_p3 = por %p2209_p2, %p2208_p1 }
 0xca6   :  { %v2194_v27 = vpop.eup %2193 }
 0xca7   :  { %v1632_v28 = vadd.f32 %v2194_v27, %v2192_v25  ;;  %v1705_v38 = vadd.f32 %v1704_v32, %v1703_v34  ;;  %p2211_p4 = pnand %p2210_p3, %p2204_p0 }
 0xca9   :  { %1633 = vadd.xlane.f32.xlu0 %v1632_v28  ;;  %1676 = vadd.xlane.f32.xlu1 %v1675_v10  ;;  %v1706_v40 = vrot.slane %v1705_v38, 2 }
 0xcab   :  { %v1707_v46 = vadd.f32 %v1706_v40, %v1705_v38 }
 0xcad   :  { %1673 = vadd.xlane.f32.xlu0 %v1672_v24  ;;  %v1708_v26 = vrot.slane %v1707_v46, 1 }
 0xcaf   :  { %v1709_v56 = vadd.f32 %v1708_v26, %v1707_v46 }
 0xd2e   :  { %v1628_v35 = vpop.xlane.xlu1 %1627 }
 0xd2f   :  { %2195 = vlog2.f32 %v1628_v35 }
 0xd30   :  { %v1631_v37 = vpop.xlane.xlu0 %1630 }
 0xd31   :  { %2197 = vlog2.f32 %v1631_v37 }
 0xd32   :  { %v1671_v0 = vpop.xlane.xlu1 %1670 }
 0xd36   :  { %v1634_v39 = vpop.xlane.xlu0 %1633  ;;  %v1677_v57 = vpop.xlane.xlu1 %1676 }
 0xd37   :  { %2199 = vlog2.f32 %v1634_v39 }
 0xd39   :  { %v2196_v41 = vpop.eup %2195 }
 0xd3a   :  { %v1636_v36 = vmul.f32 0.6931472, %v2196_v41  ;;  %v1674_v2 = vpop.xlane.xlu0 %1673 }
 0xd3b   :  { %v2198_v43 = vpop.eup %2197 }
 0xd3c   :  { %v1638_v33 = vmul.f32 0.6931472, %v2198_v43  ;;  %v1641_v1 = vadd.f32 %v1636_v36, %v2786_v51 }
 0xd3e   :  { %v1642_v47 = vadd.f32 %v1638_v33, %v2790_v54  ;;  %v1678_v48 = vsub.f32 %v1641_v1, %v1671_v0  ;;  %v1710_v54 = vmax.f32 %v1709_v56, 1.0 }
 0xd40   :  { %v1679_v49 = vsub.f32 %v1642_v47, %v1674_v2  ;;  %v1684_v55 = vmul.f32 %v1681_v23, %v1678_v48  ;;  %2201 = vrcp.f32 %v1710_v54 }
 0xd41   :  { %v2200_v50 = vpop.eup %2199 }
 0xd42   :  { %v1640_v52 = vmul.f32 0.6931472, %v2200_v50  ;;  %v1685_v53 = vmul.f32 %v1682_v29, %v1679_v49  ;;  %v1688_v51 = vsel %vm1687_vm7, %v1684_v55, 0.0 }
 0xd44   :  { %v1643_v6 = vadd.f32 %v1640_v52, %v2796_v61  ;;  %v1689_v58 = vsel %vm1687_vm7, %v1685_v53, 0.0 }
 0xd45   :  { %v1690_v60 = vadd.f32 %v1689_v58, %v1688_v51 }
 0xd46   :  { %v1680_v16 = vsub.f32 %v1643_v6, %v1677_v57 }
 0xd48   :  { %v1686_v59 = vmul.f32 %v1683_v21, %v1680_v16 }
 0xd4a   :  { %v1691_v62 = vsel %vm1687_vm7, %v1686_v59, 0.0  ;;  %v2202_v61 = vpop.eup %2201 }
 0xd4b   :  { %v1692_v63 = vadd.f32 %v1691_v62, %v1690_v60 }
 0xd4d   :  { %v1693_v4 = vrot.slane %v1692_v63, 4 }
 0xd4f   :  { %v1694_v7 = vadd.f32 %v1693_v4, %v1692_v63 }
 0xd51   :  { %v1695_v8 = vrot.slane %v1694_v7, 2 }
 0xd53   :  { %v1696_v42 = vadd.f32 %v1695_v8, %v1694_v7 }
 0xd55   :  { %v1697_v44 = vrot.slane %v1696_v42, 1 }
 0xd57   :  { %v1698_v9 = vadd.f32 %v1697_v44, %v1696_v42 }
 0xd59   :  { %v1712_v45 = vmul.f32 %v2202_v61, %v1698_v9 }
 0xd5b   :  { %1714 = vst.msk [vmem:[#allocation2] sm:$0x1] %vm1713_vm8, %v1712_v45 }
 0xd5c   :  { %2214 = shalt.err (!%p2211_p4)
}
 0xd5d   :  { %s2215_s19 = scalar_lea.hbm %s2846_s14, 16 }
 0xd5e   :  { %p2216_p5 = scmp.ne.s32.totalorder %s2846_s14, %s2215_s19  ;;  %p2219_p6 = scmp.lt.u32.totalorder %s2215_s19, %s2846_s14 }
 0xd60   :  { %p2221_p7 = pnand %p2219_p6, %p2216_p5 }
 0xd62   :  { %2224 = shalt.err (!%p2221_p7)
}
 0xd63   :  { %1724 = dma.vmem_to_hbm [thread:$0]  %s1722_s10, 16, %s2846_s14, [#allocation3]  }
 0xd64   :  { %2225 = dma.done.wait [#allocation3], 16  }
 0xd65   :  { %2226 = vsyncadd [#allocation3], 4294967280 }
 0xd66   :  { %1728 = vsyncpa [#allocation3], 1 }

// kernel: emu_forward.2
= control target key start
LH: loop header
LB: loop body
LE: loop exit
PB: predicated region body
PF: predicated region fallthrough
CT: control target
= control target key end

     0   :  { %s5159_s6 = smov 1   ;;  %s5160_s10 = smov 2   ;;  %s6068_s0 = inlined_call_operand.smem [shape: u32[45], index: -1, kind: input, shape index: {}] }
   0x1   :  { %s5242_s5 = sld [smem:[%s6068_s0]]   ;;  %s5161_s14 = smov 3  }
   0x2   :  { %s5247_s9 = sld [smem:[%s6068_s0 + %s5159_s6]]   ;;  %s5162_s18 = smov 4  }
   0x3   :  { %s5252_s13 = sld [smem:[%s6068_s0 + %s5160_s10]]   ;;  %s5163_s22 = smov 5  }
   0x4   :  { %s5257_s17 = sld [smem:[%s6068_s0 + %s5161_s14]]   ;;  %s5164_s26 = smov 6  }
   0x5   :  { %s5262_s21 = sld [smem:[%s6068_s0 + %s5162_s18]]   ;;  %s5165_s30 = smov 7  }
   0x6   :  { %s5267_s25 = sld [smem:[%s6068_s0 + %s5163_s22]]   ;;  %s5166_s4 = smov 8  }
   0x7   :  { %6089 = sst [smem:[#allocation56_spill]] %s5242_s5  ;;  %s5167_s10 = smov 9  }
   0x8   :  { %6090 = sst [smem:[#allocation57_spill]] %s5247_s9  ;;  %s5168_s15 = smov 10  }
   0x9   :  { %6091 = sst [smem:[#allocation58_spill]] %s5252_s13  ;;  %s5169_s20 = smov 11  }
   0xa   :  { %6092 = sst [smem:[#allocation59_spill]] %s5257_s17  ;;  %s5171_s1 = smov 13  }
   0xb   :  { %6093 = sst [smem:[#allocation60_spill]] %s5262_s21  ;;  %s5172_s7 = smov 14  }
   0xc   :  { %6094 = sst [smem:[#allocation61_spill]] %s5267_s25  ;;  %s5174_s22 = smov 16  }
   0xd   :  { %s5272_s29 = sld [smem:[%s6068_s0 + %s5164_s26]]   ;;  %s5170_s26 = smov 12  }
   0xe   :  { %s5277_s3 = sld [smem:[%s6068_s0 + %s5165_s30]]   ;;  %s5175_s28 = smov 17  }
   0xf   :  { %s5282_s8 = sld [smem:[%s6068_s0 + %s5166_s4]]  }
  0x10   :  { %s5287_s14 = sld [smem:[%s6068_s0 + %s5167_s10]]  }
  0x11   :  { %s5292_s19 = sld [smem:[%s6068_s0 + %s5168_s15]]   ;;  %s5173_s15 = smov 15  }
  0x12   :  { %s5297_s24 = sld [smem:[%s6068_s0 + %s5169_s20]]  }
  0x13   :  { %6095 = sst [smem:[#allocation62_spill]] %s5272_s29 }
  0x14   :  { %6096 = sst [smem:[#allocation63_spill]] %s5277_s3 }
  0x15   :  { %6097 = sst [smem:[#allocation64_spill]] %s5282_s8 }
  0x16   :  { %6098 = sst [smem:[#allocation65_spill]] %s5287_s14 }
  0x17   :  { %6099 = sst [smem:[#allocation66_spill]] %s5292_s19 }
  0x18   :  { %6100 = sst [smem:[#allocation67_spill]] %s5297_s24 }
  0x19   :  { %s5302_s30 = sld [smem:[%s6068_s0 + %s5170_s26]]  }
  0x1a   :  { %s5307_s6 = sld [smem:[%s6068_s0 + %s5171_s1]]  }
  0x1b   :  { %s5312_s12 = sld [smem:[%s6068_s0 + %s5172_s7]]   ;;  %s5176_s7 = smov 18  }
  0x1c   :  { %s5317_s20 = sld [smem:[%s6068_s0 + %s5173_s15]]   ;;  %s5177_s15 = smov 19  }
  0x1d   :  { %s5322_s27 = sld [smem:[%s6068_s0 + %s5174_s22]]   ;;  %s5178_s22 = smov 20  }
  0x1e   :  { %s5327_s4 = sld [smem:[%s6068_s0 + %s5175_s28]]   ;;  %s5179_s28 = smov 21  }
  0x1f   :  { %s5332_s29 = sld [smem:[%s6068_s0 + %s5176_s7]]   ;;  %s5180_s7 = smov 22  }
  0x20   :  { %6101 = sst [smem:[#allocation68_spill]] %s5307_s6 }
  0x21   :  { %s5337_s25 = sld [smem:[%s6068_s0 + %s5177_s15]]   ;;  %s5181_s15 = smov 23  }
  0x22   :  { %s5347_s13 = sld [smem:[%s6068_s0 + %s5179_s28]]   ;;  %s5183_s28 = smov 25  }
  0x23   :  { %6102 = sst [smem:[#allocation69_spill]] %s5322_s27 }
  0x24   :  { %s5342_s27 = sld [smem:[%s6068_s0 + %s5178_s22]]   ;;  %s5182_s22 = smov 24  }
  0x25   :  { %6103 = sst [smem:[#allocation70_spill]] %s5332_s29 }
  0x26   :  { %s5352_s29 = sld [smem:[%s6068_s0 + %s5180_s7]]   ;;  %s5184_s7 = smov 26  }
  0x27   :  { %s5357_s6 = sld [smem:[%s6068_s0 + %s5181_s15]]   ;;  %s5185_s15 = smov 27  }
  0x28   :  { %6104 = sst [smem:[#allocation71_spill]] %s5347_s13 }
  0x29   :  { %s5362_s21 = sld [smem:[%s6068_s0 + %s5182_s22]]   ;;  %s5186_s22 = smov 28  }
  0x2a   :  { %s5367_s24 = sld [smem:[%s6068_s0 + %s5183_s28]]   ;;  %s5187_s28 = smov 29  }
  0x2b   :  { %s5372_s17 = sld [smem:[%s6068_s0 + %s5184_s7]]   ;;  %s5188_s7 = smov 30  }
  0x2c   :  { %s5377_s14 = sld [smem:[%s6068_s0 + %s5185_s15]]   ;;  %s5189_s15 = smov 31  }
  0x2d   :  { %6105 = sst [smem:[#allocation72_spill]] %s5357_s6 }
  0x2e   :  { %s5387_s8 = sld [smem:[%s6068_s0 + %s5187_s28]]   ;;  %s5191_s28 = smov 33  }
  0x2f   :  { %6106 = sst [smem:[#allocation73_spill]] %s5362_s21 }
  0x30   :  { %s5382_s21 = sld [smem:[%s6068_s0 + %s5186_s22]]   ;;  %s5190_s22 = smov 32  }
  0x31   :  { %6107 = sst [smem:[#allocation74_spill]] %s5372_s17 }
  0x32   :  { %s5392_s19 = sld [smem:[%s6068_s0 + %s5188_s7]]   ;;  %s5192_s7 = smov 34  }
  0x33   :  { %s5397_s9 = sld [smem:[%s6068_s0 + %s5189_s15]]   ;;  %s5193_s15 = smov 35  }
  0x34   :  { %s5402_s5 = sld [smem:[%s6068_s0 + %s5190_s22]]   ;;  %s5194_s22 = smov 36  }
  0x35   :  { %s5407_s3 = sld [smem:[%s6068_s0 + %s5191_s28]]   ;;  %s5195_s28 = smov 37  }
  0x36   :  { %6108 = sst [smem:[#allocation75_spill]] %s5382_s21 }
  0x37   :  { %s5417_s21 = sld [smem:[%s6068_s0 + %s5193_s15]]   ;;  %s5197_s15 = smov 39  }
  0x38   :  { %6109 = sst [smem:[#allocation76_spill]] %s5392_s19 }
  0x39   :  { %s5412_s19 = sld [smem:[%s6068_s0 + %s5192_s7]]   ;;  %s5196_s7 = smov 38  }
  0x3a   :  { %6110 = sst [smem:[#allocation77_spill]] %s5402_s5 }
  0x3b   :  { %6111 = sst [smem:[#allocation78_spill]] %s5407_s3 }
  0x3c   :  { %s5422_s5 = sld [smem:[%s6068_s0 + %s5194_s22]]   ;;  %s5198_s22 = smov 40  }
  0x3d   :  { %6112 = sst [smem:[#allocation79_spill]] %s5417_s21 }
  0x3e   :  { %s5427_s3 = sld [smem:[%s6068_s0 + %s5195_s28]]   ;;  %s5199_s28 = smov 41  }
  0x3f   :  { %s5432_s17 = sld [smem:[%s6068_s0 + %s5196_s7]]   ;;  %s5200_s7 = smov 42  }
  0x40   :  { %s5437_s21 = sld [smem:[%s6068_s0 + %s5197_s15]]   ;;  %s5201_s15 = smov 43  }
  0x41   :  { %s5442_s6 = sld [smem:[%s6068_s0 + %s5198_s22]]   ;;  %s5202_s22 = smov 44  }
  0x42   :  { %s5457_s13 = sld [smem:[%s6068_s0 + %s5201_s15]]  }
  0x44   :  { %6113 = sst [smem:[#allocation80_spill]] %s5427_s3 }
  0x45   :  { %6114 = sst [smem:[#allocation81_spill]] %s5432_s17 }
  0x46   :  { %s5447_s3 = sld [smem:[%s6068_s0 + %s5199_s28]]  }
  0x47   :  { %6115 = sst [smem:[#allocation82_spill]] %s5442_s6 }
  0x48   :  { %s5452_s17 = sld [smem:[%s6068_s0 + %s5200_s7]]  }
  0x49   :  { %s5462_s6 = sld [smem:[%s6068_s0 + %s5202_s22]]  }
  0x4a   :  { %94 = vsyncpa [#allocation3], 0 }
  0x4b   :  { %95 = vsyncpa [#allocation5], 0 }
  0x4c   :  { %96 = vsyncpa [#allocation8], 0 }
  0x4d   :  { %97 = vsyncpa [#allocation11], 0 }
  0x4e   :  { %98 = vsyncpa [#allocation14], 0 }
  0x4f   :  { %99 = vsyncpa [#allocation17], 0 }
  0x50   :  { %100 = vsyncpa [#allocation20], 0 }
  0x51   :  { %101 = vsyncpa [#allocation23], 0 }
  0x52   :  { %102 = vsyncpa [#allocation26], 0 }
  0x53   :  { %103 = vsyncpa [#allocation29], 0 }
  0x54   :  { %104 = vsyncpa [#allocation32], 0 }
  0x55   :  { %105 = vsyncpa [#allocation35], 0 }
  0x56   :  { %106 = vsyncpa [#allocation38], 0 }
  0x57   :  { %107 = vsyncpa [#allocation41], 0  ;;  %s5203_s28 = smov [#allocation4]   ;;  %s5204_s1 = smov [#allocation7]  }
  0x58   :  { %s152_s0 = sshll.u32 %s5203_s28, 4  ;;  %s174_s2 = sshll.u32 %s5204_s1, 4  ;;  %s153_s0 = int_to_ptr.vmem [resolvable:$true] %s152_s0  ;;  %s175_s2 = int_to_ptr.vmem [resolvable:$true] %s174_s2 }
  0x59   :  { %s4559_s7 = scalar_lea.hbm %s5312_s12, 16 }
  0x5a   :  { %p4560_p0 = scmp.ne.s32.totalorder %s5312_s12, %s4559_s7  ;;  %p4563_p1 = scmp.lt.u32.totalorder %s4559_s7, %s5312_s12 }
  0x5c   :  { %p4565_p2 = pnand %p4563_p1, %p4560_p0 }
  0x5e   :  { %4568 = shalt.err (!%p4565_p2)
}
  0x5f   :  { %s4569_s10 = scalar_lea.vmem %s153_s0, 16  ;;  %s4573_s11 = scalar_lea.vmem %s153_s0, 32 }
  0x60   :  { %p4570_p3 = scmp.ne.s32.totalorder %s153_s0, %s4569_s10  ;;  %p4574_p4 = scmp.lt.s32.totalorder %s153_s0, %s153_s0 }
  0x61   :  { %p4575_p5 = scmp.lt.s32.totalorder %s4573_s11, %s4569_s10 }
  0x63   :  { %p4576_p6 = por %p4575_p5, %p4574_p4 }
  0x65   :  { %p4577_p7 = pnand %p4576_p6, %p4570_p3 }
  0x67   :  { %4580 = shalt.err (!%p4577_p7)
}
  0x68   :  { %155 = dma.hbm_to_vmem [thread:$0]  %s5312_s12, 16, %s153_s0, [#allocation5]  }
  0x69   :  { %s4581_s15 = scalar_lea.hbm %s5327_s4, 32 }
  0x6a   :  { %p4582_p8 = scmp.ne.s32.totalorder %s5327_s4, %s4581_s15  ;;  %p4585_p9 = scmp.lt.u32.totalorder %s4581_s15, %s5327_s4 }
  0x6c   :  { %p4587_p10 = pnand %p4585_p9, %p4582_p8 }
  0x6e   :  { %4590 = shalt.err (!%p4587_p10)
}
  0x6f   :  { %s4591_s16 = scalar_lea.vmem %s175_s2, 32  ;;  %p4596_p12 = scmp.lt.s32.totalorder %s175_s2, %s175_s2 }
  0x70   :  { %p4592_p11 = scmp.ne.s32.totalorder %s175_s2, %s4591_s16  ;;  %p4597_p13 = scmp.lt.s32.totalorder %s4591_s16, %s4591_s16 }
  0x72   :  { %p4598_p0 = por %p4597_p13, %p4596_p12 }
  0x74   :  { %p4599_p1 = pnand %p4598_p0, %p4592_p11 }
  0x76   :  { %4602 = shalt.err (!%p4599_p1)
}
  0x77   :  { %177 = dma.hbm_to_vmem [thread:$0]  %s5327_s4, 32, %s175_s2, [#allocation8]  }
  0x78   :  { %s5205_s18 = smov [#allocation10]   ;;  %s5206_s12 = smov [#allocation13]  }
  0x79   :  { %s196_s22 = sshll.u32 %s5205_s18, 4  ;;  %s216_s23 = sshll.u32 %s5206_s12, 4  ;;  %s197_s22 = int_to_ptr.vmem [resolvable:$true] %s196_s22  ;;  %s217_s23 = int_to_ptr.vmem [resolvable:$true] %s216_s23 }
  0x7a   :  { %s4603_s26 = scalar_lea.hbm %s5342_s27, 16 }
  0x7b   :  { %p4604_p2 = scmp.ne.s32.totalorder %s5342_s27, %s4603_s26  ;;  %p4607_p3 = scmp.lt.u32.totalorder %s4603_s26, %s5342_s27 }
  0x7d   :  { %p4609_p4 = pnand %p4607_p3, %p4604_p2 }
  0x7f   :  { %4612 = shalt.err (!%p4609_p4)
}
  0x80   :  { %s4613_s28 = scalar_lea.vmem %s197_s22, 16  ;;  %s4617_s0 = scalar_lea.vmem %s197_s22, 32 }
  0x81   :  { %p4614_p5 = scmp.ne.s32.totalorder %s197_s22, %s4613_s28  ;;  %p4618_p6 = scmp.lt.s32.totalorder %s197_s22, %s197_s22 }
  0x82   :  { %p4619_p7 = scmp.lt.s32.totalorder %s4617_s0, %s4613_s28 }
  0x84   :  { %p4620_p8 = por %p4619_p7, %p4618_p6 }
  0x86   :  { %p4621_p9 = pnand %p4620_p8, %p4614_p5 }
  0x88   :  { %4624 = shalt.err (!%p4621_p9)
}
  0x89   :  { %199 = dma.hbm_to_vmem [thread:$0]  %s5342_s27, 16, %s197_s22, [#allocation11]  }
  0x8a   :  { %s4625_s4 = scalar_lea.hbm %s5352_s29, 16 }
  0x8b   :  { %p4626_p10 = scmp.ne.s32.totalorder %s5352_s29, %s4625_s4  ;;  %p4629_p11 = scmp.lt.u32.totalorder %s4625_s4, %s5352_s29 }
  0x8d   :  { %p4631_p12 = pnand %p4629_p11, %p4626_p10 }
  0x8f   :  { %4634 = shalt.err (!%p4631_p12)
}
  0x90   :  { %s4635_s1 = scalar_lea.vmem %s217_s23, 16  ;;  %s4639_s2 = scalar_lea.vmem %s217_s23, 32 }
  0x91   :  { %p4636_p13 = scmp.ne.s32.totalorder %s217_s23, %s4635_s1  ;;  %p4640_p0 = scmp.lt.s32.totalorder %s217_s23, %s217_s23 }
  0x92   :  { %p4641_p1 = scmp.lt.s32.totalorder %s4639_s2, %s4635_s1 }
  0x94   :  { %p4642_p2 = por %p4641_p1, %p4640_p0 }
  0x96   :  { %p4643_p3 = pnand %p4642_p2, %p4636_p13 }
  0x98   :  { %4646 = shalt.err (!%p4643_p3)
}
  0x99   :  { %219 = dma.hbm_to_vmem [thread:$0]  %s5352_s29, 16, %s217_s23, [#allocation14]  }
  0x9a   :  { %s5207_s7 = smov [#allocation16]   ;;  %s5208_s10 = smov [#allocation19]  }
  0x9b   :  { %s238_s27 = sshll.u32 %s5207_s7, 4  ;;  %s260_s11 = sshll.u32 %s5208_s10, 4  ;;  %s239_s27 = int_to_ptr.vmem [resolvable:$true] %s238_s27  ;;  %s261_s11 = int_to_ptr.vmem [resolvable:$true] %s260_s11 }
  0x9c   :  { %s4647_s15 = scalar_lea.hbm %s5367_s24, 48 }
  0x9d   :  { %p4648_p4 = scmp.ne.s32.totalorder %s5367_s24, %s4647_s15  ;;  %p4651_p5 = scmp.lt.u32.totalorder %s4647_s15, %s5367_s24 }
  0x9f   :  { %p4653_p6 = pnand %p4651_p5, %p4648_p4 }
  0xa1   :  { %4656 = shalt.err (!%p4653_p6)
}
  0xa2   :  { %s4657_s16 = scalar_lea.vmem %s239_s27, 48  ;;  %s4661_s18 = scalar_lea.vmem %s239_s27, 64 }
  0xa3   :  { %p4658_p7 = scmp.ne.s32.totalorder %s239_s27, %s4657_s16  ;;  %p4662_p8 = scmp.lt.s32.totalorder %s239_s27, %s239_s27 }
  0xa4   :  { %p4663_p9 = scmp.lt.s32.totalorder %s4661_s18, %s4657_s16 }
  0xa6   :  { %p4664_p10 = por %p4663_p9, %p4662_p8 }
  0xa8   :  { %p4665_p11 = pnand %p4664_p10, %p4658_p7 }
  0xaa   :  { %4668 = shalt.err (!%p4665_p11)
}
  0xab   :  { %241 = dma.hbm_to_vmem [thread:$0]  %s5367_s24, 48, %s239_s27, [#allocation17]  }
  0xac   :  { %s4669_s29 = scalar_lea.hbm %s5377_s14, 16 }
  0xad   :  { %p4670_p12 = scmp.ne.s32.totalorder %s5377_s14, %s4669_s29  ;;  %p4673_p13 = scmp.lt.u32.totalorder %s4669_s29, %s5377_s14 }
  0xaf   :  { %p4675_p0 = pnand %p4673_p13, %p4670_p12 }
  0xb1   :  { %4678 = shalt.err (!%p4675_p0)
}
  0xb2   :  { %s4679_s22 = scalar_lea.vmem %s261_s11, 16  ;;  %s4683_s12 = scalar_lea.vmem %s261_s11, 32 }
  0xb3   :  { %p4680_p1 = scmp.ne.s32.totalorder %s261_s11, %s4679_s22  ;;  %p4684_p2 = scmp.lt.s32.totalorder %s261_s11, %s261_s11 }
  0xb4   :  { %p4685_p3 = scmp.lt.s32.totalorder %s4683_s12, %s4679_s22 }
  0xb6   :  { %p4686_p4 = por %p4685_p3, %p4684_p2 }
  0xb8   :  { %p4687_p5 = pnand %p4686_p4, %p4680_p1 }
  0xba   :  { %4690 = shalt.err (!%p4687_p5)
}
  0xbb   :  { %263 = dma.hbm_to_vmem [thread:$0]  %s5377_s14, 16, %s261_s11, [#allocation20]  }
  0xbc   :  { %s5209_s23 = smov [#allocation22]   ;;  %s5210_s26 = smov [#allocation25]  }
  0xbd   :  { %s280_s24 = sshll.u32 %s5209_s23, 4  ;;  %s302_s28 = sshll.u32 %s5210_s26, 4  ;;  %s281_s24 = int_to_ptr.vmem [resolvable:$true] %s280_s24  ;;  %s303_s28 = int_to_ptr.vmem [resolvable:$true] %s302_s28 }
  0xbe   :  { %s4691_s0 = scalar_lea.hbm %s5387_s8, 16 }
  0xbf   :  { %p4692_p6 = scmp.ne.s32.totalorder %s5387_s8, %s4691_s0  ;;  %p4695_p7 = scmp.lt.u32.totalorder %s4691_s0, %s5387_s8 }
  0xc1   :  { %p4697_p8 = pnand %p4695_p7, %p4692_p6 }
  0xc3   :  { %4700 = shalt.err (!%p4697_p8)
}
  0xc4   :  { %s4701_s4 = scalar_lea.vmem %s281_s24, 16  ;;  %s4705_s1 = scalar_lea.vmem %s281_s24, 32 }
  0xc5   :  { %p4702_p9 = scmp.ne.s32.totalorder %s281_s24, %s4701_s4  ;;  %p4706_p10 = scmp.lt.s32.totalorder %s281_s24, %s281_s24 }
  0xc6   :  { %p4707_p11 = scmp.lt.s32.totalorder %s4705_s1, %s4701_s4 }
  0xc8   :  { %p4708_p12 = por %p4707_p11, %p4706_p10 }
  0xca   :  { %p4709_p13 = pnand %p4708_p12, %p4702_p9 }
  0xcc   :  { %4712 = shalt.err (!%p4709_p13)
}
  0xcd   :  { %283 = dma.hbm_to_vmem [thread:$0]  %s5387_s8, 16, %s281_s24, [#allocation23]  }
  0xce   :  { %s4713_s14 = scalar_lea.hbm %s5397_s9, 16 }
  0xcf   :  { %p4714_p0 = scmp.ne.s32.totalorder %s5397_s9, %s4713_s14  ;;  %p4717_p1 = scmp.lt.u32.totalorder %s4713_s14, %s5397_s9 }
  0xd1   :  { %p4719_p2 = pnand %p4717_p1, %p4714_p0 }
  0xd3   :  { %4722 = shalt.err (!%p4719_p2)
}
  0xd4   :  { %s4723_s2 = scalar_lea.vmem %s303_s28, 16  ;;  %s4727_s7 = scalar_lea.vmem %s303_s28, 32 }
  0xd5   :  { %p4724_p3 = scmp.ne.s32.totalorder %s303_s28, %s4723_s2  ;;  %p4728_p4 = scmp.lt.s32.totalorder %s303_s28, %s303_s28 }
  0xd6   :  { %p4729_p5 = scmp.lt.s32.totalorder %s4727_s7, %s4723_s2 }
  0xd8   :  { %p4730_p6 = por %p4729_p5, %p4728_p4 }
  0xda   :  { %p4731_p7 = pnand %p4730_p6, %p4724_p3 }
  0xdc   :  { %4734 = shalt.err (!%p4731_p7)
}
  0xdd   :  { %305 = dma.hbm_to_vmem [thread:$0]  %s5397_s9, 16, %s303_s28, [#allocation26]  }
  0xde   :  { %s5211_s27 = smov [#allocation28]   ;;  %s5212_s10 = smov [#allocation31]  }
  0xdf   :  { %s323_s8 = sshll.u32 %s5211_s27, 4  ;;  %s346_s11 = sshll.u32 %s5212_s10, 4  ;;  %s324_s8 = int_to_ptr.vmem [resolvable:$true] %s323_s8  ;;  %s5496_s11 = int_to_ptr.vmem [resolvable:$true] %s346_s11 }
  0xe0   :  { %s4735_s15 = scalar_lea.hbm %s5412_s19, 1024 }
  0xe1   :  { %p4736_p8 = scmp.ne.s32.totalorder %s5412_s19, %s4735_s15  ;;  %p4739_p9 = scmp.lt.u32.totalorder %s4735_s15, %s5412_s19 }
  0xe3   :  { %p4741_p10 = pnand %p4739_p9, %p4736_p8 }
  0xe5   :  { %4744 = shalt.err (!%p4741_p10)
}
  0xe6   :  { %s4745_s16 = scalar_lea.vmem %s324_s8, 1024  ;;  %p4750_p12 = scmp.lt.s32.totalorder %s324_s8, %s324_s8 }
  0xe7   :  { %p4746_p11 = scmp.ne.s32.totalorder %s324_s8, %s4745_s16  ;;  %p4751_p13 = scmp.lt.s32.totalorder %s4745_s16, %s4745_s16 }
  0xe9   :  { %p4752_p0 = por %p4751_p13, %p4750_p12 }
  0xeb   :  { %p4753_p1 = pnand %p4752_p0, %p4746_p11 }
  0xed   :  { %4756 = shalt.err (!%p4753_p1)
}
  0xee   :  { %s5213_s9 = smov 64   ;;  %s5214_s18 = smov 4  }
  0xef   :  { %329 = dma.hbm_to_vmem [thread:$0]  %s5412_s19, 1024, %s324_s8, [#allocation29], %s5213_s9, %s5213_s9, %s5214_s18  }
  0xf0   :  { %s4757_s29 = scalar_lea.hbm %s5422_s5, 16 }
  0xf1   :  { %p4758_p2 = scmp.ne.s32.totalorder %s5422_s5, %s4757_s29  ;;  %p4761_p3 = scmp.lt.u32.totalorder %s4757_s29, %s5422_s5 }
  0xf3   :  { %p4763_p4 = pnand %p4761_p3, %p4758_p2 }
  0xf5   :  { %4766 = shalt.err (!%p4763_p4)
}
  0xf6   :  { %s4767_s22 = scalar_lea.vmem %s5496_s11, 16  ;;  %s4771_s12 = scalar_lea.vmem %s5496_s11, 32 }
  0xf7   :  { %p4768_p5 = scmp.ne.s32.totalorder %s5496_s11, %s4767_s22  ;;  %p4772_p6 = scmp.lt.s32.totalorder %s5496_s11, %s5496_s11 }
  0xf8   :  { %p4773_p7 = scmp.lt.s32.totalorder %s4771_s12, %s4767_s22 }
  0xfa   :  { %p4774_p8 = por %p4773_p7, %p4772_p6 }
  0xfc   :  { %p4775_p9 = pnand %p4774_p8, %p4768_p5 }
  0xfe   :  { %4778 = shalt.err (!%p4775_p9)
}
  0xff   :  { %349 = dma.hbm_to_vmem [thread:$0]  %s5422_s5, 16, %s5496_s11, [#allocation32]  }
 0x100   :  { %s5215_s19 = smov [#allocation34]   ;;  %s5216_s24 = smov [#allocation37]  }
 0x101   :  { %s368_s23 = sshll.u32 %s5215_s19, 4  ;;  %s390_s26 = sshll.u32 %s5216_s24, 4  ;;  %s369_s23 = int_to_ptr.vmem [resolvable:$true] %s368_s23  ;;  %s391_s26 = int_to_ptr.vmem [resolvable:$true] %s390_s26 }
 0x102   :  { %s4779_s28 = scalar_lea.hbm %s5437_s21, 32 }
 0x103   :  { %p4780_p10 = scmp.ne.s32.totalorder %s5437_s21, %s4779_s28  ;;  %p4783_p11 = scmp.lt.u32.totalorder %s4779_s28, %s5437_s21 }
 0x105   :  { %p4785_p12 = pnand %p4783_p11, %p4780_p10 }
 0x107   :  { %4788 = shalt.err (!%p4785_p12)
}
 0x108   :  { %s4789_s0 = scalar_lea.vmem %s369_s23, 32  ;;  %p4794_p0 = scmp.lt.s32.totalorder %s369_s23, %s369_s23 }
 0x109   :  { %p4790_p13 = scmp.ne.s32.totalorder %s369_s23, %s4789_s0  ;;  %p4795_p1 = scmp.lt.s32.totalorder %s4789_s0, %s4789_s0 }
 0x10b   :  { %p4796_p2 = por %p4795_p1, %p4794_p0 }
 0x10d   :  { %p4797_p3 = pnand %p4796_p2, %p4790_p13 }
 0x10f   :  { %4800 = shalt.err (!%p4797_p3)
}
 0x110   :  { %371 = dma.hbm_to_vmem [thread:$0]  %s5437_s21, 32, %s369_s23, [#allocation35]  }
 0x111   :  { %s4801_s5 = scalar_lea.hbm %s5447_s3, 16 }
 0x112   :  { %p4802_p4 = scmp.ne.s32.totalorder %s5447_s3, %s4801_s5  ;;  %p4805_p5 = scmp.lt.u32.totalorder %s4801_s5, %s5447_s3 }
 0x114   :  { %p4807_p6 = pnand %p4805_p5, %p4802_p4 }
 0x116   :  { %4810 = shalt.err (!%p4807_p6)
}
 0x117   :  { %s4811_s4 = scalar_lea.vmem %s391_s26, 16  ;;  %s4815_s1 = scalar_lea.vmem %s391_s26, 32 }
 0x118   :  { %p4812_p7 = scmp.ne.s32.totalorder %s391_s26, %s4811_s4  ;;  %p4816_p8 = scmp.lt.s32.totalorder %s391_s26, %s391_s26 }
 0x119   :  { %p4817_p9 = scmp.lt.s32.totalorder %s4815_s1, %s4811_s4 }
 0x11b   :  { %p4818_p10 = por %p4817_p9, %p4816_p8 }
 0x11d   :  { %p4819_p11 = pnand %p4818_p10, %p4812_p7 }
 0x11f   :  { %4822 = shalt.err (!%p4819_p11)
}
 0x120   :  { %393 = dma.hbm_to_vmem [thread:$0]  %s5447_s3, 16, %s391_s26, [#allocation38]  }
 0x121   :  { %s5217_s14 = smov [#allocation2]   ;;  %s5218_s2 = smov [#allocation6]  }
 0x122   :  { %s137_s21 = sshll.u32 %s5217_s14, 4  ;;  %s162_s7 = sshll.u32 %s5218_s2, 4  ;;  %s138_s21 = int_to_ptr.vmem [resolvable:$true] %s137_s21  ;;  %s163_s7 = int_to_ptr.vmem [resolvable:$true] %s162_s7 }
 0x123   :  { %s4823_s27 = scalar_lea.hbm %s5302_s30, 1024 }
 0x124   :  { %p4824_p12 = scmp.ne.s32.totalorder %s5302_s30, %s4823_s27  ;;  %p4827_p13 = scmp.lt.u32.totalorder %s4823_s27, %s5302_s30 }
 0x126   :  { %p4829_p0 = pnand %p4827_p13, %p4824_p12 }
 0x128   :  { %4832 = shalt.err (!%p4829_p0)
}
 0x129   :  { %s4833_s8 = scalar_lea.vmem %s138_s21, 1024  ;;  %p4838_p2 = scmp.lt.s32.totalorder %s138_s21, %s138_s21 }
 0x12a   :  { %p4834_p1 = scmp.ne.s32.totalorder %s138_s21, %s4833_s8  ;;  %p4839_p3 = scmp.lt.s32.totalorder %s4833_s8, %s4833_s8 }
 0x12c   :  { %p4840_p4 = por %p4839_p3, %p4838_p2 }
 0x12e   :  { %p4841_p5 = pnand %p4840_p4, %p4834_p1 }
 0x130   :  { %4844 = shalt.err (!%p4841_p5)
}
 0x131   :  { %143 = dma.hbm_to_vmem [thread:$0]  %s5302_s30, 1024, %s138_s21, [#allocation3], %s5213_s9, %s5213_s9, %s5214_s18  }
 0x132   :  { %s4845_s3 = scalar_lea.hbm %s5317_s20, 16 }
 0x133   :  { %p4846_p6 = scmp.ne.s32.totalorder %s5317_s20, %s4845_s3  ;;  %p4849_p7 = scmp.lt.u32.totalorder %s4845_s3, %s5317_s20 }
 0x135   :  { %p4851_p8 = pnand %p4849_p7, %p4846_p6 }
 0x137   :  { %4854 = shalt.err (!%p4851_p8)
}
 0x138   :  { %s4855_s10 = scalar_lea.vmem %s163_s7, 16  ;;  %s4859_s11 = scalar_lea.vmem %s163_s7, 32 }
 0x139   :  { %p4856_p9 = scmp.ne.s32.totalorder %s163_s7, %s4855_s10  ;;  %p4860_p10 = scmp.lt.s32.totalorder %s163_s7, %s163_s7 }
 0x13a   :  { %p4861_p11 = scmp.lt.s32.totalorder %s4859_s11, %s4855_s10 }
 0x13c   :  { %p4862_p12 = por %p4861_p11, %p4860_p10 }
 0x13e   :  { %p4863_p13 = pnand %p4862_p12, %p4856_p9 }
 0x140   :  { %4866 = shalt.err (!%p4863_p13)
}
 0x141   :  { %165 = dma.hbm_to_vmem [thread:$0]  %s5317_s20, 16, %s163_s7, [#allocation5]  }
 0x142   :  { %s5219_s15 = smov [#allocation9]   ;;  %s5220_s16 = smov [#allocation12]  }
 0x143   :  { %s186_s30 = sshll.u32 %s5219_s15, 4  ;;  %s206_s29 = sshll.u32 %s5220_s16, 4  ;;  %s187_s30 = int_to_ptr.vmem [resolvable:$true] %s186_s30  ;;  %s207_s29 = int_to_ptr.vmem [resolvable:$true] %s206_s29 }
 0x144   :  { %s4867_s22 = scalar_lea.hbm %s5337_s25, 16 }
 0x145   :  { %p4868_p0 = scmp.ne.s32.totalorder %s5337_s25, %s4867_s22  ;;  %p4871_p1 = scmp.lt.u32.totalorder %s4867_s22, %s5337_s25 }
 0x147   :  { %p4873_p2 = pnand %p4871_p1, %p4868_p0 }
 0x149   :  { %4876 = shalt.err (!%p4873_p2)
}
 0x14a   :  { %s4877_s12 = scalar_lea.vmem %s187_s30, 16  ;;  %s4881_s19 = scalar_lea.vmem %s187_s30, 32 }
 0x14b   :  { %p4878_p3 = scmp.ne.s32.totalorder %s187_s30, %s4877_s12  ;;  %p4882_p4 = scmp.lt.s32.totalorder %s187_s30, %s187_s30 }
 0x14c   :  { %p4883_p5 = scmp.lt.s32.totalorder %s4881_s19, %s4877_s12 }
 0x14e   :  { %p4884_p6 = por %p4883_p5, %p4882_p4 }
 0x150   :  { %p4885_p7 = pnand %p4884_p6, %p4878_p3 }
 0x152   :  { %4888 = shalt.err (!%p4885_p7)
}
 0x153   :  { %s6116_s20 = sld [smem:[#allocation71_spill]] }
 0x154   :  { %189 = dma.hbm_to_vmem [thread:$0]  %s5337_s25, 16, %s187_s30, [#allocation8]  }
 0x159   :  { %s4889_s23 = scalar_lea.hbm %s6116_s20, 16 }
 0x15a   :  { %p4890_p8 = scmp.ne.s32.totalorder %s6116_s20, %s4889_s23  ;;  %p4893_p9 = scmp.lt.u32.totalorder %s4889_s23, %s6116_s20 }
 0x15c   :  { %p4895_p10 = pnand %p4893_p9, %p4890_p8 }
 0x15e   :  { %4898 = shalt.err (!%p4895_p10)
}
 0x15f   :  { %s4899_s24 = scalar_lea.vmem %s207_s29, 16  ;;  %s4903_s26 = scalar_lea.vmem %s207_s29, 32 }
 0x160   :  { %p4900_p11 = scmp.ne.s32.totalorder %s207_s29, %s4899_s24  ;;  %p4904_p12 = scmp.lt.s32.totalorder %s207_s29, %s207_s29 }
 0x161   :  { %p4905_p13 = scmp.lt.s32.totalorder %s4903_s26, %s4899_s24 }
 0x163   :  { %p4906_p0 = por %p4905_p13, %p4904_p12 }
 0x165   :  { %p4907_p1 = pnand %p4906_p0, %p4900_p11 }
 0x167   :  { %4910 = shalt.err (!%p4907_p1)
}
 0x168   :  { %s6117_s28 = sld [smem:[#allocation72_spill]]  ;;  %s5221_s0 = smov [#allocation15]  }
 0x169   :  { %209 = dma.hbm_to_vmem [thread:$0]  %s6116_s20, 16, %s207_s29, [#allocation11]  }
 0x16a   :  { %s226_s25 = sshll.u32 %s5221_s0, 4  ;;  %s5222_s5 = smov [#allocation18]   ;;  %s227_s25 = int_to_ptr.vmem [resolvable:$true] %s226_s25 }
 0x16b   :  { %s247_s4 = sshll.u32 %s5222_s5, 4  ;;  %s5542_s4 = int_to_ptr.vmem [resolvable:$true] %s247_s4 }
 0x16e   :  { %s4911_s1 = scalar_lea.hbm %s6117_s28, 16 }
 0x16f   :  { %p4912_p2 = scmp.ne.s32.totalorder %s6117_s28, %s4911_s1  ;;  %p4915_p3 = scmp.lt.u32.totalorder %s4911_s1, %s6117_s28 }
 0x171   :  { %p4917_p4 = pnand %p4915_p3, %p4912_p2 }
 0x173   :  { %4920 = shalt.err (!%p4917_p4)
}
 0x174   :  { %s4921_s14 = scalar_lea.vmem %s227_s25, 16  ;;  %s4925_s21 = scalar_lea.vmem %s227_s25, 32 }
 0x175   :  { %p4922_p5 = scmp.ne.s32.totalorder %s227_s25, %s4921_s14  ;;  %p4926_p6 = scmp.lt.s32.totalorder %s227_s25, %s227_s25 }
 0x176   :  { %p4927_p7 = scmp.lt.s32.totalorder %s4925_s21, %s4921_s14 }
 0x178   :  { %p4928_p8 = por %p4927_p7, %p4926_p6 }
 0x17a   :  { %p4929_p9 = pnand %p4928_p8, %p4922_p5 }
 0x17c   :  { %4932 = shalt.err (!%p4929_p9)
}
 0x17d   :  { %s6118_s2 = sld [smem:[#allocation74_spill]] }
 0x17e   :  { %229 = dma.hbm_to_vmem [thread:$0]  %s6117_s28, 16, %s227_s25, [#allocation14]  }
 0x183   :  { %s4933_s7 = scalar_lea.hbm %s6118_s2, 1024 }
 0x184   :  { %p4934_p10 = scmp.ne.s32.totalorder %s6118_s2, %s4933_s7  ;;  %p4937_p11 = scmp.lt.u32.totalorder %s4933_s7, %s6118_s2 }
 0x186   :  { %p4939_p12 = pnand %p4937_p11, %p4934_p10 }
 0x188   :  { %4942 = shalt.err (!%p4939_p12)
}
 0x189   :  { %s4943_s27 = scalar_lea.vmem %s5542_s4, 1024  ;;  %p4948_p0 = scmp.lt.s32.totalorder %s5542_s4, %s5542_s4 }
 0x18a   :  { %p4944_p13 = scmp.ne.s32.totalorder %s5542_s4, %s4943_s27  ;;  %p4949_p1 = scmp.lt.s32.totalorder %s4943_s27, %s4943_s27 }
 0x18c   :  { %p4950_p2 = por %p4949_p1, %p4948_p0 }
 0x18e   :  { %p4951_p3 = pnand %p4950_p2, %p4944_p13 }
 0x190   :  { %4954 = shalt.err (!%p4951_p3)
}
 0x191   :  { %s6119_s8 = sld [smem:[#allocation75_spill]]  ;;  %s5223_s3 = smov [#allocation21]  }
 0x192   :  { %253 = dma.hbm_to_vmem [thread:$0]  %s6118_s2, 1024, %s5542_s4, [#allocation17], %s5213_s9, %s5213_s9, %s5214_s18  }
 0x193   :  { %s270_s10 = sshll.u32 %s5223_s3, 4  ;;  %s5224_s11 = smov [#allocation24]   ;;  %s271_s10 = int_to_ptr.vmem [resolvable:$true] %s270_s10 }
 0x194   :  { %s289_s15 = sshll.u32 %s5224_s11, 4  ;;  %s5560_s15 = int_to_ptr.vmem [resolvable:$true] %s289_s15 }
 0x197   :  { %s4955_s30 = scalar_lea.hbm %s6119_s8, 16 }
 0x198   :  { %p4956_p4 = scmp.ne.s32.totalorder %s6119_s8, %s4955_s30  ;;  %p4959_p5 = scmp.lt.u32.totalorder %s4955_s30, %s6119_s8 }
 0x19a   :  { %p4961_p6 = pnand %p4959_p5, %p4956_p4 }
 0x19c   :  { %4964 = shalt.err (!%p4961_p6)
}
 0x19d   :  { %s4965_s16 = scalar_lea.vmem %s271_s10, 16  ;;  %s4969_s29 = scalar_lea.vmem %s271_s10, 32 }
 0x19e   :  { %p4966_p7 = scmp.ne.s32.totalorder %s271_s10, %s4965_s16  ;;  %p4970_p8 = scmp.lt.s32.totalorder %s271_s10, %s271_s10 }
 0x19f   :  { %p4971_p9 = scmp.lt.s32.totalorder %s4969_s29, %s4965_s16 }
 0x1a1   :  { %p4972_p10 = por %p4971_p9, %p4970_p8 }
 0x1a3   :  { %p4973_p11 = pnand %p4972_p10, %p4966_p7 }
 0x1a5   :  { %4976 = shalt.err (!%p4973_p11)
}
 0x1a6   :  { %s6120_s22 = sld [smem:[#allocation76_spill]] }
 0x1a7   :  { %273 = dma.hbm_to_vmem [thread:$0]  %s6119_s8, 16, %s271_s10, [#allocation20]  }
 0x1ac   :  { %s4977_s12 = scalar_lea.hbm %s6120_s22, 1024 }
 0x1ad   :  { %p4978_p12 = scmp.ne.s32.totalorder %s6120_s22, %s4977_s12  ;;  %p4981_p13 = scmp.lt.u32.totalorder %s4977_s12, %s6120_s22 }
 0x1af   :  { %p4983_p0 = pnand %p4981_p13, %p4978_p12 }
 0x1b1   :  { %4986 = shalt.err (!%p4983_p0)
}
 0x1b2   :  { %s4987_s19 = scalar_lea.vmem %s5560_s15, 1024  ;;  %p4992_p2 = scmp.lt.s32.totalorder %s5560_s15, %s5560_s15 }
 0x1b3   :  { %p4988_p1 = scmp.ne.s32.totalorder %s5560_s15, %s4987_s19  ;;  %p4993_p3 = scmp.lt.s32.totalorder %s4987_s19, %s4987_s19 }
 0x1b5   :  { %p4994_p4 = por %p4993_p3, %p4992_p2 }
 0x1b7   :  { %p4995_p5 = pnand %p4994_p4, %p4988_p1 }
 0x1b9   :  { %4998 = shalt.err (!%p4995_p5)
}
 0x1ba   :  { %s6121_s20 = sld [smem:[#allocation78_spill]]  ;;  %s5225_s23 = smov [#allocation27]  }
 0x1bb   :  { %295 = dma.hbm_to_vmem [thread:$0]  %s6120_s22, 1024, %s5560_s15, [#allocation23], %s5213_s9, %s5213_s9, %s5214_s18  }
 0x1bc   :  { %s314_s24 = sshll.u32 %s5225_s23, 4  ;;  %s5226_s26 = smov [#allocation30]   ;;  %s315_s24 = int_to_ptr.vmem [resolvable:$true] %s314_s24 }
 0x1bd   :  { %s336_s28 = sshll.u32 %s5226_s26, 4  ;;  %s337_s28 = int_to_ptr.vmem [resolvable:$true] %s336_s28 }
 0x1c0   :  { %s4999_s0 = scalar_lea.hbm %s6121_s20, 32 }
 0x1c1   :  { %p5000_p6 = scmp.ne.s32.totalorder %s6121_s20, %s4999_s0  ;;  %p5003_p7 = scmp.lt.u32.totalorder %s4999_s0, %s6121_s20 }
 0x1c3   :  { %p5005_p8 = pnand %p5003_p7, %p5000_p6 }
 0x1c5   :  { %5008 = shalt.err (!%p5005_p8)
}
 0x1c6   :  { %s5009_s25 = scalar_lea.vmem %s315_s24, 32  ;;  %p5014_p10 = scmp.lt.s32.totalorder %s315_s24, %s315_s24 }
 0x1c7   :  { %p5010_p9 = scmp.ne.s32.totalorder %s315_s24, %s5009_s25  ;;  %p5015_p11 = scmp.lt.s32.totalorder %s5009_s25, %s5009_s25 }
 0x1c9   :  { %p5016_p12 = por %p5015_p11, %p5014_p10 }
 0x1cb   :  { %p5017_p13 = pnand %p5016_p12, %p5010_p9 }
 0x1cd   :  { %5020 = shalt.err (!%p5017_p13)
}
 0x1ce   :  { %s6122_s5 = sld [smem:[#allocation79_spill]] }
 0x1cf   :  { %317 = dma.hbm_to_vmem [thread:$0]  %s6121_s20, 32, %s315_s24, [#allocation26]  }
 0x1d4   :  { %s5021_s4 = scalar_lea.hbm %s6122_s5, 16 }
 0x1d5   :  { %p5022_p0 = scmp.ne.s32.totalorder %s6122_s5, %s5021_s4  ;;  %p5025_p1 = scmp.lt.u32.totalorder %s5021_s4, %s6122_s5 }
 0x1d7   :  { %p5027_p2 = pnand %p5025_p1, %p5022_p0 }
 0x1d9   :  { %5030 = shalt.err (!%p5027_p2)
}
 0x1da   :  { %s5031_s1 = scalar_lea.vmem %s337_s28, 16  ;;  %s5035_s14 = scalar_lea.vmem %s337_s28, 32 }
 0x1db   :  { %p5032_p3 = scmp.ne.s32.totalorder %s337_s28, %s5031_s1  ;;  %p5036_p4 = scmp.lt.s32.totalorder %s337_s28, %s337_s28 }
 0x1dc   :  { %p5037_p5 = scmp.lt.s32.totalorder %s5035_s14, %s5031_s1 }
 0x1de   :  { %p5038_p6 = por %p5037_p5, %p5036_p4 }
 0x1e0   :  { %p5039_p7 = pnand %p5038_p6, %p5032_p3 }
 0x1e2   :  { %5042 = shalt.err (!%p5039_p7)
}
 0x1e3   :  { %s6123_s21 = sld [smem:[#allocation80_spill]]  ;;  %s5227_s2 = smov [#allocation33]  }
 0x1e4   :  { %339 = dma.hbm_to_vmem [thread:$0]  %s6122_s5, 16, %s337_s28, [#allocation29]  }
 0x1e5   :  { %s356_s7 = sshll.u32 %s5227_s2, 4  ;;  %s5228_s27 = smov [#allocation36]   ;;  %s357_s7 = int_to_ptr.vmem [resolvable:$true] %s356_s7 }
 0x1e6   :  { %s377_s8 = sshll.u32 %s5228_s27, 4  ;;  %s5586_s8 = int_to_ptr.vmem [resolvable:$true] %s377_s8 }
 0x1e9   :  { %s5043_s3 = scalar_lea.hbm %s6123_s21, 16 }
 0x1ea   :  { %p5044_p8 = scmp.ne.s32.totalorder %s6123_s21, %s5043_s3  ;;  %p5047_p9 = scmp.lt.u32.totalorder %s5043_s3, %s6123_s21 }
 0x1ec   :  { %p5049_p10 = pnand %p5047_p9, %p5044_p8 }
 0x1ee   :  { %5052 = shalt.err (!%p5049_p10)
}
 0x1ef   :  { %s5053_s10 = scalar_lea.vmem %s357_s7, 16  ;;  %s5057_s11 = scalar_lea.vmem %s357_s7, 32 }
 0x1f0   :  { %p5054_p11 = scmp.ne.s32.totalorder %s357_s7, %s5053_s10  ;;  %p5058_p12 = scmp.lt.s32.totalorder %s357_s7, %s357_s7 }
 0x1f1   :  { %p5059_p13 = scmp.lt.s32.totalorder %s5057_s11, %s5053_s10 }
 0x1f3   :  { %p5060_p0 = por %p5059_p13, %p5058_p12 }
 0x1f5   :  { %p5061_p1 = pnand %p5060_p0, %p5054_p11 }
 0x1f7   :  { %5064 = shalt.err (!%p5061_p1)
}
 0x1f8   :  { %s6124_s15 = sld [smem:[#allocation82_spill]] }
 0x1f9   :  { %359 = dma.hbm_to_vmem [thread:$0]  %s6123_s21, 16, %s357_s7, [#allocation32]  }
 0x1fe   :  { %s5065_s30 = scalar_lea.hbm %s6124_s15, 2048 }
 0x1ff   :  { %p5066_p2 = scmp.ne.s32.totalorder %s6124_s15, %s5065_s30  ;;  %p5069_p3 = scmp.lt.u32.totalorder %s5065_s30, %s6124_s15 }
 0x201   :  { %p5071_p4 = pnand %p5069_p3, %p5066_p2 }
 0x203   :  { %5074 = shalt.err (!%p5071_p4)
}
 0x204   :  { %s5075_s16 = scalar_lea.vmem %s5586_s8, 2048  ;;  %p5080_p6 = scmp.lt.s32.totalorder %s5586_s8, %s5586_s8 }
 0x205   :  { %p5076_p5 = scmp.ne.s32.totalorder %s5586_s8, %s5075_s16  ;;  %p5081_p7 = scmp.lt.s32.totalorder %s5075_s16, %s5075_s16 }
 0x207   :  { %p5082_p8 = por %p5081_p7, %p5080_p6 }
 0x209   :  { %p5083_p9 = pnand %p5082_p8, %p5076_p5 }
 0x20b   :  { %5086 = shalt.err (!%p5083_p9)
}
 0x20c   :  { %383 = dma.hbm_to_vmem [thread:$0]  %s6124_s15, 2048, %s5586_s8, [#allocation35], %s5213_s9, %s5213_s9, %s5214_s18  }
 0x20d   :  { %s5229_s29 = smov [#allocation39]   ;;  %s5230_s12 = smov [#allocation40]  }
 0x20e   :  { %s399_s22 = sshll.u32 %s5229_s29, 4  ;;  %s412_s19 = sshll.u32 %s5230_s12, 4  ;;  %s400_s22 = int_to_ptr.vmem [resolvable:$true] %s399_s22  ;;  %s413_s19 = int_to_ptr.vmem [resolvable:$true] %s412_s19 }
 0x20f   :  { %s5087_s20 = scalar_lea.hbm %s5452_s17, 1024 }
 0x210   :  { %p5088_p10 = scmp.ne.s32.totalorder %s5452_s17, %s5087_s20  ;;  %p5091_p11 = scmp.lt.u32.totalorder %s5087_s20, %s5452_s17 }
 0x212   :  { %p5093_p12 = pnand %p5091_p11, %p5088_p10 }
 0x214   :  { %5096 = shalt.err (!%p5093_p12)
}
 0x215   :  { %s5097_s23 = scalar_lea.vmem %s400_s22, 1024  ;;  %p5102_p0 = scmp.lt.s32.totalorder %s400_s22, %s400_s22 }
 0x216   :  { %p5098_p13 = scmp.ne.s32.totalorder %s400_s22, %s5097_s23  ;;  %p5103_p1 = scmp.lt.s32.totalorder %s5097_s23, %s5097_s23 }
 0x218   :  { %p5104_p2 = por %p5103_p1, %p5102_p0 }
 0x21a   :  { %p5105_p3 = pnand %p5104_p2, %p5098_p13 }
 0x21c   :  { %5108 = shalt.err (!%p5105_p3)
}
 0x21d   :  { %405 = dma.hbm_to_vmem [thread:$0]  %s5452_s17, 1024, %s400_s22, [#allocation38], %s5213_s9, %s5213_s9, %s5214_s18  }
 0x21e   :  { %s5109_s24 = scalar_lea.hbm %s5457_s13, 16 }
 0x21f   :  { %p5110_p4 = scmp.ne.s32.totalorder %s5457_s13, %s5109_s24  ;;  %p5113_p5 = scmp.lt.u32.totalorder %s5109_s24, %s5457_s13 }
 0x221   :  { %p5115_p6 = pnand %p5113_p5, %p5110_p4 }
 0x223   :  { %5118 = shalt.err (!%p5115_p6)
}
 0x224   :  { %s5119_s26 = scalar_lea.vmem %s413_s19, 16  ;;  %s5123_s28 = scalar_lea.vmem %s413_s19, 32 }
 0x225   :  { %p5120_p7 = scmp.ne.s32.totalorder %s413_s19, %s5119_s26  ;;  %p5124_p8 = scmp.lt.s32.totalorder %s413_s19, %s413_s19 }
 0x226   :  { %p5125_p9 = scmp.lt.s32.totalorder %s5123_s28, %s5119_s26 }
 0x228   :  { %p5126_p10 = por %p5125_p9, %p5124_p8 }
 0x22a   :  { %p5127_p11 = pnand %p5126_p10, %p5120_p7 }
 0x22c   :  { %5130 = shalt.err (!%p5127_p11)
}
 0x22d   :  { %415 = dma.hbm_to_vmem [thread:$0]  %s5457_s13, 16, %s413_s19, [#allocation41]  }
 0x22e   :  { %5131 = dma.done.wait [#allocation3], 1024  }
 0x22f   :  { %5132 = vsyncadd [#allocation3], 4294966272 }
 0x230   :  { %5133 = dma.done.wait [#allocation5], 32  }
 0x231   :  { %5134 = vsyncadd [#allocation5], 4294967264 }
 0x232   :  { %5135 = dma.done.wait [#allocation8], 48  }
 0x233   :  { %5136 = vsyncadd [#allocation8], 4294967248 }
 0x234   :  { %5137 = dma.done.wait [#allocation11], 32  }
 0x235   :  { %5138 = vsyncadd [#allocation11], 4294967264 }
 0x236   :  { %5139 = dma.done.wait [#allocation14], 32  }
 0x237   :  { %5140 = vsyncadd [#allocation14], 4294967264 }
 0x238   :  { %5141 = dma.done.wait [#allocation17], 1072  }
 0x239   :  { %5142 = vsyncadd [#allocation17], 4294966224 }
 0x23a   :  { %5143 = dma.done.wait [#allocation20], 32  }
 0x23b   :  { %5144 = vsyncadd [#allocation20], 4294967264 }
 0x23c   :  { %5145 = dma.done.wait [#allocation23], 1040  }
 0x23d   :  { %5146 = vsyncadd [#allocation23], 4294966256 }
 0x23e   :  { %5147 = dma.done.wait [#allocation26], 48  }
 0x23f   :  { %5148 = vsyncadd [#allocation26], 4294967248 }
 0x240   :  { %5149 = dma.done.wait [#allocation29], 1040  }
 0x241   :  { %5150 = vsyncadd [#allocation29], 4294966256 }
 0x242   :  { %5151 = dma.done.wait [#allocation32], 32  }
 0x243   :  { %5152 = vsyncadd [#allocation32], 4294967264 }
 0x244   :  { %5153 = dma.done.wait [#allocation35], 2080  }
 0x245   :  { %5154 = vsyncadd [#allocation35], 4294965216 }
 0x246   :  { %5155 = dma.done.wait [#allocation38], 1040  }
 0x247   :  { %5156 = vsyncadd [#allocation38], 4294966256 }
 0x248   :  { %5157 = dma.done.wait [#allocation41], 16  }
 0x249   :  { %5158 = vsyncadd [#allocation41], 4294967280  ;;  %s6125_s13 = sld [smem:[#allocation63_spill]]  ;;  %v5231_v0 = vmov 0   ;;  %s6126_s17 = sld [smem:[#allocation56_spill]]  ;;  %vm636_vm0 = vcmask 523264  }
 0x24a   :  { %640 = vmatprep.subr.bf16.mxu0 %v5231_v0  ;;  %935 = vmatprep.mubr.bf16.mxu1 %v5231_v0  ;;  %s6127_s18 = sld [smem:[#allocation57_spill]]  ;;  %s6128_s0 = sld [smem:[#allocation66_spill]]  ;;  %vm685_vm1 = vcmask 1041408   ;;  %v5232_v45 = vmov 0.0   ;;  %vm5233_vm2 = vmmov 0   ;;  %vm1086_vm3 = vcmask 1044480  }
 0x24b   :  { %4266 = vset.pattern.permute.xlu0 %v5231_v0  ;;  %4267 = vset.pattern.permute.xlu1 %v5231_v0  ;;  %s6129_s25 = sld [smem:[#allocation64_spill]]  ;;  %s6130_s5 = sld [smem:[#allocation65_spill]]  ;;  %vm1057_vm5 = vcmask 80896   ;;  %vm1061_vm7 = vcmask 74752   ;;  %vm2175_vm10 = vcmask 64512   ;;  %vm2192_vm12 = vcmask 1043456  }
 0x24c   :  { %s6131_s4 = sld [smem:[#allocation59_spill]]  ;;  %s6133_s14 = sld [smem:[#allocation60_spill]] }
 0x24d   :  { %s6132_s1 = sld [smem:[#allocation67_spill]]  ;;  %s6134_s21 = sld [smem:[#allocation68_spill]] }
 0x24e   :  { %s6135_s2 = sld [smem:[#allocation58_spill]]  ;;  %s6136_s7 = sld [smem:[#allocation69_spill]] }
 0x24f   :  { %v4273_v1 = vld [vmem:[%s6125_s13] sm:$0xff]   ;;  %v4274_v2 = vld [vmem:[%s6125_s13 + $0x8] sm:$0xff]   ;;  %v4275_v3 = vld [vmem:[%s6125_s13 + $0x10] sm:$0xff]   ;;  %s6137_s27 = sld [smem:[#allocation61_spill]]  ;;  %s6138_s8 = sld [smem:[#allocation73_spill]] }
 0x250   :  { %641 = vmatpush1.bf16.msra.mxu0 %v4273_v1  ;;  %v4276_v4 = vld [vmem:[%s6125_s13 + $0x18] sm:$0xff]   ;;  %v4277_v5 = vld [vmem:[%s6125_s13 + $0x20] sm:$0xff]   ;;  %v4278_v7 = vld [vmem:[%s6125_s13 + $0x28] sm:$0xff]   ;;  %s6139_s3 = sld [smem:[#allocation70_spill]]  ;;  %s6143_s11 = sld [smem:[#allocation77_spill]] }
 0x251   :  { %642 = vmatprep.subr.bf16.mxu0 %v5231_v0  ;;  %v4287_v6 = vld [vmem:[%s6126_s17 + $0x4] ss:$8 sps:$4 sm:$0x1f]   ;;  %v4279_v8 = vld [vmem:[%s6125_s13 + $0x30] sm:$0xff]   ;;  %v4280_v9 = vld [vmem:[%s6125_s13 + $0x38] sm:$0xff]   ;;  %s6140_s10 = sld [smem:[#allocation62_spill]] }
 0x252   :  { %3648 = vmatprep.mubr.msk.bf16.mxu0 %vm636_vm0, %v4287_v6  ;;  %v4281_v10 = vld [vmem:[%s6125_s13 + $0x40] sm:$0xff]   ;;  %v4282_v11 = vld [vmem:[%s6125_s13 + $0x48] sm:$0xff]   ;;  %v4283_v12 = vld [vmem:[%s6125_s13 + $0x50] sm:$0xff]   ;;  %s6144_s15 = sld [smem:[#allocation81_spill]] }
 0x253   :  { %v4284_v13 = vld [vmem:[%s6125_s13 + $0x58] sm:$0xff]   ;;  %v4285_v14 = vld [vmem:[%s6126_s17] ss:$8 sps:$4 sm:$0x1f]   ;;  %v4288_v24 = vld [vmem:[%s6128_s0 + $0x4] ss:$12 sps:$4 sm:$0xff]  }
 0x254   :  { %643 = vmatpush1.bf16.msra.mxu0 %v4274_v2  ;;  %v554_v16 = vld [vmem:[%s6127_s18 + $0x8] sm:$0x3]  ;;  %v553_v21 = vld [vmem:[%s6127_s18] sm:$0xff]  ;;  %903 = vmatprep.subr.bf16.mxu1 %v4288_v24  ;;  %v4296_v38 = vld [vmem:[%s6128_s0 + $0x30] ss:$12 sps:$4 sm:$0xff]  }
 0x255   :  { %644 = vmatprep.subr.bf16.mxu0 %v5231_v0  ;;  %v4290_v25 = vld [vmem:[%s6128_s0] ss:$12 sps:$4 sm:$0xff]   ;;  %v4291_v26 = vld [vmem:[%s6128_s0 + $0x1c] ss:$12 sps:$4 sm:$0xff]   ;;  %v4293_v27 = vld [vmem:[%s6128_s0 + $0x18] ss:$12 sps:$4 sm:$0xff]  }
 0x256   :  { %904 = vmatpush1.bf16.msra.mxu1 %v4290_v25  ;;  %v4294_v37 = vld [vmem:[%s6128_s0 + $0x34] ss:$12 sps:$4 sm:$0xff]   ;;  %v4297_v39 = vld [vmem:[%s6128_s0 + $0x4c] ss:$12 sps:$4 sm:$0xff]   ;;  %v4300_v41 = vld [vmem:[%s6128_s0 + $0x64] ss:$12 sps:$4 sm:$0xff]  }
 0x257   :  { %905 = vmatprep.subr.bf16.mxu1 %v4291_v26  ;;  %v4299_v40 = vld [vmem:[%s6128_s0 + $0x48] ss:$12 sps:$4 sm:$0xff]   ;;  %v4302_v42 = vld [vmem:[%s6128_s0 + $0x60] ss:$12 sps:$4 sm:$0xff]   ;;  %v4305_v44 = vld [vmem:[%s6128_s0 + $0x78] ss:$12 sps:$4 sm:$0xff]  }
 0x258   :  { %645 = vmatpush1.bf16.msra.mxu0 %v4275_v3  ;;  %v4303_v43 = vld [vmem:[%s6128_s0 + $0x7c] ss:$12 sps:$4 sm:$0xff]   ;;  %v4306_v46 = vld [vmem:[%s6128_s0 + $0x94] ss:$12 sps:$4 sm:$0xff]   ;;  %v4309_v48 = vld [vmem:[%s6128_s0 + $0xac] ss:$12 sps:$4 sm:$0xff]  }
 0x259   :  { %646 = vmatprep.subr.bf16.mxu0 %v5231_v0  ;;  %v4308_v47 = vld [vmem:[%s6128_s0 + $0x90] ss:$12 sps:$4 sm:$0xff]   ;;  %v4311_v49 = vld [vmem:[%s6128_s0 + $0xa8] ss:$12 sps:$4 sm:$0xff]   ;;  %v3649_v58 = vld [vmem:[%s6129_s25] ss:$0 sm:$0xff] }
 0x25a   :  { %906 = vmatpush1.bf16.msra.mxu1 %v4293_v27  ;;  %v3650_v62 = vld [vmem:[%s6130_s5] ss:$0 sm:$0xff]  ;;  %v4312_v3 = vld [vmem:[%s6128_s0 + $0x8] ss:$12 sps:$4 sm:$0xff]   ;;  %v4314_v6 = vld [vmem:[%s6128_s0 + $0x38] ss:$12 sps:$4 sm:$0xff]  }
 0x25b   :  { %907 = vmatprep.subr.bf16.mxu1 %v4294_v37 }
 0x25c   :  { %647 = vmatpush1.bf16.msra.mxu0 %v4276_v4 }
 0x25d   :  { %648 = vmatprep.subr.bf16.mxu0 %v5231_v0 }
 0x25e   :  { %908 = vmatpush1.bf16.msra.mxu1 %v4296_v38 }
 0x25f   :  { %909 = vmatprep.subr.bf16.mxu1 %v4297_v39 }
 0x260   :  { %649 = vmatpush1.bf16.msra.mxu0 %v4277_v5  ;;  %v4313_v5 = vld [vmem:[%s6128_s0 + $0x20] ss:$12 sps:$4 sm:$0xff]  }
 0x261   :  { %650 = vmatprep.subr.bf16.mxu0 %v5231_v0 }
 0x262   :  { %910 = vmatpush1.bf16.msra.mxu1 %v4299_v40 }
 0x263   :  { %911 = vmatprep.subr.bf16.mxu1 %v4300_v41 }
 0x264   :  { %651 = vmatpush1.bf16.msra.mxu0 %v4278_v7  ;;  %v4315_v7 = vld [vmem:[%s6128_s0 + $0x50] ss:$12 sps:$4 sm:$0xff]  }
 0x265   :  { %652 = vmatprep.subr.bf16.mxu0 %v5231_v0 }
 0x266   :  { %912 = vmatpush1.bf16.msra.mxu1 %v4302_v42 }
 0x267   :  { %913 = vmatprep.subr.bf16.mxu1 %v4303_v43 }
 0x268   :  { %653 = vmatpush1.bf16.msra.mxu0 %v4279_v8  ;;  %v4316_v8 = vld [vmem:[%s6128_s0 + $0x68] ss:$12 sps:$4 sm:$0xff]  }
 0x269   :  { %654 = vmatprep.subr.bf16.mxu0 %v5231_v0 }
 0x26a   :  { %914 = vmatpush1.bf16.msra.mxu1 %v4305_v44 }
 0x26b   :  { %915 = vmatprep.subr.bf16.mxu1 %v4306_v46 }
 0x26c   :  { %655 = vmatpush1.bf16.msra.mxu0 %v4280_v9  ;;  %v4317_v9 = vld [vmem:[%s6128_s0 + $0x80] ss:$12 sps:$4 sm:$0xff]  }
 0x26d   :  { %656 = vmatprep.subr.bf16.mxu0 %v5231_v0 }
 0x26e   :  { %916 = vmatpush1.bf16.msra.mxu1 %v4308_v47  ;;  %v3632_v47 = vld [vmem:[%s6133_s14] ss:$0 sm:$0xff] }
 0x26f   :  { %917 = vmatprep.subr.bf16.mxu1 %v4309_v48 }
 0x270   :  { %657 = vmatpush1.bf16.msra.mxu0 %v4281_v10  ;;  %v4318_v10 = vld [vmem:[%s6128_s0 + $0x98] ss:$12 sps:$4 sm:$0xff]  }
 0x271   :  { %658 = vmatprep.subr.bf16.mxu0 %v5231_v0 }
 0x272   :  { %918 = vmatpush1.bf16.msra.mxu1 %v4311_v49 }
 0x273   :  { %3979 = vmatprep.subr.bf16.mxu1 %v5232_v45 }
 0x274   :  { %659 = vmatpush1.bf16.msra.mxu0 %v4282_v11  ;;  %v4319_v11 = vld [vmem:[%s6128_s0 + $0xb0] ss:$12 sps:$4 sm:$0xff]  }
 0x275   :  { %660 = vmatprep.subr.bf16.mxu0 %v5231_v0 }
 0x278   :  { %661 = vmatpush1.bf16.msra.mxu0 %v4283_v12  ;;  %v495_v12 = vld [vmem:[%s6131_s4] sm:$0xff] }
 0x279   :  { %662 = vmatprep.subr.bf16.mxu0 %v5231_v0 }
 0x27c   :  { %663 = vmatpush1.bf16.msra.mxu0 %v4284_v13  ;;  %v496_v13 = vld [vmem:[%s6131_s4 + $0x8] sm:$0x3] }
 0x27d   :  { %3999 = vmatprep.subr.bf16.mxu0 %v5232_v45 }
 0x27f   :  { %673 = vmatmul.mubr.bf16.vlgmr.msra.gmra.mrb[0].mxu0 %v4285_v14  ;;  %v510_v14 = vlaneseq }
 0x280   :  { %4001 = vmatprep.mubr.msk.bf16.mxu0 %vm5233_vm2, %v5232_v45 }
 0x352   :  { %v674_v15 = vpop.f32.mrb[0].mxu0 }
 0x353   :  { %v676_v17 = vpop.f32.mrb[1].mxu0  ;;  %v5651_v23 = vadd.f32 %v674_v15, %v553_v21  ;;  %v5702_v15 = vshrl.u32 %v510_v14, 7 }
 0x354   :  { %v677_v18 = vpop.f32.mrb[2].mxu0  ;;  %v757_v17 = vld [vmem:[%s6132_s1] sm:$0x7] }
 0x355   :  { %v5646_v19 = vadd.f32 %v677_v18, %v554_v16  ;;  %v679_v20 = vpop.f32.mrb[3].mxu0  ;;  %v5705_v16 = vsub.s32 0, %v5702_v15  ;;  %v5709_v18 = vsub.s32 1, %v5702_v15 }
 0x357   :  { %v686_v22 = vsel %vm685_vm1, %v5646_v19, 0.0  ;;  %v763_v20 = vrot.slane %v757_v17, %v5705_v16 }
 0x358   :  { %687 = vadd.xlane.f32.xlu0 %v686_v22  ;;  %v767_v22 = vrot.slane %v757_v17, %v5709_v18 }
 0x35c   :  { %683 = vadd.xlane.f32.xlu0 %v5651_v23 }
 0x372   :  { %499 = vperm.xlu0 %4266, %v495_v12  }
 0x3e5   :  { %v688_v28 = vpop.xlane.xlu0 %687 }
 0x3e6   :  { %v691_v29 = vmul.f32 0.0078125, %v688_v28 }
 0x3e8   :  { %v693_v32 = vsub.f32 %v5646_v19, %v691_v29 }
 0x3e9   :  { %v684_v30 = vpop.xlane.xlu0 %683 }
 0x3ea   :  { %v690_v31 = vmul.f32 0.0078125, %v684_v30  ;;  %v695_v35 = vmul.f32 %v693_v32, %v693_v32 }
 0x3ec   :  { %v692_v33 = vsub.f32 %v5651_v23, %v690_v31  ;;  %v698_v36 = vsel %vm685_vm1, %v695_v35, 0.0 }
 0x3ee   :  { %v694_v34 = vmul.f32 %v692_v33, %v692_v33 }
 0x3f0   :  { %696 = vadd.xlane.f32.xlu1 %v694_v34 }
 0x3f1   :  { %v500_v48 = vpop.permute.xlu0 %499 }
 0x3f2   :  { %vm508_vm4 = vcmp.eq.s32.totalorder %v500_v48, %v3632_v47 }
 0x3f4   :  { %699 = vadd.xlane.f32.xlu1 %v698_v36  ;;  %v770_v36 = vsub.s32 2, %v5702_v15 }
 0x3f6   :  { %v771_v37 = vrot.slane %v757_v17, %v770_v36 }
 0x405   :  { %502 = vperm.xlu1 %4267, %v496_v13  }
 0x47d   :  { %v697_v50 = vpop.xlane.xlu1 %696 }
 0x47e   :  { %v701_v51 = vmul.f32 0.0078125, %v697_v50 }
 0x480   :  { %v703_v52 = vadd.f32 1e-06, %v701_v51 }
 0x481   :  { %v700_v53 = vpop.xlane.xlu1 %699 }
 0x482   :  { %4496 = vrsqrt.f32 %v703_v52  ;;  %v702_v54 = vmul.f32 0.0078125, %v700_v53 }
 0x484   :  { %v704_v55 = vadd.f32 1e-06, %v702_v54 }
 0x485   :  { %v503_v49 = vpop.permute.xlu1 %502 }
 0x486   :  { %4498 = vrsqrt.f32 %v704_v55  ;;  %vm509_vm6 = vcmp.eq.s32.totalorder %v503_v49, %v3632_v47 }
 0x48c   :  { %v4497_v56 = vpop.eup %4496 }
 0x48d   :  { %v707_v57 = vmul.f32 %v4497_v56, %v692_v33 }
 0x48f   :  { %v715_v61 = vmul.f32 %v3649_v58, %v707_v57 }
 0x490   :  { %v4499_v59 = vpop.eup %4498 }
 0x491   :  { %v708_v60 = vmul.f32 %v4499_v59, %v693_v32  ;;  %v723_v1 = vadd.f32 %v3650_v62, %v715_v61 }
 0x493   :  { %v716_v63 = vmul.f32 %v3649_v58, %v708_v60 }
 0x495   :  { %v724_v2 = vadd.f32 %v3650_v62, %v716_v63 }
 0x497   :  { %v758_v4 = vpack.c.bf16 %v724_v2, %v723_v1 }
 0x499   :  { %936 = vmatmul.mubr.bf16.vlgmr.msra.gmra.mrb[0].mxu1 %v758_v4 }
 0x49a   :  { %3980 = vmatpush3.bf16.msra.mxu1 %v4312_v3  ;;  %3995 = vmatprep.mubr.msk.bf16.mxu1 %vm5233_vm2, %v5232_v45 }
 0x49b   :  { %3981 = vmatprep.subr.bf16.mxu1 %v5232_v45 }
 0x49e   :  { %3982 = vmatpush3.bf16.msra.mxu1 %v4313_v5 }
 0x49f   :  { %3983 = vmatprep.subr.bf16.mxu1 %v5232_v45 }
 0x4a2   :  { %3984 = vmatpush3.bf16.msra.mxu1 %v4314_v6 }
 0x4a3   :  { %3985 = vmatprep.subr.bf16.mxu1 %v5232_v45 }
 0x4a6   :  { %3986 = vmatpush3.bf16.msra.mxu1 %v4315_v7 }
 0x4a7   :  { %3987 = vmatprep.subr.bf16.mxu1 %v5232_v45 }
 0x4aa   :  { %3988 = vmatpush3.bf16.msra.mxu1 %v4316_v8 }
 0x4ab   :  { %3989 = vmatprep.subr.bf16.mxu1 %v5232_v45 }
 0x4ae   :  { %3990 = vmatpush3.bf16.msra.mxu1 %v4317_v9 }
 0x4af   :  { %3991 = vmatprep.subr.bf16.mxu1 %v5232_v45 }
 0x4b2   :  { %3992 = vmatpush3.bf16.msra.mxu1 %v4318_v10 }
 0x4b3   :  { %3993 = vmatprep.subr.bf16.mxu1 %v5232_v45 }
 0x4b6   :  { %3994 = vmatpush3.bf16.msra.mxu1 %v4319_v11 }
 0x4b7   :  { %4017 = vmatprep.subr.bf16.mxu1 %v5232_v45 }
 0x4b9   :  { %3996 = vmatmul.mubr.bf16.vlgmr.msra.gmra.mrb[4].mxu1 %v758_v4 }
 0x4ba   :  { %4019 = vmatprep.mubr.msk.bf16.mxu1 %vm5233_vm2, %v5232_v45 }
 0x56c   :  { %v937_v21 = vpop.f32.mrb[0].mxu1 }
 0x56d   :  { %v938_v24 = vadd.f32 %v937_v21, %v763_v20  ;;  %v939_v25 = vpop.f32.mrb[1].mxu1 }
 0x56e   :  { %v941_v26 = vpop.f32.mrb[2].mxu1  ;;  %v940_v29 = vadd.f32 %v939_v25, %v767_v22 }
 0x56f   :  { %v942_v27 = vadd.f32 %v941_v26, %v763_v20  ;;  %v943_v28 = vpop.f32.mrb[3].mxu1  ;;  %v987_v31 = vmul.f32 0.125, %v938_v24 }
 0x570   :  { %v944_v30 = vadd.f32 %v943_v28, %v767_v22 }
 0x571   :  { %v988_v32 = vmul.f32 0.125, %v942_v27 }
 0x572   :  { %v1007_v33 = vpack.c.bf16 %v944_v30, %v940_v29 }
 0x573   :  { %v1006_v34 = vpack.c.bf16 %v988_v32, %v987_v31 }
 0x574   :  { %v1012_v35 = vsel %vm636_vm0, %v1007_v33, 0 }
 0x575   :  { %4000 = vmatpush3.bf16.xpose.msra.mxu0 %v1012_v35 }
 0x576   :  { %4005 = vmatprep.subr.bf16.mxu0 %v5232_v45 }
 0x57c   :  { %4002 = vmatmul.mubr.msk.bf16.vlgmr.msra.gmra.mrb[4].mxu0 %vm636_vm0, %v1006_v34 }
 0x57d   :  { %4007 = vmatprep.mubr.msk.bf16.mxu0 %vm5233_vm2, %v5232_v45 }
 0x58c   :  { %v980_v38 = vpop.f32.mrb[4].mxu1 }
 0x58d   :  { %v3997_v39 = vpop.f32.mrb[5].mxu1  ;;  %v981_v41 = vadd.f32 %v980_v38, %v771_v37 }
 0x58e   :  { %v983_v40 = vpop.f32.mrb[6].mxu1 }
 0x58f   :  { %v984_v42 = vadd.f32 %v983_v40, %v771_v37  ;;  %v3998_v43 = vpop.f32.mrb[7].mxu1 }
 0x591   :  { %v5721_v44 = vpack.c.bf16 %v984_v42, %v981_v41 }
 0x593   :  { %v1088_v46 = vsel %vm1086_vm3, %v5721_v44, 0 }
 0x594   :  { %4006 = vmatpush3.bf16.msra.mxu0 %v1088_v46 }
 0x595   :  { %4011 = vmatprep.subr.bf16.mxu0 %v5232_v45 }
 0x64f   :  { %v1048_v50 = vpop.f32.mrb[4].mxu0 }
 0x650   :  { %v1055_v51 = vsel %vm508_vm4, %v1048_v50, -1e+09  ;;  %v4003_v52 = vpop.f32.mrb[5].mxu0 }
 0x651   :  { %v1051_v53 = vpop.f32.mrb[6].mxu0  ;;  %v1058_v54 = vsel %vm1057_vm5, %v1055_v51, -inf }
 0x652   :  { %v1056_v55 = vsel %vm509_vm6, %v1051_v53, -1e+09  ;;  %v4004_v56 = vpop.f32.mrb[7].mxu0  ;;  %1059 = vmax.xlane.f32.xlu1 %v1058_v54 }
 0x653   :  { %v1062_v57 = vsel %vm1061_vm7, %v1056_v55, -inf  ;;  %v4322_v56 = vld [vmem:[#allocation2 + $0x10] sm:$0xff]  }
 0x654   :  { %1063 = vmax.xlane.f32.xlu0 %v1062_v57  ;;  %v4323_v57 = vld [vmem:[#allocation2 + $0x18] sm:$0xff]  }
 0x66a   :  { %1132 = vrot.lane.b32.xlu0 %v1006_v34, %s5213_s9 }
 0x6df   :  { %v1060_v58 = vpop.xlane.xlu1 %1059 }
 0x6e0   :  { %v1065_v59 = vsub.f32 %v1055_v51, %v1060_v58  ;;  %v4324_v58 = vld [vmem:[#allocation2 + $0x20] sm:$0xff]  }
 0x6e1   :  { %v1064_v60 = vpop.xlane.xlu0 %1063 }
 0x6e2   :  { %v1067_v61 = vmul.f32 1.442695, %v1065_v59  ;;  %v1066_v62 = vsub.f32 %v1056_v55, %v1064_v60  ;;  %v4320_v55 = vld [vmem:[#allocation2] sm:$0xff]   ;;  %v4325_v59 = vld [vmem:[#allocation2 + $0x28] sm:$0xff]   ;;  %v4326_v60 = vld [vmem:[#allocation2 + $0x30] sm:$0xff]  }
 0x6e4   :  { %4500 = vpow2.f32 %v1067_v61  ;;  %v1069_v63 = vmul.f32 1.442695, %v1066_v62  ;;  %v4327_v61 = vld [vmem:[#allocation2 + $0x38] sm:$0xff]  }
 0x6e5   :  { %v1133_v17 = vpop.permute.xlu0 %1132 }
 0x6e6   :  { %4502 = vpow2.f32 %v1069_v63 }
 0x6ee   :  { %v4501_v1 = vpop.eup %4500 }
 0x6ef   :  { %v1071_v2 = vsel %vm1057_vm5, %v4501_v1, 0.0 }
 0x6f0   :  { %v4503_v3 = vpop.eup %4502  ;;  %1072 = vadd.xlane.f32.xlu1 %v1071_v2 }
 0x6f1   :  { %v1074_v4 = vsel %vm1061_vm7, %v4503_v3, 0.0 }
 0x6f4   :  { %1075 = vadd.xlane.f32.xlu1 %v1074_v4 }
 0x705   :  { %1135 = vrot.lane.b32.xlu1 %v1007_v33, %s5213_s9 }
 0x77d   :  { %v1073_v5 = vpop.xlane.xlu1 %1072 }
 0x77e   :  { %4504 = vrcp.f32 %v1073_v5 }
 0x781   :  { %v1076_v6 = vpop.xlane.xlu1 %1075 }
 0x782   :  { %4506 = vrcp.f32 %v1076_v6 }
 0x785   :  { %v1136_v11 = vpop.permute.xlu1 %1135 }
 0x786   :  { %v1141_v13 = vsel %vm636_vm0, %v1136_v11, 0 }
 0x788   :  { %v4505_v7 = vpop.eup %4504 }
 0x789   :  { %v1079_v9 = vmul.f32 %v4505_v7, %v4501_v1 }
 0x78c   :  { %v4507_v8 = vpop.eup %4506 }
 0x78d   :  { %v1080_v10 = vmul.f32 %v4507_v8, %v4503_v3 }
 0x78f   :  { %v1081_v12 = vpack.c.bf16 %v1080_v10, %v1079_v9  ;;  %v3679_v10 = vld [vmem:[%s6134_s21] ss:$0 sm:$0xff] }
 0x791   :  { %4008 = vmatmul.mubr.msk.bf16.vlgmr.msra.gmra.mrb[8].mxu0 %vm1057_vm5, %v1081_v12 }
 0x792   :  { %4012 = vmatpush3.bf16.xpose.msra.mxu0 %v1141_v13  ;;  %4013 = vmatprep.mubr.msk.bf16.mxu0 %vm5233_vm2, %v5232_v45 }
 0x793   :  { %4023 = vmatprep.subr.bf16.mxu0 %v5232_v45 }
 0x799   :  { %4014 = vmatmul.mubr.msk.bf16.vlgmr.msra.gmra.mrb[12].mxu0 %vm636_vm0, %v1133_v17 }
 0x79a   :  { %4039 = vmatprep.mubr.msk.bf16.mxu0 %vm5233_vm2, %v5232_v45  ;;  %4024 = vmatpush3.bf16.msra.mxu0 %v4320_v55  ;;  %v4346_v55 = vld [vmem:[%s6136_s7 + $0x60] ss:$8 sps:$4 sm:$0xff]  }
 0x79b   :  { %4025 = vmatprep.subr.bf16.mxu0 %v5232_v45 }
 0x864   :  { %v5743_v20 = vpop.f32.mrb[8].mxu0 }
 0x865   :  { %v4009_v21 = vpop.f32.mrb[9].mxu0 }
 0x866   :  { %v5745_v22 = vpop.f32.mrb[10].mxu0 }
 0x867   :  { %v4010_v24 = vpop.f32.mrb[11].mxu0 }
 0x86c   :  { %v1177_v25 = vpop.f32.mrb[12].mxu0 }
 0x86d   :  { %v1184_v26 = vsel %vm508_vm4, %v1177_v25, -1e+09  ;;  %v4015_v27 = vpop.f32.mrb[13].mxu0 }
 0x86e   :  { %v1180_v28 = vpop.f32.mrb[14].mxu0  ;;  %v1186_v29 = vsel %vm1057_vm5, %v1184_v26, -inf  ;;  %v4328_v27 = vld [vmem:[%s6136_s7] ss:$8 sps:$4 sm:$0xff]  }
 0x86f   :  { %v1185_v30 = vsel %vm509_vm6, %v1180_v28, -1e+09  ;;  %1187 = vmax.xlane.f32.xlu1 %v1186_v29  ;;  %v4016_v31 = vpop.f32.mrb[15].mxu0  ;;  %v4330_v28 = vld [vmem:[%s6136_s7 + $0x4] ss:$8 sps:$4 sm:$0xff]  }
 0x870   :  { %v1189_v32 = vsel %vm1061_vm7, %v1185_v30, -inf  ;;  %v4333_v29 = vld [vmem:[%s6136_s7 + $0x14] ss:$8 sps:$4 sm:$0xff]  }
 0x871   :  { %1190 = vmax.xlane.f32.xlu0 %v1189_v32 }
 0x8fc   :  { %v1188_v33 = vpop.xlane.xlu1 %1187 }
 0x8fd   :  { %v1192_v34 = vsub.f32 %v1184_v26, %v1188_v33  ;;  %v5781_v26 = vld [vmem:[%s6135_s2] sm:$0xff] }
 0x8fe   :  { %v1191_v35 = vpop.xlane.xlu0 %1190 }
 0x8ff   :  { %v1194_v37 = vmul.f32 1.442695, %v1192_v34  ;;  %v1193_v38 = vsub.f32 %v1185_v30, %v1191_v35 }
 0x901   :  { %4508 = vpow2.f32 %v1194_v37  ;;  %v1196_v39 = vmul.f32 1.442695, %v1193_v38 }
 0x903   :  { %4510 = vpow2.f32 %v1196_v39 }
 0x90b   :  { %v4509_v40 = vpop.eup %4508 }
 0x90c   :  { %v1198_v41 = vsel %vm1057_vm5, %v4509_v40, 0.0 }
 0x90d   :  { %v4511_v42 = vpop.eup %4510  ;;  %1199 = vadd.xlane.f32.xlu1 %v1198_v41 }
 0x90e   :  { %v1201_v43 = vsel %vm1061_vm7, %v4511_v42, 0.0 }
 0x911   :  { %1202 = vadd.xlane.f32.xlu1 %v1201_v43  ;;  %v4336_v43 = vld [vmem:[%s6136_s7 + $0x24] ss:$8 sps:$4 sm:$0xff]  }
 0x922   :  { %1210 = vrot.lane.b32.xlu1 %v5721_v44, %s5213_s9  ;;  %v4321_v44 = vld [vmem:[#allocation2 + $0x8] sm:$0xff]  }
 0x923   :  { %4026 = vmatpush3.bf16.msra.mxu0 %v4321_v44  ;;  %v4351_v44 = vld [vmem:[%s6136_s7 + $0x74] ss:$8 sps:$4 sm:$0xff]  }
 0x924   :  { %4027 = vmatprep.subr.bf16.mxu0 %v5232_v45 }
 0x927   :  { %4028 = vmatpush3.bf16.msra.mxu0 %v4322_v56  ;;  %v4349_v56 = vld [vmem:[%s6136_s7 + $0x70] ss:$8 sps:$4 sm:$0xff]  }
 0x928   :  { %4029 = vmatprep.subr.bf16.mxu0 %v5232_v45 }
 0x92b   :  { %4030 = vmatpush3.bf16.msra.mxu0 %v4323_v57  ;;  %v4354_v57 = vld [vmem:[%s6138_s8 + $0x4] ss:$12 sps:$4 sm:$0xff]  }
 0x92c   :  { %4031 = vmatprep.subr.bf16.mxu0 %v5232_v45 }
 0x92f   :  { %4032 = vmatpush3.bf16.msra.mxu0 %v4324_v58 }
 0x930   :  { %4033 = vmatprep.subr.bf16.mxu0 %v5232_v45 }
 0x933   :  { %4034 = vmatpush3.bf16.msra.mxu0 %v4325_v59 }
 0x934   :  { %4035 = vmatprep.subr.bf16.mxu0 %v5232_v45 }
 0x937   :  { %4036 = vmatpush3.bf16.msra.mxu0 %v4326_v60 }
 0x938   :  { %4037 = vmatprep.subr.bf16.mxu0 %v5232_v45 }
 0x93b   :  { %4038 = vmatpush3.bf16.msra.mxu0 %v4327_v61 }
 0x99a   :  { %v1200_v46 = vpop.xlane.xlu1 %1199 }
 0x99b   :  { %4512 = vrcp.f32 %v1200_v46  ;;  %v4334_v46 = vld [vmem:[%s6136_s7 + $0x20] ss:$8 sps:$4 sm:$0xff]  }
 0x99e   :  { %v1203_v47 = vpop.xlane.xlu1 %1202 }
 0x99f   :  { %4514 = vrcp.f32 %v1203_v47  ;;  %v4339_v47 = vld [vmem:[%s6136_s7 + $0x34] ss:$8 sps:$4 sm:$0xff]  }
 0x9a2   :  { %v1211_v48 = vpop.permute.xlu1 %1210 }
 0x9a3   :  { %v1216_v49 = vsel %vm1086_vm3, %v1211_v48, 0  ;;  %v4337_v48 = vld [vmem:[%s6136_s7 + $0x30] ss:$8 sps:$4 sm:$0xff]  }
 0x9a4   :  { %4018 = vmatpush3.bf16.msra.mxu1 %v1216_v49  ;;  %v514_v49 = vld [vmem:[%s6137_s27] sm:$0xff] }
 0x9a5   :  { %v4513_v50 = vpop.eup %4512  ;;  %1518 = vmatprep.subr.bf16.mxu1 %v4330_v28  ;;  %v4358_v28 = vld [vmem:[%s6138_s8 + $0x30] ss:$12 sps:$4 sm:$0xff]  }
 0x9a6   :  { %v1206_v52 = vmul.f32 %v4513_v50, %v4509_v40  ;;  %v4342_v50 = vld [vmem:[%s6136_s7 + $0x44] ss:$8 sps:$4 sm:$0xff]  }
 0x9a9   :  { %v4515_v51 = vpop.eup %4514 }
 0x9aa   :  { %v1207_v53 = vmul.f32 %v4515_v51, %v4511_v42  ;;  %v4340_v51 = vld [vmem:[%s6136_s7 + $0x40] ss:$8 sps:$4 sm:$0xff]  }
 0x9ac   :  { %v1208_v54 = vpack.c.bf16 %v1207_v53, %v1206_v52  ;;  %v4345_v52 = vld [vmem:[%s6136_s7 + $0x54] ss:$8 sps:$4 sm:$0xff]   ;;  %v4343_v53 = vld [vmem:[%s6136_s7 + $0x50] ss:$8 sps:$4 sm:$0xff]  }
 0x9ae   :  { %4020 = vmatmul.mubr.msk.bf16.vlgmr.msra.gmra.mrb[8].mxu1 %vm1057_vm5, %v1208_v54  ;;  %v4348_v54 = vld [vmem:[%s6136_s7 + $0x64] ss:$8 sps:$4 sm:$0xff]  }
 0x9af   :  { %1550 = vmatprep.mubr.bf16.mxu1 %v5231_v0  ;;  %1519 = vmatpush1.bf16.msra.mxu1 %v4328_v27  ;;  %v4360_v27 = vld [vmem:[%s6138_s8 + $0x34] ss:$12 sps:$4 sm:$0xff]  }
 0x9b0   :  { %1520 = vmatprep.subr.bf16.mxu1 %v4333_v29  ;;  %v4363_v29 = vld [vmem:[%s6138_s8 + $0x4c] ss:$12 sps:$4 sm:$0xff]  }
 0xa81   :  { %v1252_v62 = vpop.f32.mrb[8].mxu1 }
 0xa82   :  { %v4021_v63 = vpop.f32.mrb[9].mxu1 }
 0xa83   :  { %v1255_v1 = vpop.f32.mrb[10].mxu1 }
 0xa84   :  { %v4268_v2 = vpack.i.bf16 %v1255_v1, %v1252_v62  ;;  %v4022_v3 = vpop.f32.mrb[11].mxu1 }
 0xa85   :  { %v3688_v3 = vld [vmem:[#allocation4] ss:$0 sm:$0xff] }
 0xa86   :  { %4269 = vrot.lane.b32.xlu0 %v4268_v2, %s5213_s9 }
 0xaf8   :  { %v4270_v4 = vpop.permute.xlu0 %4269 }
 0xaf9   :  { %v4272_v5 = vunpack.i.h.bf16 %v4270_v4  ;;  %v4271_v6 = vunpack.i.l.bf16 %v4270_v4 }
 0xafb   :  { %v1268_v7 = vsel %vm636_vm0, %v5745_v22, %v4272_v5  ;;  %v1267_v8 = vsel %vm636_vm0, %v5743_v20, %v4271_v6 }
 0xafc   :  { %v1269_v9 = vpack.c.bf16 %v1268_v7, %v1267_v8  ;;  %v3689_v7 = vld [vmem:[#allocation6] ss:$0 sm:$0xff] }
 0xafe   :  { %4040 = vmatmul.mubr.bf16.vlgmr.msra.gmra.mrb[16].mxu0 %v1269_v9 }
 0xbd1   :  { %v1358_v11 = vpop.f32.mrb[16].mxu0 }
 0xbd2   :  { %v1359_v12 = vadd.f32 %v3679_v10, %v1358_v11  ;;  %v4041_v13 = vpop.f32.mrb[17].mxu0 }
 0xbd3   :  { %v1361_v17 = vpop.f32.mrb[18].mxu0  ;;  %v4352_v13 = vld [vmem:[%s6138_s8] ss:$12 sps:$4 sm:$0xff]  }
 0xbd4   :  { %v5772_v21 = vadd.f32 %v1359_v12, %v5651_v23  ;;  %v1362_v24 = vadd.f32 %v3679_v10, %v1361_v17  ;;  %v4042_v22 = vpop.f32.mrb[19].mxu0  ;;  %v4331_v23 = vld [vmem:[%s6136_s7 + $0x10] ss:$8 sps:$4 sm:$0xff]  }
 0xbd5   :  { %1521 = vmatpush1.bf16.msra.mxu1 %v4331_v23  ;;  %v4361_v23 = vld [vmem:[%s6138_s8 + $0x48] ss:$12 sps:$4 sm:$0xff]  }
 0xbd6   :  { %v5775_v25 = vadd.f32 %v1362_v24, %v5646_v19  ;;  %1369 = vadd.xlane.f32.xlu0 %v5772_v21  ;;  %1522 = vmatprep.subr.bf16.mxu1 %v4336_v43  ;;  %v4357_v24 = vld [vmem:[%s6138_s8 + $0x1c] ss:$12 sps:$4 sm:$0xff]  }
 0xbd7   :  { %v4373_v43 = vld [vmem:[%s6138_s8 + $0xa8] ss:$12 sps:$4 sm:$0xff]  }
 0xbd8   :  { %v1371_v20 = vsel %vm685_vm1, %v5775_v25, 0.0 }
 0xbd9   :  { %1372 = vadd.xlane.f32.xlu1 %v1371_v20  ;;  %1523 = vmatpush1.bf16.msra.mxu1 %v4334_v46  ;;  %v4355_v20 = vld [vmem:[%s6138_s8 + $0x18] ss:$12 sps:$4 sm:$0xff]  }
 0xbda   :  { %1524 = vmatprep.subr.bf16.mxu1 %v4339_v47 }
 0xbdd   :  { %1824 = vadd.xlane.f32.xlu1 %v5781_v26  ;;  %1525 = vmatpush1.bf16.msra.mxu1 %v4337_v48  ;;  %v4377_v48 = vld [vmem:[%s6139_s3] sm:$0xff]  }
 0xbde   :  { %1526 = vmatprep.subr.bf16.mxu1 %v4342_v50  ;;  %v4379_v50 = vld [vmem:[%s6139_s3 + $0x8] sm:$0xff]  }
 0xbe1   :  { %1527 = vmatpush1.bf16.msra.mxu1 %v4340_v51  ;;  %v4380_v51 = vld [vmem:[%s6139_s3 + $0x50] sm:$0xff]  }
 0xbe2   :  { %1528 = vmatprep.subr.bf16.mxu1 %v4345_v52  ;;  %v4381_v52 = vld [vmem:[%s6139_s3 + $0x10] sm:$0xff]  }
 0xbe5   :  { %1529 = vmatpush1.bf16.msra.mxu1 %v4343_v53  ;;  %v4382_v53 = vld [vmem:[%s6139_s3 + $0x58] sm:$0xff]  }
 0xbe6   :  { %1530 = vmatprep.subr.bf16.mxu1 %v4348_v54  ;;  %v4383_v54 = vld [vmem:[%s6139_s3 + $0x18] sm:$0xff]  }
 0xbe9   :  { %1531 = vmatpush1.bf16.msra.mxu1 %v4346_v55  ;;  %v4384_v55 = vld [vmem:[%s6139_s3 + $0x60] sm:$0xff]  }
 0xbea   :  { %1532 = vmatprep.subr.bf16.mxu1 %v4351_v44  ;;  %v4385_v44 = vld [vmem:[%s6139_s3 + $0x20] sm:$0xff]  }
 0xbed   :  { %1533 = vmatpush1.bf16.msra.mxu1 %v4349_v56  ;;  %v4386_v56 = vld [vmem:[%s6139_s3 + $0x68] sm:$0xff]  }
 0xbee   :  { %2027 = vmatprep.subr.bf16.mxu1 %v4354_v57  ;;  %v4387_v57 = vld [vmem:[%s6139_s3 + $0x28] sm:$0xff]  }
 0xc63   :  { %v1370_v19 = vpop.xlane.xlu0 %1369 }
 0xc64   :  { %v1374_v30 = vmul.f32 0.0078125, %v1370_v19  ;;  %v4366_v19 = vld [vmem:[%s6138_s8 + $0x64] ss:$12 sps:$4 sm:$0xff]  }
 0xc66   :  { %v1376_v31 = vsub.f32 %v5772_v21, %v1374_v30  ;;  %v1373_v32 = vpop.xlane.xlu1 %1372  ;;  %v4364_v30 = vld [vmem:[%s6138_s8 + $0x60] ss:$12 sps:$4 sm:$0xff]  }
 0xc67   :  { %v1375_v33 = vmul.f32 0.0078125, %v1373_v32 }
 0xc68   :  { %v1378_v34 = vmul.f32 %v1376_v31, %v1376_v31 }
 0xc69   :  { %v1377_v35 = vsub.f32 %v5775_v25, %v1375_v33  ;;  %v4367_v33 = vld [vmem:[%s6138_s8 + $0x78] ss:$12 sps:$4 sm:$0xff]  }
 0xc6a   :  { %1380 = vadd.xlane.f32.xlu1 %v1378_v34  ;;  %v1825_v37 = vpop.xlane.xlu1 %1824  ;;  %v4372_v34 = vld [vmem:[%s6138_s8 + $0x94] ss:$12 sps:$4 sm:$0xff]  }
 0xc6b   :  { %v1826_v38 = vmul.f32 0.0078125, %v1825_v37  ;;  %v1379_v39 = vmul.f32 %v1377_v35, %v1377_v35  ;;  %v3725_v37 = vld [vmem:[#allocation13] ss:$0 sm:$0xff] }
 0xc6d   :  { %v5791_v40 = vsub.f32 %v5781_v26, %v1826_v38  ;;  %v1382_v41 = vsel %vm685_vm1, %v1379_v39, 0.0  ;;  %v4370_v38 = vld [vmem:[%s6138_s8 + $0x90] ss:$12 sps:$4 sm:$0xff]   ;;  %v4375_v39 = vld [vmem:[%s6138_s8 + $0xac] ss:$12 sps:$4 sm:$0xff]  }
 0xc6e   :  { %1383 = vadd.xlane.f32.xlu0 %v1382_v41 }
 0xc6f   :  { %v1828_v42 = vmul.f32 %v5791_v40, %v5791_v40 }
 0xc71   :  { %1829 = vadd.xlane.f32.xlu1 %v1828_v42  ;;  %v3726_v42 = vld [vmem:[#allocation15] ss:$0 sm:$0xff] }
 0xc84   :  { %517 = vperm.xlu0 %4266, %v514_v49   ;;  %v4378_v49 = vld [vmem:[%s6139_s3 + $0x48] sm:$0xff]  }
 0xcf7   :  { %v1381_v58 = vpop.xlane.xlu1 %1380 }
 0xcf8   :  { %v1385_v59 = vmul.f32 0.0078125, %v1381_v58  ;;  %v4388_v58 = vld [vmem:[%s6139_s3 + $0x70] sm:$0xff]  }
 0xcfa   :  { %v1387_v60 = vadd.f32 1e-06, %v1385_v59  ;;  %v4389_v59 = vld [vmem:[%s6139_s3 + $0x30] sm:$0xff]  }
 0xcfb   :  { %v1384_v61 = vpop.xlane.xlu0 %1383 }
 0xcfc   :  { %4516 = vrsqrt.f32 %v1387_v60  ;;  %v1386_v62 = vmul.f32 0.0078125, %v1384_v61  ;;  %v4390_v60 = vld [vmem:[%s6139_s3 + $0x78] sm:$0xff]  }
 0xcfd   :  { %v4391_v61 = vld [vmem:[%s6139_s3 + $0x38] sm:$0xff]  }
 0xcfe   :  { %v1388_v63 = vadd.f32 1e-06, %v1386_v62  ;;  %v1830_v8 = vpop.xlane.xlu1 %1829  ;;  %v1426_v62 = vld [vmem:[#allocation7] sm:$0x3] }
 0xcff   :  { %v1831_v12 = vmul.f32 0.0078125, %v1830_v8 }
 0xd00   :  { %4518 = vrsqrt.f32 %v1388_v63  ;;  %v1431_v63 = vrot.slane %v1426_v62, %v5705_v16 }
 0xd01   :  { %v1832_v22 = vadd.f32 1e-06, %v1831_v12 }
 0xd03   :  { %4520 = vrsqrt.f32 %v1832_v22 }
 0xd06   :  { %v4517_v1 = vpop.eup %4516 }
 0xd07   :  { %v1391_v2 = vmul.f32 %v4517_v1, %v1376_v31  ;;  %v4369_v31 = vld [vmem:[%s6138_s8 + $0x7c] ss:$12 sps:$4 sm:$0xff]   ;;  %v1435_v1 = vrot.slane %v1426_v62, %v5709_v18 }
 0xd09   :  { %v1399_v6 = vmul.f32 %v3688_v3, %v1391_v2 }
 0xd0a   :  { %v4519_v4 = vpop.eup %4518 }
 0xd0b   :  { %v1392_v5 = vmul.f32 %v4519_v4, %v1377_v35  ;;  %v1407_v10 = vadd.f32 %v3689_v7, %v1399_v6 }
 0xd0d   :  { %v1400_v9 = vmul.f32 %v3688_v3, %v1392_v5  ;;  %v4521_v32 = vpop.eup %4520 }
 0xd0e   :  { %v1834_v35 = vmul.f32 %v4521_v32, %v5791_v40  ;;  %v4376_v40 = vld [vmem:[%s6139_s3 + $0x40] sm:$0xff]  }
 0xd0f   :  { %v1408_v11 = vadd.f32 %v3689_v7, %v1400_v9  ;;  %3874 = vmatprep.subr.bf16.mxu0 %v4376_v40  ;;  %v5852_v40 = vld [vmem:[#allocation16] sm:$0x7] }
 0xd10   :  { %v1841_v41 = vmul.f32 %v3725_v37, %v1834_v35  ;;  %3875 = vmatpush3.bf16.msra.mxu0 %v4377_v48 }
 0xd11   :  { %v1409_v17 = vpack.c.bf16 %v1408_v11, %v1407_v10  ;;  %3876 = vmatprep.subr.bf16.mxu0 %v4378_v49 }
 0xd12   :  { %v1848_v46 = vadd.f32 %v3726_v42, %v1841_v41 }
 0xd13   :  { %1551 = vmatmul.mubr.bf16.vlgmr.msra.gmra.mrb[12].mxu1 %v1409_v17 }
 0xd14   :  { %2028 = vmatpush1.bf16.msra.mxu1 %v4352_v13  ;;  %2059 = vmatprep.mubr.bf16.mxu1 %v5231_v0  ;;  %v5827_v47 = vpack.c.bf16 %v1848_v46, %v1848_v46 }
 0xd15   :  { %2029 = vmatprep.subr.bf16.mxu1 %v4357_v24  ;;  %3877 = vmatpush3.bf16.msra.mxu0 %v4379_v50 }
 0xd16   :  { %3878 = vmatprep.subr.bf16.mxu0 %v4380_v51 }
 0xd18   :  { %2030 = vmatpush1.bf16.msra.mxu1 %v4355_v20 }
 0xd19   :  { %2031 = vmatprep.subr.bf16.mxu1 %v4360_v27  ;;  %3879 = vmatpush3.bf16.msra.mxu0 %v4381_v52 }
 0xd1a   :  { %3880 = vmatprep.subr.bf16.mxu0 %v4382_v53 }
 0xd1c   :  { %2032 = vmatpush1.bf16.msra.mxu1 %v4358_v28 }
 0xd1d   :  { %2033 = vmatprep.subr.bf16.mxu1 %v4363_v29  ;;  %3881 = vmatpush3.bf16.msra.mxu0 %v4383_v54 }
 0xd1e   :  { %3882 = vmatprep.subr.bf16.mxu0 %v4384_v55 }
 0xd20   :  { %2034 = vmatpush1.bf16.msra.mxu1 %v4361_v23 }
 0xd21   :  { %2035 = vmatprep.subr.bf16.mxu1 %v4366_v19  ;;  %3883 = vmatpush3.bf16.msra.mxu0 %v4385_v44  ;;  %v1887_v44 = vrot.slane %v5852_v40, %v5705_v16 }
 0xd22   :  { %3884 = vmatprep.subr.bf16.mxu0 %v4386_v56 }
 0xd24   :  { %2036 = vmatpush1.bf16.msra.mxu1 %v4364_v30 }
 0xd25   :  { %2037 = vmatprep.subr.bf16.mxu1 %v4369_v31  ;;  %3885 = vmatpush3.bf16.msra.mxu0 %v4387_v57 }
 0xd26   :  { %3886 = vmatprep.subr.bf16.mxu0 %v4388_v58  ;;  %v1891_v58 = vrot.slane %v5852_v40, %v5709_v18 }
 0xd28   :  { %2038 = vmatpush1.bf16.msra.mxu1 %v4367_v33 }
 0xd29   :  { %2039 = vmatprep.subr.bf16.mxu1 %v4372_v34  ;;  %3887 = vmatpush3.bf16.msra.mxu0 %v4389_v59 }
 0xd2a   :  { %3888 = vmatprep.subr.bf16.mxu0 %v4390_v60 }
 0xd2c   :  { %2040 = vmatpush1.bf16.msra.mxu1 %v4370_v38 }
 0xd2d   :  { %2041 = vmatprep.subr.bf16.mxu1 %v4375_v39  ;;  %3889 = vmatpush3.bf16.msra.mxu0 %v4391_v61  ;;  %v4392_v61 = vld [vmem:[%s6138_s8 + $0x8] ss:$12 sps:$4 sm:$0xff]  }
 0xd2e   :  { %4043 = vmatprep.subr.bf16.mxu0 %v5232_v45 }
 0xd30   :  { %2042 = vmatpush1.bf16.msra.mxu1 %v4373_v43 }
 0xd31   :  { %4063 = vmatprep.subr.bf16.mxu1 %v5232_v45 }
 0xd33   :  { %2060 = vmatmul.mubr.bf16.vlgmr.msra.gmra.mrb[16].mxu1 %v5827_v47 }
 0xd34   :  { %4065 = vmatprep.mubr.msk.bf16.mxu1 %vm5233_vm2, %v5232_v45 }
 0xde6   :  { %v1552_v2 = vpop.f32.mrb[12].mxu1 }
 0xde7   :  { %v1553_v3 = vadd.f32 %v1552_v2, %v1431_v63  ;;  %v1554_v4 = vpop.f32.mrb[13].mxu1 }
 0xde8   :  { %v1555_v5 = vadd.f32 %v1554_v4, %v1435_v1  ;;  %v1556_v6 = vpop.f32.mrb[14].mxu1 }
 0xde9   :  { %v1565_v7 = vmul.f32 0.044715, %v1553_v3  ;;  %v1557_v8 = vadd.f32 %v1556_v6, %v1431_v63  ;;  %v1558_v9 = vpop.f32.mrb[15].mxu1  ;;  %v1561_v48 = vmul.f32 0.5, %v1553_v3  ;;  %v4393_v6 = vld [vmem:[%s6138_s8 + $0x20] ss:$12 sps:$4 sm:$0xff]  }
 0xdea   :  { %v1566_v10 = vmul.f32 0.044715, %v1555_v5  ;;  %v1559_v11 = vadd.f32 %v1558_v9, %v1435_v1  ;;  %v1562_v51 = vmul.f32 0.5, %v1555_v5 }
 0xdeb   :  { %v1569_v12 = vmul.f32 %v1565_v7, %v1553_v3  ;;  %v1567_v13 = vmul.f32 0.044715, %v1557_v8  ;;  %v1563_v49 = vmul.f32 0.5, %v1557_v8 }
 0xdec   :  { %v1570_v17 = vmul.f32 %v1566_v10, %v1555_v5  ;;  %v1568_v24 = vmul.f32 0.044715, %v1559_v11  ;;  %v1564_v52 = vmul.f32 0.5, %v1559_v11  ;;  %v4394_v10 = vld [vmem:[%s6138_s8 + $0x38] ss:$12 sps:$4 sm:$0xff]  }
 0xded   :  { %v1573_v22 = vmul.f32 %v1569_v12, %v1553_v3  ;;  %v1571_v20 = vmul.f32 %v1567_v13, %v1557_v8  ;;  %v4396_v12 = vld [vmem:[%s6138_s8 + $0x68] ss:$12 sps:$4 sm:$0xff]   ;;  %v4397_v13 = vld [vmem:[%s6138_s8 + $0x80] ss:$12 sps:$4 sm:$0xff]  }
 0xdee   :  { %v1574_v27 = vmul.f32 %v1570_v17, %v1555_v5  ;;  %v1572_v28 = vmul.f32 %v1568_v24, %v1559_v11  ;;  %v4398_v17 = vld [vmem:[%s6138_s8 + $0x98] ss:$12 sps:$4 sm:$0xff]   ;;  %v4399_v24 = vld [vmem:[%s6138_s8 + $0xb0] ss:$12 sps:$4 sm:$0xff]  }
 0xdef   :  { %v1577_v29 = vadd.f32 %v1573_v22, %v1553_v3  ;;  %v1575_v23 = vmul.f32 %v1571_v20, %v1557_v8 }
 0xdf0   :  { %v1576_v19 = vmul.f32 %v1572_v28, %v1559_v11  ;;  %v1578_v30 = vadd.f32 %v1574_v27, %v1555_v5 }
 0xdf1   :  { %v1581_v31 = vmul.f32 0.7978846, %v1577_v29  ;;  %v1579_v32 = vadd.f32 %v1575_v23, %v1557_v8  ;;  %v5888_v23 = vld [vmem:[#allocation9] ss:$0 sm:$0xff] }
 0xdf2   :  { %v1580_v33 = vadd.f32 %v1576_v19, %v1559_v11  ;;  %v1582_v34 = vmul.f32 0.7978846, %v1578_v30  ;;  %v4395_v11 = vld [vmem:[%s6138_s8 + $0x50] ss:$12 sps:$4 sm:$0xff]  }
 0xdf3   :  { %4522 = vtanh.f32 %v1581_v31  ;;  %v1583_v35 = vmul.f32 0.7978846, %v1579_v32  ;;  %v513_v31 = vand.u32 127, %v510_v14  ;;  %v3633_v32 = vld [vmem:[%s6140_s10] ss:$0 sm:$0xff] }
 0xdf4   :  { %v1584_v37 = vmul.f32 0.7978846, %v1580_v33  ;;  %4524 = vtanh.f32 %v1582_v34  ;;  %v5893_v33 = vpop.permute.xlu0 %517  ;;  %v4406_v34 = vld [vmem:[#allocation18 + $0x30] sm:$0xff]  }
 0xdf5   :  { %4526 = vtanh.f32 %v1583_v35  ;;  %vm523_vm8 = vcmp.eq.s32.totalorder %v5893_v33, %v3633_v32  ;;  %vm524_vm9 = vcmp.ge.s32.totalorder %v5702_v15, %v513_v31  ;;  %v4404_v31 = vld [vmem:[#allocation18 + $0x20] sm:$0xff]   ;;  %v4405_v32 = vld [vmem:[#allocation18 + $0x28] sm:$0xff]  }
 0xdf6   :  { %4528 = vtanh.f32 %v1584_v37  ;;  %vm5900_vm11 = vmand %vm523_vm8, %vm524_vm9 }
 0xdfd   :  { %v4523_v38 = vpop.eup %4522 }
 0xdfe   :  { %v4525_v39 = vpop.eup %4524  ;;  %v1589_v41 = vadd.f32 1.0, %v4523_v38 }
 0xdff   :  { %v4527_v42 = vpop.eup %4526  ;;  %v1590_v43 = vadd.f32 1.0, %v4525_v39 }
 0xe00   :  { %v4529_v46 = vpop.eup %4528  ;;  %v1591_v50 = vadd.f32 1.0, %v4527_v42  ;;  %v1593_v54 = vmul.f32 %v1589_v41, %v1561_v48  ;;  %v1895_v41 = vrot.slane %v5852_v40, %v770_v36 }
 0xe01   :  { %v1592_v53 = vadd.f32 1.0, %v4529_v46  ;;  %v1594_v56 = vmul.f32 %v1590_v43, %v1562_v51 }
 0xe02   :  { %v1595_v55 = vmul.f32 %v1591_v50, %v1563_v49 }
 0xe03   :  { %v1596_v57 = vmul.f32 %v1592_v53, %v1564_v52 }
 0xe04   :  { %v1597_v59 = vpack.c.bf16 %v1595_v55, %v1593_v54 }
 0xe05   :  { %v1598_v60 = vpack.c.bf16 %v1596_v57, %v1594_v56 }
 0xe06   :  { %v2061_v62 = vpop.f32.mrb[16].mxu1 }
 0xe07   :  { %v2062_v63 = vadd.f32 %v2061_v62, %v1887_v44  ;;  %v2063_v1 = vpop.f32.mrb[17].mxu1  ;;  %1759 = vmatprep.mubr.bf16.mxu0 %v1598_v60 }
 0xe08   :  { %v2064_v2 = vadd.f32 %v2063_v1, %v1891_v58  ;;  %v2065_v3 = vpop.f32.mrb[18].mxu1  ;;  %1760 = vmatmul.mubr.bf16.vlgmr.msra.gmra.mrb[20].mxu0 %v1597_v59 }
 0xe09   :  { %v2108_v4 = vmul.f32 0.125, %v2062_v63  ;;  %v2066_v5 = vpop.f32.mrb[19].mxu1  ;;  %4044 = vmatpush3.bf16.msra.mxu0 %v4392_v61  ;;  %4059 = vmatprep.mubr.msk.bf16.mxu0 %vm5233_vm2, %v5232_v45 }
 0xe0a   :  { %v5862_v7 = vpack.c.bf16 %v2064_v2, %v2064_v2  ;;  %4045 = vmatprep.subr.bf16.mxu0 %v5232_v45 }
 0xe0b   :  { %v2126_v8 = vpack.c.bf16 %v2108_v4, %v2108_v4 }
 0xe0c   :  { %v2132_v9 = vsel %vm636_vm0, %v5862_v7, 0 }
 0xe0d   :  { %4046 = vmatpush3.bf16.msra.mxu0 %v4393_v6  ;;  %4064 = vmatpush3.bf16.xpose.msra.mxu1 %v2132_v9 }
 0xe0e   :  { %2237 = vrot.lane.b32.xlu0 %v2126_v8, %s5213_s9  ;;  %4047 = vmatprep.subr.bf16.mxu0 %v5232_v45 }
 0xe0f   :  { %4069 = vmatprep.subr.bf16.mxu1 %v5232_v45 }
 0xe11   :  { %4048 = vmatpush3.bf16.msra.mxu0 %v4394_v10 }
 0xe12   :  { %4049 = vmatprep.subr.bf16.mxu0 %v5232_v45 }
 0xe14   :  { %4066 = vmatmul.mubr.msk.bf16.vlgmr.msra.gmra.mrb[20].mxu1 %vm636_vm0, %v2126_v8 }
 0xe15   :  { %4050 = vmatpush3.bf16.msra.mxu0 %v4395_v11  ;;  %4071 = vmatprep.mubr.msk.bf16.mxu1 %vm5233_vm2, %v5232_v45 }
 0xe16   :  { %4051 = vmatprep.subr.bf16.mxu0 %v5232_v45 }
 0xe19   :  { %4052 = vmatpush3.bf16.msra.mxu0 %v4396_v12 }
 0xe1a   :  { %4053 = vmatprep.subr.bf16.mxu0 %v5232_v45 }
 0xe1d   :  { %4054 = vmatpush3.bf16.msra.mxu0 %v4397_v13 }
 0xe1e   :  { %4055 = vmatprep.subr.bf16.mxu0 %v5232_v45 }
 0xe21   :  { %4056 = vmatpush3.bf16.msra.mxu0 %v4398_v17 }
 0xe22   :  { %4057 = vmatprep.subr.bf16.mxu0 %v5232_v45 }
 0xe25   :  { %4058 = vmatpush3.bf16.msra.mxu0 %v4399_v24 }
 0xe26   :  { %4087 = vmatprep.subr.bf16.mxu0 %v5232_v45 }
 0xe28   :  { %4060 = vmatmul.mubr.bf16.vlgmr.msra.gmra.mrb[24].mxu0 %v5827_v47 }
 0xe29   :  { %4103 = vmatprep.mubr.msk.bf16.mxu0 %vm5233_vm2, %v5232_v45 }
 0xe80   :  { %v2238_v59 = vpop.permute.xlu0 %2237 }
 0xedb   :  { %v3890_v22 = vpop.f32.mrb[20].mxu0 }
 0xedc   :  { %v3891_v20 = vpop.f32.mrb[21].mxu0 }
 0xedd   :  { %v3892_v27 = vadd.f32 %v3891_v20, %v3890_v22  ;;  %v3893_v28 = vpop.f32.mrb[22].mxu0 }
 0xede   :  { %v3894_v29 = vpop.f32.mrb[23].mxu0 }
 0xedf   :  { %v1768_v19 = vadd.f32 %v3892_v27, %v5772_v21  ;;  %v3895_v30 = vadd.f32 %v3894_v29, %v3893_v28  ;;  %v4400_v29 = vld [vmem:[#allocation18] sm:$0xff]  }
 0xee0   :  { %4088 = vmatpush3.bf16.msra.mxu0 %v4400_v29 }
 0xee1   :  { %v5896_v47 = vadd.f32 %v5888_v23, %v1768_v19  ;;  %4089 = vmatprep.subr.bf16.mxu0 %v5232_v45  ;;  %v4402_v19 = vld [vmem:[#allocation18 + $0x10] sm:$0xff]  }
 0xee7   :  { %v2168_v35 = vpop.f32.mrb[20].mxu1 }
 0xee8   :  { %v2174_v21 = vsel %vm5900_vm11, %v2168_v35, -1e+09  ;;  %v4067_v14 = vpop.f32.mrb[21].mxu1  ;;  %v4407_v35 = vld [vmem:[#allocation18 + $0x38] sm:$0xff]  }
 0xee9   :  { %v2171_v37 = vpop.f32.mrb[22].mxu1  ;;  %v2176_v38 = vsel %vm2175_vm10, %v2174_v21, -inf }
 0xeea   :  { %2177 = vmax.xlane.f32.xlu1 %v2176_v38  ;;  %v4068_v39 = vpop.f32.mrb[23].mxu1 }
 0xefb   :  { %v2102_v42 = vpop.f32.mrb[24].mxu0 }
 0xefc   :  { %v2103_v43 = vadd.f32 %v2102_v42, %v1895_v41  ;;  %v4061_v46 = vpop.f32.mrb[25].mxu0 }
 0xefd   :  { %v2105_v48 = vpop.f32.mrb[26].mxu0 }
 0xefe   :  { %v2188_v49 = vpack.c.bf16 %v2103_v43, %v2103_v43  ;;  %v4062_v50 = vpop.f32.mrb[27].mxu0 }
 0xf00   :  { %v2194_v51 = vsel %vm2192_vm12, %v2188_v49, 0 }
 0xf01   :  { %4070 = vmatpush3.bf16.msra.mxu1 %v2194_v51  ;;  %v4408_v51 = vld [vmem:[%s6143_s11] ss:$8 sps:$4 sm:$0xff]  }
 0xf02   :  { %4075 = vmatprep.subr.bf16.mxu1 %v5232_v45 }
 0xf77   :  { %v2178_v52 = vpop.xlane.xlu1 %2177 }
 0xf78   :  { %v2179_v53 = vsub.f32 %v2174_v21, %v2178_v52  ;;  %v4410_v52 = vld [vmem:[%s6143_s11 + $0x4] ss:$8 sps:$4 sm:$0xff]  }
 0xf7a   :  { %v2180_v54 = vmul.f32 1.442695, %v2179_v53  ;;  %v4413_v53 = vld [vmem:[%s6143_s11 + $0x14] ss:$8 sps:$4 sm:$0xff]  }
 0xf7c   :  { %4530 = vpow2.f32 %v2180_v54  ;;  %v4411_v54 = vld [vmem:[%s6143_s11 + $0x10] ss:$8 sps:$4 sm:$0xff]  }
 0xf86   :  { %v4531_v55 = vpop.eup %4530 }
 0xf87   :  { %v2182_v15 = vsel %vm2175_vm10, %v4531_v55, 0.0 }
 0xf88   :  { %2183 = vadd.xlane.f32.xlu1 %v2182_v15  ;;  %v3755_v15 = vld [vmem:[#allocation19] ss:$0 sm:$0xff] }
 0xf99   :  { %2240 = vrot.lane.b32.xlu1 %v5862_v7, %s5213_s9  ;;  %v1769_v7 = vadd.f32 %v3895_v30, %v5775_v25  ;;  %v4403_v30 = vld [vmem:[#allocation18 + $0x18] sm:$0xff]  }
 0xf9b   :  { %v1778_v8 = vadd.f32 %v5888_v23, %v1769_v7  ;;  %v4401_v23 = vld [vmem:[#allocation18 + $0x8] sm:$0xff]  }
 0xf9c   :  { %4090 = vmatpush3.bf16.msra.mxu0 %v4401_v23  ;;  %v4431_v7 = vld [vmem:[%s6143_s11 + $0x74] ss:$8 sps:$4 sm:$0xff]  }
 0xf9d   :  { %v1783_v9 = vsel %vm685_vm1, %v1778_v8, 0.0  ;;  %4091 = vmatprep.subr.bf16.mxu0 %v5232_v45 }
 0xfa0   :  { %4092 = vmatpush3.bf16.msra.mxu0 %v4402_v19  ;;  %v3723_v19 = vld [vmem:[#allocation10] ss:$0 sm:$0xff] }
 0xfa1   :  { %4093 = vmatprep.subr.bf16.mxu0 %v5232_v45 }
 0xfa4   :  { %4094 = vmatpush3.bf16.msra.mxu0 %v4403_v30 }
 0xfa5   :  { %4095 = vmatprep.subr.bf16.mxu0 %v5232_v45 }
 0xfa8   :  { %4096 = vmatpush3.bf16.msra.mxu0 %v4404_v31 }
 0xfa9   :  { %4097 = vmatprep.subr.bf16.mxu0 %v5232_v45 }
 0xfac   :  { %4098 = vmatpush3.bf16.msra.mxu0 %v4405_v32 }
 0xfad   :  { %4099 = vmatprep.subr.bf16.mxu0 %v5232_v45 }
 0xfb0   :  { %4100 = vmatpush3.bf16.msra.mxu0 %v4406_v34  ;;  %v4434_v34 = vld [vmem:[#allocation24 + $0x10] sm:$0xff]  }
 0xfb1   :  { %4101 = vmatprep.subr.bf16.mxu0 %v5232_v45 }
 0xfb4   :  { %4102 = vmatpush3.bf16.msra.mxu0 %v4407_v35  ;;  %v3724_v35 = vld [vmem:[#allocation12] ss:$0 sm:$0xff] }
 0xfb5   :  { %2700 = vmatprep.subr.bf16.mxu0 %v4410_v52  ;;  %v3764_v52 = vld [vmem:[#allocation21] ss:$0 sm:$0xff] }
0x1015   :  { %v2184_v36 = vpop.xlane.xlu1 %2183 }
0x1016   :  { %4532 = vrcp.f32 %v2184_v36 }
0x1019   :  { %v2241_v56 = vpop.permute.xlu1 %2240 }
0x101a   :  { %v2246_v58 = vsel %vm636_vm0, %v2241_v56, 0 }
0x1020   :  { %v4533_v40 = vpop.eup %4532 }
0x1021   :  { %v2186_v44 = vmul.f32 %v4533_v40, %v4531_v55 }
0x1023   :  { %v2187_v57 = vpack.c.bf16 %v2186_v44, %v2186_v44 }
0x1025   :  { %4072 = vmatmul.mubr.msk.bf16.vlgmr.msra.gmra.mrb[24].mxu1 %vm2175_vm10, %v2187_v57 }
0x1026   :  { %4076 = vmatpush3.bf16.xpose.msra.mxu1 %v2246_v58  ;;  %4077 = vmatprep.mubr.msk.bf16.mxu1 %vm5233_vm2, %v5232_v45 }
0x1027   :  { %4081 = vmatprep.subr.bf16.mxu1 %v5232_v45 }
0x102d   :  { %4078 = vmatmul.mubr.msk.bf16.vlgmr.msra.gmra.mrb[28].mxu1 %vm636_vm0, %v2238_v59 }
0x102e   :  { %4083 = vmatprep.mubr.msk.bf16.mxu1 %vm5233_vm2, %v5232_v45 }
0x10f8   :  { %v5923_v60 = vpop.f32.mrb[24].mxu1 }
0x10f9   :  { %v4073_v61 = vpop.f32.mrb[25].mxu1 }
0x10fa   :  { %v2233_v62 = vpop.f32.mrb[26].mxu1 }
0x10fb   :  { %v4074_v63 = vpop.f32.mrb[27].mxu1  ;;  %v4414_v62 = vld [vmem:[%s6143_s11 + $0x20] ss:$8 sps:$4 sm:$0xff]  }
0x10fc   :  { %v4416_v63 = vld [vmem:[%s6143_s11 + $0x24] ss:$8 sps:$4 sm:$0xff]  }
0x1100   :  { %v2282_v1 = vpop.f32.mrb[28].mxu1 }
0x1101   :  { %v2288_v2 = vsel %vm5900_vm11, %v2282_v1, -1e+09  ;;  %v4079_v3 = vpop.f32.mrb[29].mxu1  ;;  %v4419_v1 = vld [vmem:[%s6143_s11 + $0x34] ss:$8 sps:$4 sm:$0xff]  }
0x1102   :  { %v2285_v4 = vpop.f32.mrb[30].mxu1  ;;  %v2289_v5 = vsel %vm2175_vm10, %v2288_v2, -inf  ;;  %v4425_v3 = vld [vmem:[%s6143_s11 + $0x54] ss:$8 sps:$4 sm:$0xff]  }
0x1103   :  { %2290 = vmax.xlane.f32.xlu0 %v2289_v5  ;;  %v4080_v6 = vpop.f32.mrb[31].mxu1  ;;  %v4423_v4 = vld [vmem:[%s6143_s11 + $0x50] ss:$8 sps:$4 sm:$0xff]   ;;  %v4428_v5 = vld [vmem:[%s6143_s11 + $0x64] ss:$8 sps:$4 sm:$0xff]  }
0x1104   :  { %v4426_v6 = vld [vmem:[%s6143_s11 + $0x60] ss:$8 sps:$4 sm:$0xff]  }
0x1119   :  { %2302 = vrot.lane.b32.xlu0 %v2188_v49, %s5213_s9 }
0x1138   :  { %1784 = vadd.xlane.f32.xlu0 %v1783_v9  ;;  %v4432_v9 = vld [vmem:[#allocation24] sm:$0xff]  }
0x1190   :  { %v2291_v10 = vpop.xlane.xlu0 %2290 }
0x1191   :  { %v2292_v11 = vsub.f32 %v2288_v2, %v2291_v10  ;;  %v4417_v2 = vld [vmem:[%s6143_s11 + $0x30] ss:$8 sps:$4 sm:$0xff]   ;;  %v4433_v10 = vld [vmem:[#allocation24 + $0x8] sm:$0xff]  }
0x1193   :  { %v2293_v12 = vmul.f32 1.442695, %v2292_v11 }
0x1194   :  { %v2303_v13 = vpop.permute.xlu0 %2302 }
0x1195   :  { %4534 = vpow2.f32 %v2293_v12  ;;  %v2308_v17 = vsel %vm2192_vm12, %v2303_v13, 0 }
0x1196   :  { %4082 = vmatpush3.bf16.msra.mxu1 %v2308_v17 }
0x1197   :  { %4107 = vmatprep.subr.bf16.mxu1 %v5232_v45 }
0x119f   :  { %v4535_v24 = vpop.eup %4534 }
0x11a0   :  { %v2295_v22 = vsel %vm2175_vm10, %v4535_v24, 0.0 }
0x11a1   :  { %2296 = vadd.xlane.f32.xlu1 %v2295_v22 }
0x11c5   :  { %v1785_v39 = vpop.xlane.xlu0 %1784 }
0x11c6   :  { %v1787_v41 = vmul.f32 0.0078125, %v1785_v39 }
0x11c8   :  { %v5946_v42 = vsub.f32 %v1778_v8, %v1787_v41  ;;  %v4429_v8 = vld [vmem:[%s6143_s11 + $0x70] ss:$8 sps:$4 sm:$0xff]  }
0x11c9   :  { %v4436_v41 = vld [vmem:[#allocation24 + $0x20] sm:$0xff]  }
0x11ca   :  { %v1791_v43 = vmul.f32 %v5946_v42, %v5946_v42 }
0x11cc   :  { %v1794_v46 = vsel %vm685_vm1, %v1791_v43, 0.0  ;;  %v4438_v43 = vld [vmem:[#allocation24 + $0x30] sm:$0xff]  }
0x122e   :  { %v2297_v25 = vpop.xlane.xlu1 %2296 }
0x122f   :  { %4536 = vrcp.f32 %v2297_v25 }
0x1239   :  { %v4537_v20 = vpop.eup %4536 }
0x123a   :  { %v2299_v27 = vmul.f32 %v4537_v20, %v4535_v24 }
0x123c   :  { %v2300_v28 = vpack.c.bf16 %v2299_v27, %v2299_v27 }
0x123e   :  { %4084 = vmatmul.mubr.msk.bf16.vlgmr.msra.gmra.mrb[32].mxu1 %vm2175_vm10, %v2300_v28 }
0x123f   :  { %4123 = vmatprep.mubr.msk.bf16.mxu1 %vm5233_vm2, %v5232_v45  ;;  %4108 = vmatpush3.bf16.msra.mxu1 %v4432_v9 }
0x1240   :  { %4109 = vmatprep.subr.bf16.mxu1 %v5232_v45 }
0x1243   :  { %4110 = vmatpush3.bf16.msra.mxu1 %v4433_v10 }
0x1244   :  { %4111 = vmatprep.subr.bf16.mxu1 %v5232_v45 }
0x1247   :  { %4112 = vmatpush3.bf16.msra.mxu1 %v4434_v34 }
0x1248   :  { %4113 = vmatprep.subr.bf16.mxu1 %v5232_v45 }
0x1311   :  { %v2344_v21 = vpop.f32.mrb[32].mxu1 }
0x1312   :  { %2351 = vrot.lane.b32.xlu1 %v2344_v21, %s5213_s9  ;;  %v4085_v14 = vpop.f32.mrb[33].mxu1 }
0x1313   :  { %v2347_v37 = vpop.f32.mrb[34].mxu1 }
0x1314   :  { %v4086_v38 = vpop.f32.mrb[35].mxu1 }
0x1315   :  { %v4435_v38 = vld [vmem:[#allocation24 + $0x18] sm:$0xff]  }
0x1316   :  { %4114 = vmatpush3.bf16.msra.mxu1 %v4435_v38 }
0x1317   :  { %4115 = vmatprep.subr.bf16.mxu1 %v5232_v45 }
0x131a   :  { %4116 = vmatpush3.bf16.msra.mxu1 %v4436_v41 }
0x131b   :  { %4117 = vmatprep.subr.bf16.mxu1 %v5232_v45 }
0x1336   :  { %1781 = vadd.xlane.f32.xlu1 %v5896_v47 }
0x133a   :  { %1795 = vadd.xlane.f32.xlu1 %v1794_v46  ;;  %v4439_v46 = vld [vmem:[#allocation24 + $0x38] sm:$0xff]  }
0x1384   :  { %v2352_v48 = vpop.permute.xlu1 %2351 }
0x1385   :  { %v2354_v49 = vsel %vm636_vm0, %v5923_v60, %v2352_v48 }
0x1386   :  { %v2355_v50 = vpack.c.bf16 %v2354_v49, %v2354_v49 }
0x1388   :  { %4104 = vmatmul.mubr.bf16.vlgmr.msra.gmra.mrb[28].mxu0 %v2355_v50 }
0x1389   :  { %2732 = vmatprep.mubr.bf16.mxu0 %v5231_v0  ;;  %2701 = vmatpush1.bf16.msra.mxu0 %v4408_v51 }
0x138a   :  { %2702 = vmatprep.subr.bf16.mxu0 %v4413_v53 }
0x138d   :  { %2703 = vmatpush1.bf16.msra.mxu0 %v4411_v54  ;;  %v3765_v54 = vld [vmem:[#allocation22] ss:$0 sm:$0xff] }
0x138e   :  { %2704 = vmatprep.subr.bf16.mxu0 %v4416_v63 }
0x1391   :  { %2705 = vmatpush1.bf16.msra.mxu0 %v4414_v62 }
0x1392   :  { %2706 = vmatprep.subr.bf16.mxu0 %v4419_v1 }
0x1395   :  { %2707 = vmatpush1.bf16.msra.mxu0 %v4417_v2 }
0x13c3   :  { %v1782_v55 = vpop.xlane.xlu1 %1781 }
0x13c4   :  { %v1786_v36 = vmul.f32 0.0078125, %v1782_v55 }
0x13c6   :  { %v1788_v58 = vsub.f32 %v5896_v47, %v1786_v36  ;;  %v4420_v47 = vld [vmem:[%s6143_s11 + $0x40] ss:$8 sps:$4 sm:$0xff]  }
0x13c7   :  { %v1796_v11 = vpop.xlane.xlu1 %1795 }
0x13c8   :  { %v1790_v61 = vmul.f32 %v1788_v58, %v1788_v58  ;;  %v1798_v12 = vmul.f32 0.0078125, %v1796_v11 }
0x13ca   :  { %v1800_v13 = vadd.f32 1e-06, %v1798_v12 }
0x13cc   :  { %4538 = vrsqrt.f32 %v1800_v13  ;;  %v4558_v13 = vld [vmem:[%s6133_s14] ss:$0 sm:$0xff] }
0x13cd   :  { %vm526_vm13 = vcmp.eq.s32.totalorder %v5893_v33, %v4558_v13 }
0x13d6   :  { %v4539_v29 = vpop.eup %4538 }
0x13d7   :  { %v1804_v23 = vmul.f32 %v4539_v29, %v5946_v42  ;;  %v4437_v42 = vld [vmem:[#allocation24 + $0x28] sm:$0xff]  }
0x13d8   :  { %4118 = vmatpush3.bf16.msra.mxu1 %v4437_v42 }
0x13d9   :  { %v1812_v32 = vmul.f32 %v3723_v19, %v1804_v23  ;;  %4119 = vmatprep.subr.bf16.mxu1 %v5232_v45 }
0x13db   :  { %v1820_v37 = vadd.f32 %v3724_v35, %v1812_v32 }
0x13dc   :  { %4120 = vmatpush3.bf16.msra.mxu1 %v4438_v43 }
0x13dd   :  { %4121 = vmatprep.subr.bf16.mxu1 %v5232_v45 }
0x13e0   :  { %4122 = vmatpush3.bf16.msra.mxu1 %v4439_v46 }
0x13e1   :  { %4127 = vmatprep.subr.bf16.mxu1 %v5232_v45 }
0x145b   :  { %v2444_v40 = vpop.f32.mrb[28].mxu0 }
0x145c   :  { %v2445_v44 = vadd.f32 %v3755_v15, %v2444_v40  ;;  %v4105_v56 = vpop.f32.mrb[29].mxu0  ;;  %v2608_v40 = vld [vmem:[#allocation27] sm:$0x3] }
0x145d   :  { %v2447_v57 = vpop.f32.mrb[30].mxu0 }
0x145e   :  { %v5961_v59 = vadd.f32 %v2445_v44, %v5781_v26  ;;  %v4106_v60 = vpop.f32.mrb[31].mxu0  ;;  %v4422_v26 = vld [vmem:[%s6143_s11 + $0x44] ss:$8 sps:$4 sm:$0xff]   ;;  %v2613_v44 = vrot.slane %v2608_v40, %v5705_v16  ;;  %v2617_v57 = vrot.slane %v2608_v40, %v5709_v18 }
0x145f   :  { %2708 = vmatprep.subr.bf16.mxu0 %v4422_v26 }
0x1460   :  { %2453 = vadd.xlane.f32.xlu0 %v5961_v59  ;;  %2709 = vmatpush1.bf16.msra.mxu0 %v4420_v47 }
0x1461   :  { %2710 = vmatprep.subr.bf16.mxu0 %v4425_v3 }
0x1464   :  { %1792 = vadd.xlane.f32.xlu0 %v1790_v61  ;;  %2711 = vmatpush1.bf16.msra.mxu0 %v4423_v4  ;;  %v3766_v4 = vld [vmem:[#allocation25] ss:$0 sm:$0xff] }
0x1465   :  { %2712 = vmatprep.subr.bf16.mxu0 %v4428_v5 }
0x1468   :  { %2713 = vmatpush1.bf16.msra.mxu0 %v4426_v6 }
0x1469   :  { %2714 = vmatprep.subr.bf16.mxu0 %v4431_v7 }
0x146c   :  { %2715 = vmatpush1.bf16.msra.mxu0 %v4429_v8 }
0x146d   :  { %4151 = vmatprep.subr.bf16.mxu0 %v5232_v45 }
0x14ed   :  { %v2454_v17 = vpop.xlane.xlu0 %2453 }
0x14ee   :  { %v2455_v24 = vmul.f32 0.0078125, %v2454_v17 }
0x14f0   :  { %v2456_v22 = vsub.f32 %v5961_v59, %v2455_v24 }
0x14f1   :  { %v1793_v25 = vpop.xlane.xlu0 %1792 }
0x14f2   :  { %v1797_v20 = vmul.f32 0.0078125, %v1793_v25  ;;  %v2457_v27 = vmul.f32 %v2456_v22, %v2456_v22 }
0x14f4   :  { %v1799_v28 = vadd.f32 1e-06, %v1797_v20  ;;  %2458 = vadd.xlane.f32.xlu0 %v2457_v27 }
0x14f6   :  { %4540 = vrsqrt.f32 %v1799_v28 }
0x1500   :  { %v4541_v30 = vpop.eup %4540 }
0x1501   :  { %v1803_v31 = vmul.f32 %v4541_v30, %v1788_v58 }
0x1503   :  { %v1811_v21 = vmul.f32 %v3723_v19, %v1803_v31 }
0x1505   :  { %v1819_v14 = vadd.f32 %v3724_v35, %v1811_v21 }
0x1507   :  { %v2591_v39 = vpack.c.bf16 %v1820_v37, %v1819_v14 }
0x1509   :  { %2733 = vmatmul.mubr.bf16.vlgmr.msra.gmra.mrb[32].mxu0 %v2591_v39 }
0x150a   :  { %4167 = vmatprep.mubr.msk.bf16.mxu0 %vm5233_vm2, %v5232_v45 }
0x1581   :  { %v2459_v48 = vpop.xlane.xlu0 %2458 }
0x1582   :  { %v2460_v49 = vmul.f32 0.0078125, %v2459_v48 }
0x1584   :  { %v2461_v50 = vadd.f32 1e-06, %v2460_v49 }
0x1586   :  { %4542 = vrsqrt.f32 %v2461_v50 }
0x1590   :  { %v4543_v51 = vpop.eup %4542 }
0x1591   :  { %v2463_v53 = vmul.f32 %v4543_v51, %v2456_v22 }
0x1593   :  { %v2470_v55 = vmul.f32 %v3764_v52, %v2463_v53 }
0x1595   :  { %v2477_v15 = vadd.f32 %v3765_v54, %v2470_v55 }
0x1597   :  { %v2478_v36 = vpack.c.bf16 %v2477_v15, %v2477_v15 }
0x1599   :  { %4124 = vmatmul.mubr.bf16.vlgmr.msra.gmra.mrb[36].mxu1 %v2478_v36 }
0x159a   :  { %4129 = vmatprep.mubr.msk.bf16.mxu1 %vm5233_vm2, %v5232_v45 }
0x15dc   :  { %v2734_v56 = vpop.f32.mrb[32].mxu0 }
0x15dd   :  { %v2736_v58 = vpop.f32.mrb[33].mxu0  ;;  %v2735_v61 = vadd.f32 %v2734_v56, %v2613_v44 }
0x15de   :  { %v2738_v60 = vpop.f32.mrb[34].mxu0  ;;  %v2737_v1 = vadd.f32 %v2736_v58, %v2617_v57  ;;  %v4440_v58 = vld [vmem:[#allocation28] sm:$0xff]  }
0x15df   :  { %v2739_v62 = vadd.f32 %v2738_v60, %v2613_v44  ;;  %v2740_v63 = vpop.f32.mrb[35].mxu0  ;;  %4152 = vmatpush3.bf16.msra.mxu0 %v4440_v58  ;;  %v4441_v60 = vld [vmem:[#allocation28 + $0x8] sm:$0xff]  }
0x15e0   :  { %v2741_v2 = vadd.f32 %v2740_v63, %v2617_v57  ;;  %4153 = vmatprep.subr.bf16.mxu0 %v5232_v45  ;;  %v4444_v63 = vld [vmem:[#allocation28 + $0x20] sm:$0xff]   ;;  %v4481_v58 = vld [vmem:[#allocation36 + $0x20] sm:$0xff]  }
0x15e1   :  { %v2761_v26 = vpack.c.bf16 %v2739_v62, %v2735_v61  ;;  %v4442_v61 = vld [vmem:[#allocation28 + $0x10] sm:$0xff]   ;;  %v4443_v62 = vld [vmem:[#allocation28 + $0x18] sm:$0xff]  }
0x15e2   :  { %v2821_v47 = vpack.c.bf16 %v2741_v2, %v2737_v1  ;;  %v4445_v1 = vld [vmem:[#allocation28 + $0x28] sm:$0xff]   ;;  %v4447_v2 = vld [vmem:[#allocation28 + $0x38] sm:$0xff]  }
0x15e3   :  { %v2766_v3 = vsel %vm636_vm0, %v2761_v26, 0  ;;  %4154 = vmatpush3.bf16.msra.mxu0 %v4441_v60  ;;  %v4482_v60 = vld [vmem:[#allocation36 + $0x68] sm:$0xff]  }
0x15e4   :  { %4128 = vmatpush3.bf16.xpose.msra.mxu1 %v2766_v3  ;;  %v2826_v12 = vsel %vm1086_vm3, %v2821_v47, 0  ;;  %4155 = vmatprep.subr.bf16.mxu0 %v5232_v45 }
0x15e5   :  { %4133 = vmatprep.subr.bf16.mxu1 %v5232_v45 }
0x15e7   :  { %4156 = vmatpush3.bf16.msra.mxu0 %v4442_v61  ;;  %v4483_v61 = vld [vmem:[#allocation36 + $0x28] sm:$0xff]  }
0x15e8   :  { %4157 = vmatprep.subr.bf16.mxu0 %v5232_v45 }
0x15eb   :  { %4158 = vmatpush3.bf16.msra.mxu0 %v4443_v62  ;;  %v4484_v62 = vld [vmem:[#allocation36 + $0x70] sm:$0xff]  }
0x15ec   :  { %4159 = vmatprep.subr.bf16.mxu0 %v5232_v45 }
0x15ef   :  { %4160 = vmatpush3.bf16.msra.mxu0 %v4444_v63  ;;  %v4485_v63 = vld [vmem:[#allocation36 + $0x30] sm:$0xff]  }
0x15f0   :  { %4161 = vmatprep.subr.bf16.mxu0 %v5232_v45 }
0x15f3   :  { %4162 = vmatpush3.bf16.msra.mxu0 %v4445_v1  ;;  %v4486_v1 = vld [vmem:[#allocation36 + $0x78] sm:$0xff]  }
0x15f4   :  { %4163 = vmatprep.subr.bf16.mxu0 %v5232_v45 }
0x166c   :  { %v2584_v5 = vpop.f32.mrb[36].mxu1 }
0x166d   :  { %v2585_v6 = vadd.f32 %v3766_v4, %v2584_v5  ;;  %v4125_v7 = vpop.f32.mrb[37].mxu1 }
0x166e   :  { %v2587_v8 = vpop.f32.mrb[38].mxu1 }
0x166f   :  { %v2590_v9 = vmul.f32 0.125, %v2585_v6  ;;  %v4126_v10 = vpop.f32.mrb[39].mxu1  ;;  %v3795_v8 = vld [vmem:[#allocation30] ss:$0 sm:$0xff] }
0x1671   :  { %v2760_v11 = vpack.c.bf16 %v2590_v9, %v2590_v9 }
0x1673   :  { %4130 = vmatmul.mubr.msk.bf16.vlgmr.msra.gmra.mrb[40].mxu1 %vm636_vm0, %v2760_v11 }
0x1674   :  { %4134 = vmatpush3.bf16.msra.mxu1 %v2826_v12  ;;  %4135 = vmatprep.mubr.msk.bf16.mxu1 %vm5233_vm2, %v5232_v45 }
0x1675   :  { %4139 = vmatprep.subr.bf16.mxu1 %v5232_v45 }
0x1746   :  { %v2802_v17 = vpop.f32.mrb[40].mxu1 }
0x1747   :  { %v2808_v24 = vsel %vm526_vm13, %v2802_v17, -1e+09  ;;  %v4131_v22 = vpop.f32.mrb[41].mxu1 }
0x1748   :  { %v2805_v25 = vpop.f32.mrb[42].mxu1  ;;  %v2809_v20 = vsel %vm1057_vm5, %v2808_v24, -inf  ;;  %v4450_v22 = vld [vmem:[%s6144_s15 + $0x4] ss:$8 sps:$4 sm:$0xff]  }
0x1749   :  { %2810 = vmax.xlane.f32.xlu1 %v2809_v20  ;;  %v4132_v27 = vpop.f32.mrb[43].mxu1  ;;  %v4453_v25 = vld [vmem:[%s6144_s15 + $0x14] ss:$8 sps:$4 sm:$0xff]   ;;  %v4451_v20 = vld [vmem:[%s6144_s15 + $0x10] ss:$8 sps:$4 sm:$0xff]  }
0x174a   :  { %v4456_v27 = vld [vmem:[%s6144_s15 + $0x24] ss:$8 sps:$4 sm:$0xff]  }
0x175a   :  { %2872 = vrot.lane.b32.xlu1 %v2761_v26, %s5213_s9 }
0x17d6   :  { %v2811_v28 = vpop.xlane.xlu1 %2810 }
0x17d7   :  { %v2812_v29 = vsub.f32 %v2808_v24, %v2811_v28  ;;  %v4448_v24 = vld [vmem:[%s6144_s15] ss:$8 sps:$4 sm:$0xff]  }
0x17d8   :  { %v4454_v28 = vld [vmem:[%s6144_s15 + $0x20] ss:$8 sps:$4 sm:$0xff]  }
0x17d9   :  { %v2813_v23 = vmul.f32 1.442695, %v2812_v29 }
0x17da   :  { %v2873_v35 = vpop.permute.xlu1 %2872 }
0x17db   :  { %4544 = vpow2.f32 %v2813_v23  ;;  %v2878_v14 = vsel %vm636_vm0, %v2873_v35, 0  ;;  %v4465_v35 = vld [vmem:[%s6144_s15 + $0x54] ss:$8 sps:$4 sm:$0xff]  }
0x17e5   :  { %v4545_v19 = vpop.eup %4544 }
0x17e6   :  { %v2815_v30 = vsel %vm1057_vm5, %v4545_v19, 0.0 }
0x17e7   :  { %2816 = vadd.xlane.f32.xlu0 %v2815_v30  ;;  %v4459_v30 = vld [vmem:[%s6144_s15 + $0x34] ss:$8 sps:$4 sm:$0xff]  }
0x17fd   :  { %2869 = vrot.lane.b32.xlu0 %v2760_v11, %s5213_s9 }
0x1874   :  { %v2817_v31 = vpop.xlane.xlu0 %2816 }
0x1875   :  { %4546 = vrcp.f32 %v2817_v31  ;;  %v4457_v31 = vld [vmem:[%s6144_s15 + $0x30] ss:$8 sps:$4 sm:$0xff]  }
0x1878   :  { %v2870_v37 = vpop.permute.xlu0 %2869 }
0x187f   :  { %v4547_v32 = vpop.eup %4546 }
0x1880   :  { %v2819_v34 = vmul.f32 %v4547_v32, %v4545_v19  ;;  %v4462_v32 = vld [vmem:[%s6144_s15 + $0x44] ss:$8 sps:$4 sm:$0xff]  }
0x1882   :  { %v2820_v21 = vpack.c.bf16 %v2819_v34, %v2819_v34  ;;  %v4460_v34 = vld [vmem:[%s6144_s15 + $0x40] ss:$8 sps:$4 sm:$0xff]  }
0x1884   :  { %4136 = vmatmul.mubr.msk.bf16.vlgmr.msra.gmra.mrb[44].mxu1 %vm1057_vm5, %v2820_v21  ;;  %v4463_v21 = vld [vmem:[%s6144_s15 + $0x50] ss:$8 sps:$4 sm:$0xff]  }
0x1885   :  { %4140 = vmatpush3.bf16.xpose.msra.mxu1 %v2878_v14  ;;  %4141 = vmatprep.mubr.msk.bf16.mxu1 %vm5233_vm2, %v5232_v45  ;;  %v4468_v14 = vld [vmem:[%s6144_s15 + $0x64] ss:$8 sps:$4 sm:$0xff]  }
0x1886   :  { %4145 = vmatprep.subr.bf16.mxu1 %v5232_v45 }
0x188c   :  { %4142 = vmatmul.mubr.msk.bf16.vlgmr.msra.gmra.mrb[48].mxu1 %vm636_vm0, %v2870_v37  ;;  %v4466_v37 = vld [vmem:[%s6144_s15 + $0x60] ss:$8 sps:$4 sm:$0xff]  }
0x188d   :  { %4147 = vmatprep.mubr.msk.bf16.mxu1 %vm5233_vm2, %v5232_v45 }
0x1957   :  { %v2862_v38 = vpop.f32.mrb[44].mxu1 }
0x1958   :  { %v4137_v39 = vpop.f32.mrb[45].mxu1 }
0x1959   :  { %v2865_v41 = vpop.f32.mrb[46].mxu1  ;;  %v4469_v39 = vld [vmem:[%s6144_s15 + $0x70] ss:$8 sps:$4 sm:$0xff]  }
0x195a   :  { %v4138_v42 = vpop.f32.mrb[47].mxu1 }
0x195f   :  { %v2914_v43 = vpop.f32.mrb[48].mxu1 }
0x1960   :  { %v2920_v46 = vsel %vm526_vm13, %v2914_v43, -1e+09  ;;  %v4143_v48 = vpop.f32.mrb[49].mxu1 }
0x1961   :  { %v2917_v49 = vpop.f32.mrb[50].mxu1  ;;  %v2921_v50 = vsel %vm1057_vm5, %v2920_v46, -inf  ;;  %v3804_v48 = vld [vmem:[#allocation31] ss:$0 sm:$0xff] }
0x1962   :  { %2922 = vmax.xlane.f32.xlu1 %v2921_v50  ;;  %v4144_v51 = vpop.f32.mrb[51].mxu1  ;;  %v3805_v50 = vld [vmem:[#allocation33] ss:$0 sm:$0xff] }
0x1973   :  { %2934 = vrot.lane.b32.xlu1 %v2821_v47, %s5213_s9 }
0x19ef   :  { %v2923_v52 = vpop.xlane.xlu1 %2922 }
0x19f0   :  { %v2924_v53 = vsub.f32 %v2920_v46, %v2923_v52 }
0x19f2   :  { %v2925_v54 = vmul.f32 1.442695, %v2924_v53 }
0x19f3   :  { %v2935_v55 = vpop.permute.xlu1 %2934 }
0x19f4   :  { %4548 = vpow2.f32 %v2925_v54  ;;  %v2940_v15 = vsel %vm1086_vm3, %v2935_v55, 0  ;;  %v4472_v54 = vld [vmem:[#allocation36 + $0x40] sm:$0xff]  }
0x19f5   :  { %4146 = vmatpush3.bf16.msra.mxu1 %v2940_v15  ;;  %v4473_v55 = vld [vmem:[#allocation36] sm:$0xff]   ;;  %v4474_v15 = vld [vmem:[#allocation36 + $0x48] sm:$0xff]  }
0x19f6   :  { %3219 = vmatprep.subr.bf16.mxu1 %v4450_v22 }
0x19fe   :  { %v4549_v36 = vpop.eup %4548 }
0x19ff   :  { %v2927_v33 = vsel %vm1057_vm5, %v4549_v36, 0.0 }
0x1a00   :  { %2928 = vadd.xlane.f32.xlu0 %v2927_v33  ;;  %v4476_v33 = vld [vmem:[#allocation36 + $0x50] sm:$0xff]  }
0x1a8d   :  { %v2929_v40 = vpop.xlane.xlu0 %2928 }
0x1a8e   :  { %4550 = vrcp.f32 %v2929_v40  ;;  %v4477_v40 = vld [vmem:[#allocation36 + $0x10] sm:$0xff]  }
0x1a98   :  { %v4551_v44 = vpop.eup %4550 }
0x1a99   :  { %v2931_v56 = vmul.f32 %v4551_v44, %v4549_v36  ;;  %v4475_v36 = vld [vmem:[#allocation36 + $0x8] sm:$0xff]   ;;  %v4478_v44 = vld [vmem:[#allocation36 + $0x58] sm:$0xff]  }
0x1a9b   :  { %v2932_v57 = vpack.c.bf16 %v2931_v56, %v2931_v56  ;;  %v4479_v56 = vld [vmem:[#allocation36 + $0x18] sm:$0xff]  }
0x1a9d   :  { %4148 = vmatmul.mubr.msk.bf16.vlgmr.msra.gmra.mrb[52].mxu1 %vm1057_vm5, %v2932_v57  ;;  %v4480_v57 = vld [vmem:[#allocation36 + $0x60] sm:$0xff]  }
0x1a9e   :  { %3251 = vmatprep.mubr.bf16.mxu1 %v5231_v0  ;;  %v4446_v0 = vld [vmem:[#allocation28 + $0x30] sm:$0xff]   ;;  %3220 = vmatpush1.bf16.msra.mxu1 %v4448_v24 }
0x1a9f   :  { %4164 = vmatpush3.bf16.msra.mxu0 %v4446_v0  ;;  %3221 = vmatprep.subr.bf16.mxu1 %v4453_v25  ;;  %v4487_v0 = vld [vmem:[#allocation36 + $0x38] sm:$0xff]  }
0x1aa0   :  { %4165 = vmatprep.subr.bf16.mxu0 %v5232_v45 }
0x1aa2   :  { %3222 = vmatpush1.bf16.msra.mxu1 %v4451_v20 }
0x1aa3   :  { %4166 = vmatpush3.bf16.msra.mxu0 %v4447_v2  ;;  %3223 = vmatprep.subr.bf16.mxu1 %v4456_v27  ;;  %v4488_v2 = vld [vmem:[#allocation39] sm:$0xff]  }
0x1aa4   :  { %3948 = vmatprep.subr.bf16.mxu0 %v4472_v54  ;;  %v3839_v54 = vld [vmem:[#allocation40] ss:$0 sm:$0xff] }
0x1aa6   :  { %3224 = vmatpush1.bf16.msra.mxu1 %v4454_v28 }
0x1aa7   :  { %3225 = vmatprep.subr.bf16.mxu1 %v4459_v30 }
0x1aaa   :  { %3226 = vmatpush1.bf16.msra.mxu1 %v4457_v31 }
0x1aab   :  { %3227 = vmatprep.subr.bf16.mxu1 %v4462_v32 }
0x1aae   :  { %3228 = vmatpush1.bf16.msra.mxu1 %v4460_v34 }
0x1aaf   :  { %3229 = vmatprep.subr.bf16.mxu1 %v4465_v35 }
0x1ab2   :  { %3230 = vmatpush1.bf16.msra.mxu1 %v4463_v21 }
0x1ab3   :  { %3231 = vmatprep.subr.bf16.mxu1 %v4468_v14 }
0x1ab6   :  { %3232 = vmatpush1.bf16.msra.mxu1 %v4466_v37 }
0x1b70   :  { %v2976_v26 = vpop.f32.mrb[52].mxu1 }
0x1b71   :  { %2983 = vrot.lane.b32.xlu0 %v2976_v26, %s5213_s9  ;;  %v4149_v47 = vpop.f32.mrb[53].mxu1  ;;  %v4489_v26 = vld [vmem:[#allocation39 + $0x8] sm:$0xff]  }
0x1b72   :  { %v2979_v3 = vpop.f32.mrb[54].mxu1  ;;  %v4490_v47 = vld [vmem:[#allocation39 + $0x10] sm:$0xff]  }
0x1b73   :  { %v4150_v4 = vpop.f32.mrb[55].mxu1  ;;  %v4491_v3 = vld [vmem:[#allocation39 + $0x18] sm:$0xff]  }
0x1b74   :  { %v4492_v4 = vld [vmem:[#allocation39 + $0x20] sm:$0xff]  }
0x1be3   :  { %v2984_v5 = vpop.permute.xlu0 %2983 }
0x1be4   :  { %v2986_v6 = vsel %vm636_vm0, %v2862_v38, %v2984_v5  ;;  %v4471_v38 = vld [vmem:[%s6144_s15 + $0x74] ss:$8 sps:$4 sm:$0xff]  }
0x1be5   :  { %v2987_v7 = vpack.c.bf16 %v2986_v6, %v2986_v6  ;;  %3233 = vmatprep.subr.bf16.mxu1 %v4471_v38  ;;  %v4493_v5 = vld [vmem:[#allocation39 + $0x28] sm:$0xff]   ;;  %v3127_v6 = vld [vmem:[#allocation34] sm:$0x3] }
0x1be6   :  { %3234 = vmatpush1.bf16.msra.mxu1 %v4469_v39  ;;  %v4494_v39 = vld [vmem:[#allocation39 + $0x30] sm:$0xff]  }
0x1be7   :  { %4168 = vmatmul.mubr.bf16.vlgmr.msra.gmra.mrb[36].mxu0 %v2987_v7  ;;  %4171 = vmatprep.subr.bf16.mxu1 %v5232_v45  ;;  %v3132_v7 = vrot.slane %v3127_v6, %v5705_v16 }
0x1be8   :  { %3949 = vmatpush3.bf16.msra.mxu0 %v4473_v55 }
0x1be9   :  { %3950 = vmatprep.subr.bf16.mxu0 %v4474_v15 }
0x1bec   :  { %3951 = vmatpush3.bf16.msra.mxu0 %v4475_v36 }
0x1bed   :  { %3952 = vmatprep.subr.bf16.mxu0 %v4476_v33 }
0x1bf0   :  { %3953 = vmatpush3.bf16.msra.mxu0 %v4477_v40 }
0x1bf1   :  { %3954 = vmatprep.subr.bf16.mxu0 %v4478_v44 }
0x1bf4   :  { %3955 = vmatpush3.bf16.msra.mxu0 %v4479_v56 }
0x1bf5   :  { %3956 = vmatprep.subr.bf16.mxu0 %v4480_v57 }
0x1bf8   :  { %3957 = vmatpush3.bf16.msra.mxu0 %v4481_v58 }
0x1bf9   :  { %3958 = vmatprep.subr.bf16.mxu0 %v4482_v60 }
0x1bfc   :  { %3959 = vmatpush3.bf16.msra.mxu0 %v4483_v61 }
0x1bfd   :  { %3960 = vmatprep.subr.bf16.mxu0 %v4484_v62 }
0x1c00   :  { %3961 = vmatpush3.bf16.msra.mxu0 %v4485_v63 }
0x1c01   :  { %3962 = vmatprep.subr.bf16.mxu0 %v4486_v1 }
0x1c04   :  { %3963 = vmatpush3.bf16.msra.mxu0 %v4487_v0 }
0x1cba   :  { %v3076_v9 = vpop.f32.mrb[36].mxu0 }
0x1cbb   :  { %v3077_v10 = vadd.f32 %v3795_v8, %v3076_v9  ;;  %v4169_v11 = vpop.f32.mrb[37].mxu0  ;;  %v3136_v8 = vrot.slane %v3127_v6, %v5709_v18 }
0x1cbc   :  { %v3079_v12 = vpop.f32.mrb[38].mxu0 }
0x1cbd   :  { %v6034_v13 = vadd.f32 %v3077_v10, %v5961_v59  ;;  %v4170_v17 = vpop.f32.mrb[39].mxu0 }
0x1cbf   :  { %3085 = vadd.xlane.f32.xlu1 %v6034_v13 }
0x1d4c   :  { %v3086_v59 = vpop.xlane.xlu1 %3085 }
0x1d4d   :  { %v3087_v29 = vmul.f32 0.0078125, %v3086_v59 }
0x1d4f   :  { %v3088_v23 = vsub.f32 %v6034_v13, %v3087_v29 }
0x1d51   :  { %v3089_v19 = vmul.f32 %v3088_v23, %v3088_v23 }
0x1d53   :  { %3090 = vadd.xlane.f32.xlu0 %v3089_v19 }
0x1de0   :  { %v3091_v41 = vpop.xlane.xlu0 %3090 }
0x1de1   :  { %v3092_v42 = vmul.f32 0.0078125, %v3091_v41  ;;  %v4495_v41 = vld [vmem:[#allocation39 + $0x38] sm:$0xff]  }
0x1de3   :  { %v3093_v43 = vadd.f32 1e-06, %v3092_v42 }
0x1de5   :  { %4552 = vrsqrt.f32 %v3093_v43 }
0x1def   :  { %v4553_v46 = vpop.eup %4552 }
0x1df0   :  { %v3095_v49 = vmul.f32 %v4553_v46, %v3088_v23 }
0x1df2   :  { %v3102_v51 = vmul.f32 %v3804_v48, %v3095_v49  ;;  %v3838_v49 = vld [vmem:[#allocation37] ss:$0 sm:$0xff] }
0x1df4   :  { %v3109_v52 = vadd.f32 %v3805_v50, %v3102_v51 }
0x1df6   :  { %v3110_v53 = vpack.c.bf16 %v3109_v52, %v3109_v52 }
0x1df8   :  { %3252 = vmatmul.mubr.bf16.vlgmr.msra.gmra.mrb[56].mxu1 %v3110_v53 }
0x1df9   :  { %4187 = vmatprep.mubr.msk.bf16.mxu1 %vm5233_vm2, %v5232_v45  ;;  %4172 = vmatpush3.bf16.msra.mxu1 %v4488_v2 }
0x1dfa   :  { %4173 = vmatprep.subr.bf16.mxu1 %v5232_v45 }
0x1dfd   :  { %4174 = vmatpush3.bf16.msra.mxu1 %v4489_v26 }
0x1dfe   :  { %4175 = vmatprep.subr.bf16.mxu1 %v5232_v45 }
0x1e01   :  { %4176 = vmatpush3.bf16.msra.mxu1 %v4490_v47 }
0x1e02   :  { %4177 = vmatprep.subr.bf16.mxu1 %v5232_v45 }
0x1e05   :  { %4178 = vmatpush3.bf16.msra.mxu1 %v4491_v3 }
0x1e06   :  { %4179 = vmatprep.subr.bf16.mxu1 %v5232_v45 }
0x1e09   :  { %4180 = vmatpush3.bf16.msra.mxu1 %v4492_v4 }
0x1e0a   :  { %4181 = vmatprep.subr.bf16.mxu1 %v5232_v45 }
0x1e0d   :  { %4182 = vmatpush3.bf16.msra.mxu1 %v4493_v5 }
0x1e0e   :  { %4183 = vmatprep.subr.bf16.mxu1 %v5232_v45 }
0x1e11   :  { %4184 = vmatpush3.bf16.msra.mxu1 %v4494_v39 }
0x1e12   :  { %4185 = vmatprep.subr.bf16.mxu1 %v5232_v45 }
0x1e15   :  { %4186 = vmatpush3.bf16.msra.mxu1 %v4495_v41 }
0x1ecb   :  { %v3253_v9 = vpop.f32.mrb[56].mxu1 }
0x1ecc   :  { %v3254_v10 = vadd.f32 %v3253_v9, %v3132_v7  ;;  %v3255_v11 = vpop.f32.mrb[57].mxu1 }
0x1ecd   :  { %v3256_v12 = vadd.f32 %v3255_v11, %v3136_v8  ;;  %v3257_v17 = vpop.f32.mrb[58].mxu1 }
0x1ece   :  { %v3262_v24 = vmul.f32 0.044715, %v3254_v10  ;;  %v3258_v22 = vpop.f32.mrb[59].mxu1  ;;  %v3260_v31 = vmul.f32 0.5, %v3254_v10 }
0x1ecf   :  { %v3263_v25 = vmul.f32 0.044715, %v3256_v12  ;;  %v3261_v34 = vmul.f32 0.5, %v3256_v12 }
0x1ed0   :  { %v3264_v20 = vmul.f32 %v3262_v24, %v3254_v10 }
0x1ed1   :  { %v3265_v27 = vmul.f32 %v3263_v25, %v3256_v12 }
0x1ed2   :  { %v3266_v28 = vmul.f32 %v3264_v20, %v3254_v10 }
0x1ed3   :  { %v3267_v59 = vmul.f32 %v3265_v27, %v3256_v12 }
0x1ed4   :  { %v3268_v29 = vadd.f32 %v3266_v28, %v3254_v10 }
0x1ed5   :  { %v3269_v23 = vadd.f32 %v3267_v59, %v3256_v12 }
0x1ed6   :  { %v3270_v19 = vmul.f32 0.7978846, %v3268_v29 }
0x1ed7   :  { %v3271_v30 = vmul.f32 0.7978846, %v3269_v23 }
0x1ed8   :  { %4554 = vtanh.f32 %v3270_v19 }
0x1ed9   :  { %4556 = vtanh.f32 %v3271_v30 }
0x1ee2   :  { %v4555_v16 = vpop.eup %4554 }
0x1ee3   :  { %v4557_v18 = vpop.eup %4556  ;;  %v3274_v32 = vadd.f32 1.0, %v4555_v16 }
0x1ee4   :  { %v3275_v35 = vadd.f32 1.0, %v4557_v18 }
0x1ee5   :  { %v3276_v21 = vmul.f32 %v3274_v32, %v3260_v31 }
0x1ee6   :  { %v3277_v14 = vmul.f32 %v3275_v35, %v3261_v34 }
0x1ee7   :  { %v3278_v38 = vpack.c.bf16 %v3276_v21, %v3276_v21 }
0x1ee8   :  { %v3279_v37 = vpack.c.bf16 %v3277_v14, %v3277_v14 }
0x1eea   :  { %3440 = vmatprep.mubr.bf16.mxu0 %v3279_v37 }
0x1eeb   :  { %3441 = vmatmul.mubr.bf16.vlgmr.msra.gmra.mrb[40].mxu0 %v3278_v38 }
0x1fbe   :  { %v3964_v42 = vpop.f32.mrb[40].mxu0 }
0x1fbf   :  { %v3965_v43 = vpop.f32.mrb[41].mxu0 }
0x1fc0   :  { %v3966_v46 = vadd.f32 %v3965_v43, %v3964_v42  ;;  %v3967_v48 = vpop.f32.mrb[42].mxu0 }
0x1fc1   :  { %v3968_v50 = vpop.f32.mrb[43].mxu0 }
0x1fc2   :  { %v3448_v51 = vadd.f32 %v3966_v46, %v6034_v13 }
0x1fc4   :  { %v3456_v52 = vadd.f32 %v3838_v49, %v3448_v51 }
0x1fc6   :  { %v3457_v53 = vpack.c.bf16 %v3456_v52, %v3456_v52 }
0x1fc8   :  { %4188 = vmatmul.mubr.bf16.vlgmr.msra.gmra.mrb[60].mxu1 %v3457_v53 }
0x209b   :  { %v3563_v55 = vpop.f32.mrb[60].mxu1 }
0x209c   :  { %v3564_v15 = vadd.f32 %v3839_v54, %v3563_v55  ;;  %v4189_v36 = vpop.f32.mrb[61].mxu1 }
0x209d   :  { %v3566_v33 = vpop.f32.mrb[62].mxu1 }
0x209e   :  { %3569 = vst [vmem:[%s5462_s6] sm:$0xff] %v3564_v15  ;;  %v4190_v45 = vpop.f32.mrb[63].mxu1 }
0x209f   :  { %3574 = vsyncpa [#allocation3], 1 }
0x20a0   :  { %3575 = vsyncpa [#allocation5], 1 }
0x20a1   :  { %3576 = vsyncpa [#allocation8], 1 }
0x20a2   :  { %3577 = vsyncpa [#allocation11], 1 }
0x20a3   :  { %3578 = vsyncpa [#allocation14], 1 }
0x20a4   :  { %3579 = vsyncpa [#allocation17], 1 }
0x20a5   :  { %3580 = vsyncpa [#allocation20], 1 }
0x20a6   :  { %3581 = vsyncpa [#allocation23], 1 }
0x20a7   :  { %3582 = vsyncpa [#allocation26], 1 }
0x20a8   :  { %3583 = vsyncpa [#allocation29], 1 }
0x20a9   :  { %3584 = vsyncpa [#allocation32], 1 }
0x20aa   :  { %3585 = vsyncpa [#allocation35], 1 }
0x20ab   :  { %3586 = vsyncpa [#allocation38], 1 }
0x20ac   :  { %3587 = vsyncpa [#allocation41], 1 }

</bundles_post_ra>
